<compile_context>
chip_gen: v5e
topology: v5e:2x2
jax: 0.10.0
libtpu: 0.0.40
codegen_flags: <defaults>
</compile_context>

<pallas_src>
import functools

import jax
import jax.numpy as jnp
from jax.experimental import pallas as pl
from jax.experimental.pallas import tpu as pltpu

LANE = 128


def _round_up(n, m=LANE):
    return ((n + m - 1) // m) * m


# -----------------------------------------------------------------------------
# The fused kernel: encoder + embedding + LSTM + output projection + length mask.
# Single invocation (no grid); every operand is a whole-array VMEM block.
# -----------------------------------------------------------------------------
def _captioning_kernel(pat_ref, wc_ref, bc_ref, wf_ref, bf_ref, tbl_ref, cap_ref,
                       len_ref, wih_ref, bih_ref, whh_ref, wout_ref, bout_ref,
                       out_ref, *, B, HW, T, HP):
    T1 = T + 1
    CP = wc_ref.shape[1]          # conv channels, padded to 128
    VP = tbl_ref.shape[0]         # vocab, padded to 128

    # ---------------- Encoder: conv(3x3 as im2col matmul) + ReLU + global avg pool + FC ------
    conv = jnp.dot(pat_ref[...], wc_ref[...], preferred_element_type=jnp.float32)
    conv = jnp.maximum(conv + bc_ref[...], 0.0)                          # (B*HW, CP)

    # Per-image global average pool, assembled into a (B, CP) batch with an iota select
    # (avoids in-kernel concatenate; B is tiny and static).
    row_b = jax.lax.broadcasted_iota(jnp.int32, (B, CP), 0)
    pooled = jnp.zeros((B, CP), jnp.float32)
    for b in range(B):
        mean_b = jnp.mean(conv[b * HW:(b + 1) * HW, :], axis=0, keepdims=True)   # (1, CP)
        pooled = pooled + jnp.where(row_b == b, mean_b, 0.0)
    feat = jnp.dot(pooled.astype(jnp.bfloat16), wf_ref[...],
                   preferred_element_type=jnp.float32) + bf_ref[...]     # (B, EP)

    # ---------------- Decoder: embedding lookup as one-hot matmul (in-kernel gather) ---------
    ids = cap_ref[...]                                                   # (T*B, 1) int32, time-major
    oh = (ids == jax.lax.broadcasted_iota(jnp.int32, (T * B, VP), 1)).astype(jnp.bfloat16)
    embeds = jnp.dot(oh, tbl_ref[...], preferred_element_type=jnp.float32)        # (T*B, EP)

    # Hoisted LSTM input projection (x @ W_ih + b) for all timesteps; only h @ W_hh stays in
    # the recurrence.  b_ih stands for PyTorch's b_ih + b_hh combined.
    w_ih = wih_ref[...]
    b_ih = bih_ref[...]
    xw_feat = jnp.dot(feat.astype(jnp.bfloat16), w_ih,
                      preferred_element_type=jnp.float32) + b_ih         # (B, 4HP)   t = 0
    xw_emb = jnp.dot(embeds.astype(jnp.bfloat16), w_ih,
                     preferred_element_type=jnp.float32) + b_ih          # (T*B, 4HP) t = 1..T

    # ---------------- LSTM recurrence (statically unrolled) + fused output proj + mask -------
    # Gate order matches PyTorch nn.LSTM: [i | f | g | o], each gate padded to HP=128 lanes.
    whh = whh_ref[...]
    wout = wout_ref[...]
    bout = bout_ref[...]
    lens = len_ref[...]                                                  # (B, 1) int32
    h = jnp.zeros((B, HP), jnp.float32)
    c = jnp.zeros((B, HP), jnp.float32)
    for t in range(T1):
        xw_t = xw_feat if t == 0 else xw_emb[(t - 1) * B:t * B, :]
        gates = xw_t + jnp.dot(h.astype(jnp.bfloat16), whh,
                               preferred_element_type=jnp.float32)       # (B, 4HP)
        i_g = jax.nn.sigmoid(gates[:, 0:HP])
        f_g = jax.nn.sigmoid(gates[:, HP:2 * HP])
        g_g = jnp.tanh(gates[:, 2 * HP:3 * HP])
        o_g = jax.nn.sigmoid(gates[:, 3 * HP:4 * HP])
        c = f_g * c + i_g * g_g
        h = o_g * jnp.tanh(c)
        logit = jnp.dot(h.astype(jnp.bfloat16), wout,
                        preferred_element_type=jnp.float32) + bout       # (B, VP)
        mask = (lens > t).astype(jnp.float32)                            # (B, 1): t < lengths[b]
        out_ref[t * B:(t + 1) * B, :] = (logit * mask).astype(out_ref.dtype)


# -----------------------------------------------------------------------------
# Parameters: logical-size init (matches the PyTorch module), then zero-padding of
# every matmul dimension to 128 lanes so all kernel matmuls / stores are lane-dense.
# -----------------------------------------------------------------------------
def init_params(key, *, C=4, conv_out=8, embed=32, hidden=32, vocab=64):
    ks = jax.random.split(key, 10)
    s = 0.1
    return {
        # encoder
        "w_conv": s * jax.random.normal(ks[0], (conv_out, C, 3, 3), jnp.float32),
        "b_conv": s * jax.random.normal(ks[1], (conv_out,), jnp.float32),
        "w_fc": s * jax.random.normal(ks[2], (conv_out, embed), jnp.float32),
        "b_fc": s * jax.random.normal(ks[3], (embed,), jnp.float32),
        # decoder (b_lstm corresponds to PyTorch's b_ih + b_hh summed together)
        "embed_tbl": s * jax.random.normal(ks[4], (vocab, embed), jnp.float32),
        "w_ih": s * jax.random.normal(ks[5], (embed, 4 * hidden), jnp.float32),
        "w_hh": s * jax.random.normal(ks[6], (hidden, 4 * hidden), jnp.float32),
        "b_lstm": s * jax.random.normal(ks[7], (4 * hidden,), jnp.float32),
        "w_out": s * jax.random.normal(ks[8], (hidden, vocab), jnp.float32),
        "b_out": s * jax.random.normal(ks[9], (vocab,), jnp.float32),
    }


def _pad2(a, rows, cols):
    return jnp.pad(a, ((0, rows - a.shape[0]), (0, cols - a.shape[1])))


def _pad_gate_cols(w, h, hp):
    """Pad each of the 4 PyTorch gate blocks [i|f|g|o] along the last dim from h to hp."""
    lead = w.shape[:-1]
    w4 = w.reshape(lead + (4, h))
    w4 = jnp.pad(w4, [(0, 0)] * len(lead) + [(0, 0), (0, hp - h)])
    return w4.reshape(lead + (4 * hp,))


def prepare_params(p):
    conv_out, C = p["w_conv"].shape[:2]
    K = C * 9
    E = p["w_fc"].shape[1]
    Hd = p["w_hh"].shape[0]
    V = p["w_out"].shape[1]
    Kp, CP, EP, HP, VP = map(_round_up, (K, conv_out, E, Hd, V))

    w_conv_mat = p["w_conv"].reshape(conv_out, K).T   # (C*9, conv_out), matches im2col ordering
    return {
        "w_conv": _pad2(w_conv_mat, Kp, CP).astype(jnp.bfloat16),
        "b_conv": jnp.pad(p["b_conv"], (0, CP - conv_out)).reshape(1, CP),
        "w_fc": _pad2(p["w_fc"], CP, EP).astype(jnp.bfloat16),
        "b_fc": jnp.pad(p["b_fc"], (0, EP - E)).reshape(1, EP),
        "embed_tbl": _pad2(p["embed_tbl"], VP, EP).astype(jnp.bfloat16),
        "w_ih": _pad2(_pad_gate_cols(p["w_ih"], Hd, HP), EP, 4 * HP).astype(jnp.bfloat16),
        "b_lstm": _pad_gate_cols(p["b_lstm"], Hd, HP).reshape(1, 4 * HP),
        "w_hh": _pad2(_pad_gate_cols(p["w_hh"], Hd, HP), HP, 4 * HP).astype(jnp.bfloat16),
        "w_out": _pad2(p["w_out"], HP, VP).astype(jnp.bfloat16),
        "b_out": jnp.pad(p["b_out"], (0, VP - V)).reshape(1, VP),
        "vocab": V,
        "im2col_k": K,
    }


# -----------------------------------------------------------------------------
# Wrapper: tiny XLA glue (im2col patches, int reshapes, final transpose/slice) around
# the single fused pallas_call.
# -----------------------------------------------------------------------------
def image_captioning_forward(pp, images, captions, lengths):
    B, C, H, W = images.shape
    T = captions.shape[1]
    T1 = T + 1
    HW = H * W
    K = pp["im2col_k"]
    Kp, _ = pp["w_conv"].shape
    HP = pp["w_hh"].shape[0]
    VP = pp["w_out"].shape[1]
    V = pp["vocab"]

    # im2col for the 3x3 / pad-1 conv, zero-padded to a lane-dense (128) contraction dim.
    xp = jnp.pad(images, ((0, 0), (0, 0), (1, 1), (1, 1)))
    pats = [xp[:, :, kh:kh + H, kw:kw + W] for kh in range(3) for kw in range(3)]
    pat = jnp.stack(pats, axis=-1).transpose(0, 2, 3, 1, 4).reshape(B, HW, K)
    pat = jnp.pad(pat, ((0, 0), (0, 0), (0, Kp - K)))
    pat = pat.astype(jnp.bfloat16).reshape(B * HW, Kp)
    # TODO(synk): for larger images, assemble the 3x3 patches in-kernel from a padded
    # (C, H+2, W+2) image (halo loads) to avoid the 9x im2col HBM expansion.

    cap_tm = captions.astype(jnp.int32).T.reshape(T * B, 1)   # time-major token ids
    len_col = lengths.astype(jnp.int32).reshape(B, 1)

    kernel = functools.partial(_captioning_kernel, B=B, HW=HW, T=T, HP=HP)
    n_in = 13
    logits = pl.pallas_call(
        kernel,
        out_shape=jax.ShapeDtypeStruct((T1 * B, VP), jnp.float32),
        in_specs=[pl.BlockSpec(memory_space=pltpu.MemorySpace.VMEM)] * n_in,
        out_specs=pl.BlockSpec(memory_space=pltpu.MemorySpace.VMEM),
    )(pat, pp["w_conv"], pp["b_conv"], pp["w_fc"], pp["b_fc"], pp["embed_tbl"],
      cap_tm, len_col, pp["w_ih"], pp["b_lstm"], pp["w_hh"], pp["w_out"], pp["b_out"])

    # (T1*B, VP) time-major -> (B, T+1, vocab).
    # TODO(synk): PyTorch pack_padded_sequence flattens valid steps to (sum(lengths), vocab);
    # here we return the padded (B, T+1, vocab) tensor with invalid steps masked to 0.
    return logits.reshape(T1, B, VP).transpose(1, 0, 2)[:, :, :V]


# -----------------------------------------------------------------------------
# Pure-JAX reference (f32) used as a correctness check of the kernel path.
# -----------------------------------------------------------------------------
def reference_forward(p, images, captions, lengths):
    B = images.shape[0]
    T = captions.shape[1]
    conv = jax.lax.conv_general_dilated(
        images, p["w_conv"], window_strides=(1, 1), padding="SAME",
        dimension_numbers=("NCHW", "OIHW", "NCHW"))
    conv = jax.nn.relu(conv + p["b_conv"][None, :, None, None])
    pooled = conv.mean(axis=(2, 3))                              # (B, conv_out)
    feat = pooled @ p["w_fc"] + p["b_fc"]                        # (B, E)

    emb = p["embed_tbl"][captions]                               # (B, T, E)
    seq = jnp.concatenate([feat[:, None, :], emb], axis=1)       # (B, T+1, E)
    Hd = p["w_hh"].shape[0]
    h = jnp.zeros((B, Hd), jnp.float32)
    c = jnp.zeros((B, Hd), jnp.float32)
    outs = []
    for t in range(T + 1):
        gates = seq[:, t, :] @ p["w_ih"] + p["b_lstm"] + h @ p["w_hh"]
        i_g, f_g, g_g, o_g = jnp.split(gates, 4, axis=-1)
        i_g, f_g, o_g = jax.nn.sigmoid(i_g), jax.nn.sigmoid(f_g), jax.nn.sigmoid(o_g)
        g_g = jnp.tanh(g_g)
        c = f_g * c + i_g * g_g
        h = o_g * jnp.tanh(c)
        outs.append(h @ p["w_out"] + p["b_out"])
    out = jnp.stack(outs, axis=1)                                # (B, T+1, V)
    mask = (jnp.arange(T + 1)[None, :] < lengths[:, None]).astype(out.dtype)
    return out * mask[:, :, None]


if __name__ == "__main__":
    key = jax.random.PRNGKey(0)
    k_img, k_cap, k_par = jax.random.split(key, 3)

    B, C, H, W = 2, 4, 16, 16
    T, VOCAB = 8, 64
    EMBED, HIDDEN = 32, 32

    images = jax.random.normal(k_img, (B, C, H, W), jnp.float32)
    captions = jax.random.randint(k_cap, (B, T), 0, VOCAB, dtype=jnp.int32)
    lengths = jnp.array([T + 1, T - 1], jnp.int32)

    params = init_params(k_par, C=C, conv_out=8, embed=EMBED, hidden=HIDDEN, vocab=VOCAB)
    pp = prepare_params(params)

    fwd = jax.jit(lambda im, cap, ln: image_captioning_forward(pp, im, cap, ln))
    outputs = fwd(images, captions, lengths)
    jax.block_until_ready(outputs)
    assert outputs.shape == (B, T + 1, VOCAB)

    ref = reference_forward(params, images, captions, lengths)
    err = float(jnp.max(jnp.abs(outputs - ref)))
    assert err < 2e-2, f"max abs error vs reference: {err}"
    print("KERNEL_OK")
</pallas_src>

<mosaic_0001>
module attributes {stable_mosaic.version = 11 : i64} {
  func.func @_captioning_kernel(%arg0: memref<512x128xbf16, #tpu.memory_space<vmem>>, %arg1: memref<128x128xbf16, #tpu.memory_space<vmem>>, %arg2: memref<1x128xf32, #tpu.memory_space<vmem>>, %arg3: memref<128x128xbf16, #tpu.memory_space<vmem>>, %arg4: memref<1x128xf32, #tpu.memory_space<vmem>>, %arg5: memref<128x128xbf16, #tpu.memory_space<vmem>>, %arg6: memref<16x1xi32, #tpu.memory_space<vmem>>, %arg7: memref<2x1xi32, #tpu.memory_space<vmem>>, %arg8: memref<128x512xbf16, #tpu.memory_space<vmem>>, %arg9: memref<1x512xf32, #tpu.memory_space<vmem>>, %arg10: memref<128x512xbf16, #tpu.memory_space<vmem>>, %arg11: memref<128x128xbf16, #tpu.memory_space<vmem>>, %arg12: memref<1x128xf32, #tpu.memory_space<vmem>>, %arg13: memref<18x128xf32, #tpu.memory_space<vmem>>) attributes {dimension_semantics = [], scalar_prefetch = 0 : i64, scratch_operands = 0 : i64, tpu.core_type = #tpu.core_type<tc>} {
    %c0 = arith.constant 0 : index
    %c0_0 = arith.constant 0 : index
    %0 = vector.load %arg0[%c0, %c0_0] : memref<512x128xbf16, #tpu.memory_space<vmem>>, vector<512x128xbf16>
    %c0_1 = arith.constant 0 : index
    %c0_2 = arith.constant 0 : index
    %1 = vector.load %arg1[%c0_1, %c0_2] : memref<128x128xbf16, #tpu.memory_space<vmem>>, vector<128x128xbf16>
    %cst = arith.constant dense<0.000000e+00> : vector<512x128xf32>
    %2 = tpu.matmul %0, %1, %cst {dimension_numbers = #tpu.dot_dimension_numbers<[1], [0], [0], [1], [0, 0, 1, 1], [], []>} : vector<512x128xbf16>, vector<128x128xbf16>, vector<512x128xf32> -> vector<512x128xf32>
    %c0_3 = arith.constant 0 : index
    %c0_4 = arith.constant 0 : index
    %3 = vector.load %arg2[%c0_3, %c0_4] : memref<1x128xf32, #tpu.memory_space<vmem>>, vector<1x128xf32>
    %4 = vector.broadcast %3 : vector<1x128xf32> to vector<512x128xf32>
    %5 = arith.addf %2, %4 : vector<512x128xf32>
    %cst_5 = arith.constant 0.000000e+00 : f32
    %6 = vector.broadcast %cst_5 : f32 to vector<512x128xf32>
    %7 = arith.maximumf %5, %6 : vector<512x128xf32>
    %8 = tpu.iota {dimensions = array<i32: 0>} : vector<2x128xi32>
    %cst_6 = arith.constant 0.000000e+00 : f32
    %9 = vector.broadcast %cst_6 : f32 to vector<2x128xf32>
    %10 = vector.extract_strided_slice %7 {offsets = [0, 0], sizes = [256, 128], strides = [1, 1]} : vector<512x128xf32> to vector<256x128xf32>
    %cst_7 = arith.constant dense<0.000000e+00> : vector<128xf32>
    %11 = vector.multi_reduction <add>, %10, %cst_7 [0] : vector<256x128xf32> to vector<128xf32>
    %12 = vector.shape_cast %11 : vector<128xf32> to vector<1x128xf32>
    %cst_8 = arith.constant 2.560000e+02 : f32
    %13 = vector.broadcast %cst_8 : f32 to vector<1x128xf32>
    %14 = arith.divf %12, %13 : vector<1x128xf32>
    %c0_i32 = arith.constant 0 : i32
    %15 = vector.broadcast %c0_i32 : i32 to vector<2x128xi32>
    %16 = arith.cmpi eq, %8, %15 : vector<2x128xi32>
    %cst_9 = arith.constant 0.000000e+00 : f32
    %17 = vector.shape_cast %14 : vector<1x128xf32> to vector<1x128xf32>
    %18 = vector.broadcast %17 : vector<1x128xf32> to vector<2x128xf32>
    %19 = vector.broadcast %cst_9 : f32 to vector<2x128xf32>
    %20 = arith.select %16, %18, %19 : vector<2x128xi1>, vector<2x128xf32>
    %21 = arith.addf %9, %20 : vector<2x128xf32>
    %22 = vector.extract_strided_slice %7 {offsets = [256, 0], sizes = [256, 128], strides = [1, 1]} : vector<512x128xf32> to vector<256x128xf32>
    %cst_10 = arith.constant dense<0.000000e+00> : vector<128xf32>
    %23 = vector.multi_reduction <add>, %22, %cst_10 [0] : vector<256x128xf32> to vector<128xf32>
    %24 = vector.shape_cast %23 : vector<128xf32> to vector<1x128xf32>
    %cst_11 = arith.constant 2.560000e+02 : f32
    %25 = vector.broadcast %cst_11 : f32 to vector<1x128xf32>
    %26 = arith.divf %24, %25 : vector<1x128xf32>
    %c1_i32 = arith.constant 1 : i32
    %27 = vector.broadcast %c1_i32 : i32 to vector<2x128xi32>
    %28 = arith.cmpi eq, %8, %27 : vector<2x128xi32>
    %cst_12 = arith.constant 0.000000e+00 : f32
    %29 = vector.shape_cast %26 : vector<1x128xf32> to vector<1x128xf32>
    %30 = vector.broadcast %29 : vector<1x128xf32> to vector<2x128xf32>
    %31 = vector.broadcast %cst_12 : f32 to vector<2x128xf32>
    %32 = arith.select %28, %30, %31 : vector<2x128xi1>, vector<2x128xf32>
    %33 = arith.addf %21, %32 : vector<2x128xf32>
    %34 = arith.truncf %33 : vector<2x128xf32> to vector<2x128xbf16>
    %c0_13 = arith.constant 0 : index
    %c0_14 = arith.constant 0 : index
    %35 = vector.load %arg3[%c0_13, %c0_14] : memref<128x128xbf16, #tpu.memory_space<vmem>>, vector<128x128xbf16>
    %cst_15 = arith.constant dense<0.000000e+00> : vector<2x128xf32>
    %36 = tpu.matmul %34, %35, %cst_15 {dimension_numbers = #tpu.dot_dimension_numbers<[1], [0], [0], [1], [0, 0, 1, 1], [], []>} : vector<2x128xbf16>, vector<128x128xbf16>, vector<2x128xf32> -> vector<2x128xf32>
    %c0_16 = arith.constant 0 : index
    %c0_17 = arith.constant 0 : index
    %37 = vector.load %arg4[%c0_16, %c0_17] : memref<1x128xf32, #tpu.memory_space<vmem>>, vector<1x128xf32>
    %38 = vector.broadcast %37 : vector<1x128xf32> to vector<2x128xf32>
    %39 = arith.addf %36, %38 : vector<2x128xf32>
    %c0_18 = arith.constant 0 : index
    %c0_19 = arith.constant 0 : index
    %40 = vector.load %arg6[%c0_18, %c0_19] : memref<16x1xi32, #tpu.memory_space<vmem>>, vector<16x1xi32>
    %41 = tpu.iota {dimensions = array<i32: 1>} : vector<16x128xi32>
    %42 = vector.broadcast %40 : vector<16x1xi32> to vector<16x128xi32>
    %43 = arith.cmpi eq, %42, %41 : vector<16x128xi32>
    %44 = arith.extui %43 : vector<16x128xi1> to vector<16x128xi32>
    %45 = arith.sitofp %44 : vector<16x128xi32> to vector<16x128xf32>
    %46 = arith.truncf %45 : vector<16x128xf32> to vector<16x128xbf16>
    %c0_20 = arith.constant 0 : index
    %c0_21 = arith.constant 0 : index
    %47 = vector.load %arg5[%c0_20, %c0_21] : memref<128x128xbf16, #tpu.memory_space<vmem>>, vector<128x128xbf16>
    %cst_22 = arith.constant dense<0.000000e+00> : vector<16x128xf32>
    %48 = tpu.matmul %46, %47, %cst_22 {dimension_numbers = #tpu.dot_dimension_numbers<[1], [0], [0], [1], [0, 0, 1, 1], [], []>} : vector<16x128xbf16>, vector<128x128xbf16>, vector<16x128xf32> -> vector<16x128xf32>
    %c0_23 = arith.constant 0 : index
    %c0_24 = arith.constant 0 : index
    %49 = vector.load %arg8[%c0_23, %c0_24] : memref<128x512xbf16, #tpu.memory_space<vmem>>, vector<128x512xbf16>
    %c0_25 = arith.constant 0 : index
    %c0_26 = arith.constant 0 : index
    %50 = vector.load %arg9[%c0_25, %c0_26] : memref<1x512xf32, #tpu.memory_space<vmem>>, vector<1x512xf32>
    %51 = arith.truncf %39 : vector<2x128xf32> to vector<2x128xbf16>
    %cst_27 = arith.constant dense<0.000000e+00> : vector<2x512xf32>
    %52 = tpu.matmul %51, %49, %cst_27 {dimension_numbers = #tpu.dot_dimension_numbers<[1], [0], [0], [1], [0, 0, 1, 1], [], []>} : vector<2x128xbf16>, vector<128x512xbf16>, vector<2x512xf32> -> vector<2x512xf32>
    %53 = vector.broadcast %50 : vector<1x512xf32> to vector<2x512xf32>
    %54 = arith.addf %52, %53 : vector<2x512xf32>
    %55 = arith.truncf %48 : vector<16x128xf32> to vector<16x128xbf16>
    %cst_28 = arith.constant dense<0.000000e+00> : vector<16x512xf32>
    %56 = tpu.matmul %55, %49, %cst_28 {dimension_numbers = #tpu.dot_dimension_numbers<[1], [0], [0], [1], [0, 0, 1, 1], [], []>} : vector<16x128xbf16>, vector<128x512xbf16>, vector<16x512xf32> -> vector<16x512xf32>
    %57 = vector.broadcast %50 : vector<1x512xf32> to vector<16x512xf32>
    %58 = arith.addf %56, %57 : vector<16x512xf32>
    %c0_29 = arith.constant 0 : index
    %c0_30 = arith.constant 0 : index
    %59 = vector.load %arg10[%c0_29, %c0_30] : memref<128x512xbf16, #tpu.memory_space<vmem>>, vector<128x512xbf16>
    %c0_31 = arith.constant 0 : index
    %c0_32 = arith.constant 0 : index
    %60 = vector.load %arg11[%c0_31, %c0_32] : memref<128x128xbf16, #tpu.memory_space<vmem>>, vector<128x128xbf16>
    %c0_33 = arith.constant 0 : index
    %c0_34 = arith.constant 0 : index
    %61 = vector.load %arg12[%c0_33, %c0_34] : memref<1x128xf32, #tpu.memory_space<vmem>>, vector<1x128xf32>
    %c0_35 = arith.constant 0 : index
    %c0_36 = arith.constant 0 : index
    %62 = vector.load %arg7[%c0_35, %c0_36] : memref<2x1xi32, #tpu.memory_space<vmem>>, vector<2x1xi32>
    %cst_37 = arith.constant 0.000000e+00 : f32
    %63 = vector.broadcast %cst_37 : f32 to vector<2x128xf32>
    %cst_38 = arith.constant 0.000000e+00 : f32
    %64 = vector.broadcast %cst_38 : f32 to vector<2x128xf32>
    %65 = arith.truncf %63 : vector<2x128xf32> to vector<2x128xbf16>
    %cst_39 = arith.constant dense<0.000000e+00> : vector<2x512xf32>
    %66 = tpu.matmul %65, %59, %cst_39 {dimension_numbers = #tpu.dot_dimension_numbers<[1], [0], [0], [1], [0, 0, 1, 1], [], []>} : vector<2x128xbf16>, vector<128x512xbf16>, vector<2x512xf32> -> vector<2x512xf32>
    %67 = arith.addf %54, %66 : vector<2x512xf32>
    %68 = vector.extract_strided_slice %67 {offsets = [0, 0], sizes = [2, 128], strides = [1, 1]} : vector<2x512xf32> to vector<2x128xf32>
    %69 = arith.negf %68 : vector<2x128xf32>
    %70 = math.exp %69 : vector<2x128xf32>
    %cst_40 = arith.constant 1.000000e+00 : f32
    %71 = vector.broadcast %cst_40 : f32 to vector<2x128xf32>
    %72 = arith.addf %71, %70 : vector<2x128xf32>
    %73 = arith.divf %71, %72 : vector<2x128xf32>
    %74 = vector.extract_strided_slice %67 {offsets = [0, 128], sizes = [2, 128], strides = [1, 1]} : vector<2x512xf32> to vector<2x128xf32>
    %75 = arith.negf %74 : vector<2x128xf32>
    %76 = math.exp %75 : vector<2x128xf32>
    %cst_41 = arith.constant 1.000000e+00 : f32
    %77 = vector.broadcast %cst_41 : f32 to vector<2x128xf32>
    %78 = arith.addf %77, %76 : vector<2x128xf32>
    %79 = arith.divf %77, %78 : vector<2x128xf32>
    %80 = vector.extract_strided_slice %67 {offsets = [0, 256], sizes = [2, 128], strides = [1, 1]} : vector<2x512xf32> to vector<2x128xf32>
    %81 = math.tanh %80 : vector<2x128xf32>
    %82 = vector.extract_strided_slice %67 {offsets = [0, 384], sizes = [2, 128], strides = [1, 1]} : vector<2x512xf32> to vector<2x128xf32>
    %83 = arith.negf %82 : vector<2x128xf32>
    %84 = math.exp %83 : vector<2x128xf32>
    %cst_42 = arith.constant 1.000000e+00 : f32
    %85 = vector.broadcast %cst_42 : f32 to vector<2x128xf32>
    %86 = arith.addf %85, %84 : vector<2x128xf32>
    %87 = arith.divf %85, %86 : vector<2x128xf32>
    %88 = arith.mulf %79, %64 : vector<2x128xf32>
    %89 = arith.mulf %73, %81 : vector<2x128xf32>
    %90 = arith.addf %88, %89 : vector<2x128xf32>
    %91 = math.tanh %90 : vector<2x128xf32>
    %92 = arith.mulf %87, %91 : vector<2x128xf32>
    %93 = arith.truncf %92 : vector<2x128xf32> to vector<2x128xbf16>
    %cst_43 = arith.constant dense<0.000000e+00> : vector<2x128xf32>
    %94 = tpu.matmul %93, %60, %cst_43 {dimension_numbers = #tpu.dot_dimension_numbers<[1], [0], [0], [1], [0, 0, 1, 1], [], []>} : vector<2x128xbf16>, vector<128x128xbf16>, vector<2x128xf32> -> vector<2x128xf32>
    %95 = vector.broadcast %61 : vector<1x128xf32> to vector<2x128xf32>
    %96 = arith.addf %94, %95 : vector<2x128xf32>
    %c0_i32_44 = arith.constant 0 : i32
    %97 = vector.broadcast %c0_i32_44 : i32 to vector<2x1xi32>
    %98 = arith.cmpi sgt, %62, %97 : vector<2x1xi32>
    %99 = arith.extui %98 : vector<2x1xi1> to vector<2x1xi32>
    %100 = arith.sitofp %99 : vector<2x1xi32> to vector<2x1xf32>
    %101 = vector.broadcast %100 : vector<2x1xf32> to vector<2x128xf32>
    %102 = arith.mulf %96, %101 : vector<2x128xf32>
    %c0_45 = arith.constant 0 : index
    %c0_46 = arith.constant 0 : index
    %103 = vector.load %arg13[%c0_45, %c0_46] : memref<18x128xf32, #tpu.memory_space<vmem>>, vector<2x128xf32>
    tpu.vector_store %arg13[%c0_45, %c0_46], %102 {strides = array<i32>} : memref<18x128xf32, #tpu.memory_space<vmem>>, vector<2x128xf32>,
    %104 = vector.extract_strided_slice %58 {offsets = [0, 0], sizes = [2, 512], strides = [1, 1]} : vector<16x512xf32> to vector<2x512xf32>
    %105 = arith.truncf %92 : vector<2x128xf32> to vector<2x128xbf16>
    %cst_47 = arith.constant dense<0.000000e+00> : vector<2x512xf32>
    %106 = tpu.matmul %105, %59, %cst_47 {dimension_numbers = #tpu.dot_dimension_numbers<[1], [0], [0], [1], [0, 0, 1, 1], [], []>} : vector<2x128xbf16>, vector<128x512xbf16>, vector<2x512xf32> -> vector<2x512xf32>
    %107 = arith.addf %104, %106 : vector<2x512xf32>
    %108 = vector.extract_strided_slice %107 {offsets = [0, 0], sizes = [2, 128], strides = [1, 1]} : vector<2x512xf32> to vector<2x128xf32>
    %109 = arith.negf %108 : vector<2x128xf32>
    %110 = math.exp %109 : vector<2x128xf32>
    %cst_48 = arith.constant 1.000000e+00 : f32
    %111 = vector.broadcast %cst_48 : f32 to vector<2x128xf32>
    %112 = arith.addf %111, %110 : vector<2x128xf32>
    %113 = arith.divf %111, %112 : vector<2x128xf32>
    %114 = vector.extract_strided_slice %107 {offsets = [0, 128], sizes = [2, 128], strides = [1, 1]} : vector<2x512xf32> to vector<2x128xf32>
    %115 = arith.negf %114 : vector<2x128xf32>
    %116 = math.exp %115 : vector<2x128xf32>
    %cst_49 = arith.constant 1.000000e+00 : f32
    %117 = vector.broadcast %cst_49 : f32 to vector<2x128xf32>
    %118 = arith.addf %117, %116 : vector<2x128xf32>
    %119 = arith.divf %117, %118 : vector<2x128xf32>
    %120 = vector.extract_strided_slice %107 {offsets = [0, 256], sizes = [2, 128], strides = [1, 1]} : vector<2x512xf32> to vector<2x128xf32>
    %121 = math.tanh %120 : vector<2x128xf32>
    %122 = vector.extract_strided_slice %107 {offsets = [0, 384], sizes = [2, 128], strides = [1, 1]} : vector<2x512xf32> to vector<2x128xf32>
    %123 = arith.negf %122 : vector<2x128xf32>
    %124 = math.exp %123 : vector<2x128xf32>
    %cst_50 = arith.constant 1.000000e+00 : f32
    %125 = vector.broadcast %cst_50 : f32 to vector<2x128xf32>
    %126 = arith.addf %125, %124 : vector<2x128xf32>
    %127 = arith.divf %125, %126 : vector<2x128xf32>
    %128 = arith.mulf %119, %90 : vector<2x128xf32>
    %129 = arith.mulf %113, %121 : vector<2x128xf32>
    %130 = arith.addf %128, %129 : vector<2x128xf32>
    %131 = math.tanh %130 : vector<2x128xf32>
    %132 = arith.mulf %127, %131 : vector<2x128xf32>
    %133 = arith.truncf %132 : vector<2x128xf32> to vector<2x128xbf16>
    %cst_51 = arith.constant dense<0.000000e+00> : vector<2x128xf32>
    %134 = tpu.matmul %133, %60, %cst_51 {dimension_numbers = #tpu.dot_dimension_numbers<[1], [0], [0], [1], [0, 0, 1, 1], [], []>} : vector<2x128xbf16>, vector<128x128xbf16>, vector<2x128xf32> -> vector<2x128xf32>
    %135 = vector.broadcast %61 : vector<1x128xf32> to vector<2x128xf32>
    %136 = arith.addf %134, %135 : vector<2x128xf32>
    %c1_i32_52 = arith.constant 1 : i32
    %137 = vector.broadcast %c1_i32_52 : i32 to vector<2x1xi32>
    %138 = arith.cmpi sgt, %62, %137 : vector<2x1xi32>
    %139 = arith.extui %138 : vector<2x1xi1> to vector<2x1xi32>
    %140 = arith.sitofp %139 : vector<2x1xi32> to vector<2x1xf32>
    %141 = vector.broadcast %140 : vector<2x1xf32> to vector<2x128xf32>
    %142 = arith.mulf %136, %141 : vector<2x128xf32>
    %c2 = arith.constant 2 : index
    %c0_53 = arith.constant 0 : index
    %143 = vector.load %arg13[%c2, %c0_53] : memref<18x128xf32, #tpu.memory_space<vmem>>, vector<2x128xf32>
    tpu.vector_store %arg13[%c2, %c0_53], %142 {strides = array<i32>} : memref<18x128xf32, #tpu.memory_space<vmem>>, vector<2x128xf32>,
    %144 = vector.extract_strided_slice %58 {offsets = [2, 0], sizes = [2, 512], strides = [1, 1]} : vector<16x512xf32> to vector<2x512xf32>
    %145 = arith.truncf %132 : vector<2x128xf32> to vector<2x128xbf16>
    %cst_54 = arith.constant dense<0.000000e+00> : vector<2x512xf32>
    %146 = tpu.matmul %145, %59, %cst_54 {dimension_numbers = #tpu.dot_dimension_numbers<[1], [0], [0], [1], [0, 0, 1, 1], [], []>} : vector<2x128xbf16>, vector<128x512xbf16>, vector<2x512xf32> -> vector<2x512xf32>
    %147 = arith.addf %144, %146 : vector<2x512xf32>
    %148 = vector.extract_strided_slice %147 {offsets = [0, 0], sizes = [2, 128], strides = [1, 1]} : vector<2x512xf32> to vector<2x128xf32>
    %149 = arith.negf %148 : vector<2x128xf32>
    %150 = math.exp %149 : vector<2x128xf32>
    %cst_55 = arith.constant 1.000000e+00 : f32
    %151 = vector.broadcast %cst_55 : f32 to vector<2x128xf32>
    %152 = arith.addf %151, %150 : vector<2x128xf32>
    %153 = arith.divf %151, %152 : vector<2x128xf32>
    %154 = vector.extract_strided_slice %147 {offsets = [0, 128], sizes = [2, 128], strides = [1, 1]} : vector<2x512xf32> to vector<2x128xf32>
    %155 = arith.negf %154 : vector<2x128xf32>
    %156 = math.exp %155 : vector<2x128xf32>
    %cst_56 = arith.constant 1.000000e+00 : f32
    %157 = vector.broadcast %cst_56 : f32 to vector<2x128xf32>
    %158 = arith.addf %157, %156 : vector<2x128xf32>
    %159 = arith.divf %157, %158 : vector<2x128xf32>
    %160 = vector.extract_strided_slice %147 {offsets = [0, 256], sizes = [2, 128], strides = [1, 1]} : vector<2x512xf32> to vector<2x128xf32>
    %161 = math.tanh %160 : vector<2x128xf32>
    %162 = vector.extract_strided_slice %147 {offsets = [0, 384], sizes = [2, 128], strides = [1, 1]} : vector<2x512xf32> to vector<2x128xf32>
    %163 = arith.negf %162 : vector<2x128xf32>
    %164 = math.exp %163 : vector<2x128xf32>
    %cst_57 = arith.constant 1.000000e+00 : f32
    %165 = vector.broadcast %cst_57 : f32 to vector<2x128xf32>
    %166 = arith.addf %165, %164 : vector<2x128xf32>
    %167 = arith.divf %165, %166 : vector<2x128xf32>
    %168 = arith.mulf %159, %130 : vector<2x128xf32>
    %169 = arith.mulf %153, %161 : vector<2x128xf32>
    %170 = arith.addf %168, %169 : vector<2x128xf32>
    %171 = math.tanh %170 : vector<2x128xf32>
    %172 = arith.mulf %167, %171 : vector<2x128xf32>
    %173 = arith.truncf %172 : vector<2x128xf32> to vector<2x128xbf16>
    %cst_58 = arith.constant dense<0.000000e+00> : vector<2x128xf32>
    %174 = tpu.matmul %173, %60, %cst_58 {dimension_numbers = #tpu.dot_dimension_numbers<[1], [0], [0], [1], [0, 0, 1, 1], [], []>} : vector<2x128xbf16>, vector<128x128xbf16>, vector<2x128xf32> -> vector<2x128xf32>
    %175 = vector.broadcast %61 : vector<1x128xf32> to vector<2x128xf32>
    %176 = arith.addf %174, %175 : vector<2x128xf32>
    %c2_i32 = arith.constant 2 : i32
    %177 = vector.broadcast %c2_i32 : i32 to vector<2x1xi32>
    %178 = arith.cmpi sgt, %62, %177 : vector<2x1xi32>
    %179 = arith.extui %178 : vector<2x1xi1> to vector<2x1xi32>
    %180 = arith.sitofp %179 : vector<2x1xi32> to vector<2x1xf32>
    %181 = vector.broadcast %180 : vector<2x1xf32> to vector<2x128xf32>
    %182 = arith.mulf %176, %181 : vector<2x128xf32>
    %c4 = arith.constant 4 : index
    %c0_59 = arith.constant 0 : index
    %183 = vector.load %arg13[%c4, %c0_59] : memref<18x128xf32, #tpu.memory_space<vmem>>, vector<2x128xf32>
    tpu.vector_store %arg13[%c4, %c0_59], %182 {strides = array<i32>} : memref<18x128xf32, #tpu.memory_space<vmem>>, vector<2x128xf32>,
    %184 = vector.extract_strided_slice %58 {offsets = [4, 0], sizes = [2, 512], strides = [1, 1]} : vector<16x512xf32> to vector<2x512xf32>
    %185 = arith.truncf %172 : vector<2x128xf32> to vector<2x128xbf16>
    %cst_60 = arith.constant dense<0.000000e+00> : vector<2x512xf32>
    %186 = tpu.matmul %185, %59, %cst_60 {dimension_numbers = #tpu.dot_dimension_numbers<[1], [0], [0], [1], [0, 0, 1, 1], [], []>} : vector<2x128xbf16>, vector<128x512xbf16>, vector<2x512xf32> -> vector<2x512xf32>
    %187 = arith.addf %184, %186 : vector<2x512xf32>
    %188 = vector.extract_strided_slice %187 {offsets = [0, 0], sizes = [2, 128], strides = [1, 1]} : vector<2x512xf32> to vector<2x128xf32>
    %189 = arith.negf %188 : vector<2x128xf32>
    %190 = math.exp %189 : vector<2x128xf32>
    %cst_61 = arith.constant 1.000000e+00 : f32
    %191 = vector.broadcast %cst_61 : f32 to vector<2x128xf32>
    %192 = arith.addf %191, %190 : vector<2x128xf32>
    %193 = arith.divf %191, %192 : vector<2x128xf32>
    %194 = vector.extract_strided_slice %187 {offsets = [0, 128], sizes = [2, 128], strides = [1, 1]} : vector<2x512xf32> to vector<2x128xf32>
    %195 = arith.negf %194 : vector<2x128xf32>
    %196 = math.exp %195 : vector<2x128xf32>
    %cst_62 = arith.constant 1.000000e+00 : f32
    %197 = vector.broadcast %cst_62 : f32 to vector<2x128xf32>
    %198 = arith.addf %197, %196 : vector<2x128xf32>
    %199 = arith.divf %197, %198 : vector<2x128xf32>
    %200 = vector.extract_strided_slice %187 {offsets = [0, 256], sizes = [2, 128], strides = [1, 1]} : vector<2x512xf32> to vector<2x128xf32>
    %201 = math.tanh %200 : vector<2x128xf32>
    %202 = vector.extract_strided_slice %187 {offsets = [0, 384], sizes = [2, 128], strides = [1, 1]} : vector<2x512xf32> to vector<2x128xf32>
    %203 = arith.negf %202 : vector<2x128xf32>
    %204 = math.exp %203 : vector<2x128xf32>
    %cst_63 = arith.constant 1.000000e+00 : f32
    %205 = vector.broadcast %cst_63 : f32 to vector<2x128xf32>
    %206 = arith.addf %205, %204 : vector<2x128xf32>
    %207 = arith.divf %205, %206 : vector<2x128xf32>
    %208 = arith.mulf %199, %170 : vector<2x128xf32>
    %209 = arith.mulf %193, %201 : vector<2x128xf32>
    %210 = arith.addf %208, %209 : vector<2x128xf32>
    %211 = math.tanh %210 : vector<2x128xf32>
    %212 = arith.mulf %207, %211 : vector<2x128xf32>
    %213 = arith.truncf %212 : vector<2x128xf32> to vector<2x128xbf16>
    %cst_64 = arith.constant dense<0.000000e+00> : vector<2x128xf32>
    %214 = tpu.matmul %213, %60, %cst_64 {dimension_numbers = #tpu.dot_dimension_numbers<[1], [0], [0], [1], [0, 0, 1, 1], [], []>} : vector<2x128xbf16>, vector<128x128xbf16>, vector<2x128xf32> -> vector<2x128xf32>
    %215 = vector.broadcast %61 : vector<1x128xf32> to vector<2x128xf32>
    %216 = arith.addf %214, %215 : vector<2x128xf32>
    %c3_i32 = arith.constant 3 : i32
    %217 = vector.broadcast %c3_i32 : i32 to vector<2x1xi32>
    %218 = arith.cmpi sgt, %62, %217 : vector<2x1xi32>
    %219 = arith.extui %218 : vector<2x1xi1> to vector<2x1xi32>
    %220 = arith.sitofp %219 : vector<2x1xi32> to vector<2x1xf32>
    %221 = vector.broadcast %220 : vector<2x1xf32> to vector<2x128xf32>
    %222 = arith.mulf %216, %221 : vector<2x128xf32>
    %c6 = arith.constant 6 : index
    %c0_65 = arith.constant 0 : index
    %223 = vector.load %arg13[%c6, %c0_65] : memref<18x128xf32, #tpu.memory_space<vmem>>, vector<2x128xf32>
    tpu.vector_store %arg13[%c6, %c0_65], %222 {strides = array<i32>} : memref<18x128xf32, #tpu.memory_space<vmem>>, vector<2x128xf32>,
    %224 = vector.extract_strided_slice %58 {offsets = [6, 0], sizes = [2, 512], strides = [1, 1]} : vector<16x512xf32> to vector<2x512xf32>
    %225 = arith.truncf %212 : vector<2x128xf32> to vector<2x128xbf16>
    %cst_66 = arith.constant dense<0.000000e+00> : vector<2x512xf32>
    %226 = tpu.matmul %225, %59, %cst_66 {dimension_numbers = #tpu.dot_dimension_numbers<[1], [0], [0], [1], [0, 0, 1, 1], [], []>} : vector<2x128xbf16>, vector<128x512xbf16>, vector<2x512xf32> -> vector<2x512xf32>
    %227 = arith.addf %224, %226 : vector<2x512xf32>
    %228 = vector.extract_strided_slice %227 {offsets = [0, 0], sizes = [2, 128], strides = [1, 1]} : vector<2x512xf32> to vector<2x128xf32>
    %229 = arith.negf %228 : vector<2x128xf32>
    %230 = math.exp %229 : vector<2x128xf32>
    %cst_67 = arith.constant 1.000000e+00 : f32
    %231 = vector.broadcast %cst_67 : f32 to vector<2x128xf32>
    %232 = arith.addf %231, %230 : vector<2x128xf32>
    %233 = arith.divf %231, %232 : vector<2x128xf32>
    %234 = vector.extract_strided_slice %227 {offsets = [0, 128], sizes = [2, 128], strides = [1, 1]} : vector<2x512xf32> to vector<2x128xf32>
    %235 = arith.negf %234 : vector<2x128xf32>
    %236 = math.exp %235 : vector<2x128xf32>
    %cst_68 = arith.constant 1.000000e+00 : f32
    %237 = vector.broadcast %cst_68 : f32 to vector<2x128xf32>
    %238 = arith.addf %237, %236 : vector<2x128xf32>
    %239 = arith.divf %237, %238 : vector<2x128xf32>
    %240 = vector.extract_strided_slice %227 {offsets = [0, 256], sizes = [2, 128], strides = [1, 1]} : vector<2x512xf32> to vector<2x128xf32>
    %241 = math.tanh %240 : vector<2x128xf32>
    %242 = vector.extract_strided_slice %227 {offsets = [0, 384], sizes = [2, 128], strides = [1, 1]} : vector<2x512xf32> to vector<2x128xf32>
    %243 = arith.negf %242 : vector<2x128xf32>
    %244 = math.exp %243 : vector<2x128xf32>
    %cst_69 = arith.constant 1.000000e+00 : f32
    %245 = vector.broadcast %cst_69 : f32 to vector<2x128xf32>
    %246 = arith.addf %245, %244 : vector<2x128xf32>
    %247 = arith.divf %245, %246 : vector<2x128xf32>
    %248 = arith.mulf %239, %210 : vector<2x128xf32>
    %249 = arith.mulf %233, %241 : vector<2x128xf32>
    %250 = arith.addf %248, %249 : vector<2x128xf32>
    %251 = math.tanh %250 : vector<2x128xf32>
    %252 = arith.mulf %247, %251 : vector<2x128xf32>
    %253 = arith.truncf %252 : vector<2x128xf32> to vector<2x128xbf16>
    %cst_70 = arith.constant dense<0.000000e+00> : vector<2x128xf32>
    %254 = tpu.matmul %253, %60, %cst_70 {dimension_numbers = #tpu.dot_dimension_numbers<[1], [0], [0], [1], [0, 0, 1, 1], [], []>} : vector<2x128xbf16>, vector<128x128xbf16>, vector<2x128xf32> -> vector<2x128xf32>
    %255 = vector.broadcast %61 : vector<1x128xf32> to vector<2x128xf32>
    %256 = arith.addf %254, %255 : vector<2x128xf32>
    %c4_i32 = arith.constant 4 : i32
    %257 = vector.broadcast %c4_i32 : i32 to vector<2x1xi32>
    %258 = arith.cmpi sgt, %62, %257 : vector<2x1xi32>
    %259 = arith.extui %258 : vector<2x1xi1> to vector<2x1xi32>
    %260 = arith.sitofp %259 : vector<2x1xi32> to vector<2x1xf32>
    %261 = vector.broadcast %260 : vector<2x1xf32> to vector<2x128xf32>
    %262 = arith.mulf %256, %261 : vector<2x128xf32>
    %c8 = arith.constant 8 : index
    %c0_71 = arith.constant 0 : index
    %263 = vector.load %arg13[%c8, %c0_71] : memref<18x128xf32, #tpu.memory_space<vmem>>, vector<2x128xf32>
    tpu.vector_store %arg13[%c8, %c0_71], %262 {strides = array<i32>} : memref<18x128xf32, #tpu.memory_space<vmem>>, vector<2x128xf32>,
    %264 = vector.extract_strided_slice %58 {offsets = [8, 0], sizes = [2, 512], strides = [1, 1]} : vector<16x512xf32> to vector<2x512xf32>
    %265 = arith.truncf %252 : vector<2x128xf32> to vector<2x128xbf16>
    %cst_72 = arith.constant dense<0.000000e+00> : vector<2x512xf32>
    %266 = tpu.matmul %265, %59, %cst_72 {dimension_numbers = #tpu.dot_dimension_numbers<[1], [0], [0], [1], [0, 0, 1, 1], [], []>} : vector<2x128xbf16>, vector<128x512xbf16>, vector<2x512xf32> -> vector<2x512xf32>
    %267 = arith.addf %264, %266 : vector<2x512xf32>
    %268 = vector.extract_strided_slice %267 {offsets = [0, 0], sizes = [2, 128], strides = [1, 1]} : vector<2x512xf32> to vector<2x128xf32>
    %269 = arith.negf %268 : vector<2x128xf32>
    %270 = math.exp %269 : vector<2x128xf32>
    %cst_73 = arith.constant 1.000000e+00 : f32
    %271 = vector.broadcast %cst_73 : f32 to vector<2x128xf32>
    %272 = arith.addf %271, %270 : vector<2x128xf32>
    %273 = arith.divf %271, %272 : vector<2x128xf32>
    %274 = vector.extract_strided_slice %267 {offsets = [0, 128], sizes = [2, 128], strides = [1, 1]} : vector<2x512xf32> to vector<2x128xf32>
    %275 = arith.negf %274 : vector<2x128xf32>
    %276 = math.exp %275 : vector<2x128xf32>
    %cst_74 = arith.constant 1.000000e+00 : f32
    %277 = vector.broadcast %cst_74 : f32 to vector<2x128xf32>
    %278 = arith.addf %277, %276 : vector<2x128xf32>
    %279 = arith.divf %277, %278 : vector<2x128xf32>
    %280 = vector.extract_strided_slice %267 {offsets = [0, 256], sizes = [2, 128], strides = [1, 1]} : vector<2x512xf32> to vector<2x128xf32>
    %281 = math.tanh %280 : vector<2x128xf32>
    %282 = vector.extract_strided_slice %267 {offsets = [0, 384], sizes = [2, 128], strides = [1, 1]} : vector<2x512xf32> to vector<2x128xf32>
    %283 = arith.negf %282 : vector<2x128xf32>
    %284 = math.exp %283 : vector<2x128xf32>
    %cst_75 = arith.constant 1.000000e+00 : f32
    %285 = vector.broadcast %cst_75 : f32 to vector<2x128xf32>
    %286 = arith.addf %285, %284 : vector<2x128xf32>
    %287 = arith.divf %285, %286 : vector<2x128xf32>
    %288 = arith.mulf %279, %250 : vector<2x128xf32>
    %289 = arith.mulf %273, %281 : vector<2x128xf32>
    %290 = arith.addf %288, %289 : vector<2x128xf32>
    %291 = math.tanh %290 : vector<2x128xf32>
    %292 = arith.mulf %287, %291 : vector<2x128xf32>
    %293 = arith.truncf %292 : vector<2x128xf32> to vector<2x128xbf16>
    %cst_76 = arith.constant dense<0.000000e+00> : vector<2x128xf32>
    %294 = tpu.matmul %293, %60, %cst_76 {dimension_numbers = #tpu.dot_dimension_numbers<[1], [0], [0], [1], [0, 0, 1, 1], [], []>} : vector<2x128xbf16>, vector<128x128xbf16>, vector<2x128xf32> -> vector<2x128xf32>
    %295 = vector.broadcast %61 : vector<1x128xf32> to vector<2x128xf32>
    %296 = arith.addf %294, %295 : vector<2x128xf32>
    %c5_i32 = arith.constant 5 : i32
    %297 = vector.broadcast %c5_i32 : i32 to vector<2x1xi32>
    %298 = arith.cmpi sgt, %62, %297 : vector<2x1xi32>
    %299 = arith.extui %298 : vector<2x1xi1> to vector<2x1xi32>
    %300 = arith.sitofp %299 : vector<2x1xi32> to vector<2x1xf32>
    %301 = vector.broadcast %300 : vector<2x1xf32> to vector<2x128xf32>
    %302 = arith.mulf %296, %301 : vector<2x128xf32>
    %c10 = arith.constant 10 : index
    %c0_77 = arith.constant 0 : index
    %303 = vector.load %arg13[%c10, %c0_77] : memref<18x128xf32, #tpu.memory_space<vmem>>, vector<2x128xf32>
    tpu.vector_store %arg13[%c10, %c0_77], %302 {strides = array<i32>} : memref<18x128xf32, #tpu.memory_space<vmem>>, vector<2x128xf32>,
    %304 = vector.extract_strided_slice %58 {offsets = [10, 0], sizes = [2, 512], strides = [1, 1]} : vector<16x512xf32> to vector<2x512xf32>
    %305 = arith.truncf %292 : vector<2x128xf32> to vector<2x128xbf16>
    %cst_78 = arith.constant dense<0.000000e+00> : vector<2x512xf32>
    %306 = tpu.matmul %305, %59, %cst_78 {dimension_numbers = #tpu.dot_dimension_numbers<[1], [0], [0], [1], [0, 0, 1, 1], [], []>} : vector<2x128xbf16>, vector<128x512xbf16>, vector<2x512xf32> -> vector<2x512xf32>
    %307 = arith.addf %304, %306 : vector<2x512xf32>
    %308 = vector.extract_strided_slice %307 {offsets = [0, 0], sizes = [2, 128], strides = [1, 1]} : vector<2x512xf32> to vector<2x128xf32>
    %309 = arith.negf %308 : vector<2x128xf32>
    %310 = math.exp %309 : vector<2x128xf32>
    %cst_79 = arith.constant 1.000000e+00 : f32
    %311 = vector.broadcast %cst_79 : f32 to vector<2x128xf32>
    %312 = arith.addf %311, %310 : vector<2x128xf32>
    %313 = arith.divf %311, %312 : vector<2x128xf32>
    %314 = vector.extract_strided_slice %307 {offsets = [0, 128], sizes = [2, 128], strides = [1, 1]} : vector<2x512xf32> to vector<2x128xf32>
    %315 = arith.negf %314 : vector<2x128xf32>
    %316 = math.exp %315 : vector<2x128xf32>
    %cst_80 = arith.constant 1.000000e+00 : f32
    %317 = vector.broadcast %cst_80 : f32 to vector<2x128xf32>
    %318 = arith.addf %317, %316 : vector<2x128xf32>
    %319 = arith.divf %317, %318 : vector<2x128xf32>
    %320 = vector.extract_strided_slice %307 {offsets = [0, 256], sizes = [2, 128], strides = [1, 1]} : vector<2x512xf32> to vector<2x128xf32>
    %321 = math.tanh %320 : vector<2x128xf32>
    %322 = vector.extract_strided_slice %307 {offsets = [0, 384], sizes = [2, 128], strides = [1, 1]} : vector<2x512xf32> to vector<2x128xf32>
    %323 = arith.negf %322 : vector<2x128xf32>
    %324 = math.exp %323 : vector<2x128xf32>
    %cst_81 = arith.constant 1.000000e+00 : f32
    %325 = vector.broadcast %cst_81 : f32 to vector<2x128xf32>
    %326 = arith.addf %325, %324 : vector<2x128xf32>
    %327 = arith.divf %325, %326 : vector<2x128xf32>
    %328 = arith.mulf %319, %290 : vector<2x128xf32>
    %329 = arith.mulf %313, %321 : vector<2x128xf32>
    %330 = arith.addf %328, %329 : vector<2x128xf32>
    %331 = math.tanh %330 : vector<2x128xf32>
    %332 = arith.mulf %327, %331 : vector<2x128xf32>
    %333 = arith.truncf %332 : vector<2x128xf32> to vector<2x128xbf16>
    %cst_82 = arith.constant dense<0.000000e+00> : vector<2x128xf32>
    %334 = tpu.matmul %333, %60, %cst_82 {dimension_numbers = #tpu.dot_dimension_numbers<[1], [0], [0], [1], [0, 0, 1, 1], [], []>} : vector<2x128xbf16>, vector<128x128xbf16>, vector<2x128xf32> -> vector<2x128xf32>
    %335 = vector.broadcast %61 : vector<1x128xf32> to vector<2x128xf32>
    %336 = arith.addf %334, %335 : vector<2x128xf32>
    %c6_i32 = arith.constant 6 : i32
    %337 = vector.broadcast %c6_i32 : i32 to vector<2x1xi32>
    %338 = arith.cmpi sgt, %62, %337 : vector<2x1xi32>
    %339 = arith.extui %338 : vector<2x1xi1> to vector<2x1xi32>
    %340 = arith.sitofp %339 : vector<2x1xi32> to vector<2x1xf32>
    %341 = vector.broadcast %340 : vector<2x1xf32> to vector<2x128xf32>
    %342 = arith.mulf %336, %341 : vector<2x128xf32>
    %c12 = arith.constant 12 : index
    %c0_83 = arith.constant 0 : index
    %343 = vector.load %arg13[%c12, %c0_83] : memref<18x128xf32, #tpu.memory_space<vmem>>, vector<2x128xf32>
    tpu.vector_store %arg13[%c12, %c0_83], %342 {strides = array<i32>} : memref<18x128xf32, #tpu.memory_space<vmem>>, vector<2x128xf32>,
    %344 = vector.extract_strided_slice %58 {offsets = [12, 0], sizes = [2, 512], strides = [1, 1]} : vector<16x512xf32> to vector<2x512xf32>
    %345 = arith.truncf %332 : vector<2x128xf32> to vector<2x128xbf16>
    %cst_84 = arith.constant dense<0.000000e+00> : vector<2x512xf32>
    %346 = tpu.matmul %345, %59, %cst_84 {dimension_numbers = #tpu.dot_dimension_numbers<[1], [0], [0], [1], [0, 0, 1, 1], [], []>} : vector<2x128xbf16>, vector<128x512xbf16>, vector<2x512xf32> -> vector<2x512xf32>
    %347 = arith.addf %344, %346 : vector<2x512xf32>
    %348 = vector.extract_strided_slice %347 {offsets = [0, 0], sizes = [2, 128], strides = [1, 1]} : vector<2x512xf32> to vector<2x128xf32>
    %349 = arith.negf %348 : vector<2x128xf32>
    %350 = math.exp %349 : vector<2x128xf32>
    %cst_85 = arith.constant 1.000000e+00 : f32
    %351 = vector.broadcast %cst_85 : f32 to vector<2x128xf32>
    %352 = arith.addf %351, %350 : vector<2x128xf32>
    %353 = arith.divf %351, %352 : vector<2x128xf32>
    %354 = vector.extract_strided_slice %347 {offsets = [0, 128], sizes = [2, 128], strides = [1, 1]} : vector<2x512xf32> to vector<2x128xf32>
    %355 = arith.negf %354 : vector<2x128xf32>
    %356 = math.exp %355 : vector<2x128xf32>
    %cst_86 = arith.constant 1.000000e+00 : f32
    %357 = vector.broadcast %cst_86 : f32 to vector<2x128xf32>
    %358 = arith.addf %357, %356 : vector<2x128xf32>
    %359 = arith.divf %357, %358 : vector<2x128xf32>
    %360 = vector.extract_strided_slice %347 {offsets = [0, 256], sizes = [2, 128], strides = [1, 1]} : vector<2x512xf32> to vector<2x128xf32>
    %361 = math.tanh %360 : vector<2x128xf32>
    %362 = vector.extract_strided_slice %347 {offsets = [0, 384], sizes = [2, 128], strides = [1, 1]} : vector<2x512xf32> to vector<2x128xf32>
    %363 = arith.negf %362 : vector<2x128xf32>
    %364 = math.exp %363 : vector<2x128xf32>
    %cst_87 = arith.constant 1.000000e+00 : f32
    %365 = vector.broadcast %cst_87 : f32 to vector<2x128xf32>
    %366 = arith.addf %365, %364 : vector<2x128xf32>
    %367 = arith.divf %365, %366 : vector<2x128xf32>
    %368 = arith.mulf %359, %330 : vector<2x128xf32>
    %369 = arith.mulf %353, %361 : vector<2x128xf32>
    %370 = arith.addf %368, %369 : vector<2x128xf32>
    %371 = math.tanh %370 : vector<2x128xf32>
    %372 = arith.mulf %367, %371 : vector<2x128xf32>
    %373 = arith.truncf %372 : vector<2x128xf32> to vector<2x128xbf16>
    %cst_88 = arith.constant dense<0.000000e+00> : vector<2x128xf32>
    %374 = tpu.matmul %373, %60, %cst_88 {dimension_numbers = #tpu.dot_dimension_numbers<[1], [0], [0], [1], [0, 0, 1, 1], [], []>} : vector<2x128xbf16>, vector<128x128xbf16>, vector<2x128xf32> -> vector<2x128xf32>
    %375 = vector.broadcast %61 : vector<1x128xf32> to vector<2x128xf32>
    %376 = arith.addf %374, %375 : vector<2x128xf32>
    %c7_i32 = arith.constant 7 : i32
    %377 = vector.broadcast %c7_i32 : i32 to vector<2x1xi32>
    %378 = arith.cmpi sgt, %62, %377 : vector<2x1xi32>
    %379 = arith.extui %378 : vector<2x1xi1> to vector<2x1xi32>
    %380 = arith.sitofp %379 : vector<2x1xi32> to vector<2x1xf32>
    %381 = vector.broadcast %380 : vector<2x1xf32> to vector<2x128xf32>
    %382 = arith.mulf %376, %381 : vector<2x128xf32>
    %c14 = arith.constant 14 : index
    %c0_89 = arith.constant 0 : index
    %383 = vector.load %arg13[%c14, %c0_89] : memref<18x128xf32, #tpu.memory_space<vmem>>, vector<2x128xf32>
    tpu.vector_store %arg13[%c14, %c0_89], %382 {strides = array<i32>} : memref<18x128xf32, #tpu.memory_space<vmem>>, vector<2x128xf32>,
    %384 = vector.extract_strided_slice %58 {offsets = [14, 0], sizes = [2, 512], strides = [1, 1]} : vector<16x512xf32> to vector<2x512xf32>
    %385 = arith.truncf %372 : vector<2x128xf32> to vector<2x128xbf16>
    %cst_90 = arith.constant dense<0.000000e+00> : vector<2x512xf32>
    %386 = tpu.matmul %385, %59, %cst_90 {dimension_numbers = #tpu.dot_dimension_numbers<[1], [0], [0], [1], [0, 0, 1, 1], [], []>} : vector<2x128xbf16>, vector<128x512xbf16>, vector<2x512xf32> -> vector<2x512xf32>
    %387 = arith.addf %384, %386 : vector<2x512xf32>
    %388 = vector.extract_strided_slice %387 {offsets = [0, 0], sizes = [2, 128], strides = [1, 1]} : vector<2x512xf32> to vector<2x128xf32>
    %389 = arith.negf %388 : vector<2x128xf32>
    %390 = math.exp %389 : vector<2x128xf32>
    %cst_91 = arith.constant 1.000000e+00 : f32
    %391 = vector.broadcast %cst_91 : f32 to vector<2x128xf32>
    %392 = arith.addf %391, %390 : vector<2x128xf32>
    %393 = arith.divf %391, %392 : vector<2x128xf32>
    %394 = vector.extract_strided_slice %387 {offsets = [0, 128], sizes = [2, 128], strides = [1, 1]} : vector<2x512xf32> to vector<2x128xf32>
    %395 = arith.negf %394 : vector<2x128xf32>
    %396 = math.exp %395 : vector<2x128xf32>
    %cst_92 = arith.constant 1.000000e+00 : f32
    %397 = vector.broadcast %cst_92 : f32 to vector<2x128xf32>
    %398 = arith.addf %397, %396 : vector<2x128xf32>
    %399 = arith.divf %397, %398 : vector<2x128xf32>
    %400 = vector.extract_strided_slice %387 {offsets = [0, 256], sizes = [2, 128], strides = [1, 1]} : vector<2x512xf32> to vector<2x128xf32>
    %401 = math.tanh %400 : vector<2x128xf32>
    %402 = vector.extract_strided_slice %387 {offsets = [0, 384], sizes = [2, 128], strides = [1, 1]} : vector<2x512xf32> to vector<2x128xf32>
    %403 = arith.negf %402 : vector<2x128xf32>
    %404 = math.exp %403 : vector<2x128xf32>
    %cst_93 = arith.constant 1.000000e+00 : f32
    %405 = vector.broadcast %cst_93 : f32 to vector<2x128xf32>
    %406 = arith.addf %405, %404 : vector<2x128xf32>
    %407 = arith.divf %405, %406 : vector<2x128xf32>
    %408 = arith.mulf %399, %370 : vector<2x128xf32>
    %409 = arith.mulf %393, %401 : vector<2x128xf32>
    %410 = arith.addf %408, %409 : vector<2x128xf32>
    %411 = math.tanh %410 : vector<2x128xf32>
    %412 = arith.mulf %407, %411 : vector<2x128xf32>
    %413 = arith.truncf %412 : vector<2x128xf32> to vector<2x128xbf16>
    %cst_94 = arith.constant dense<0.000000e+00> : vector<2x128xf32>
    %414 = tpu.matmul %413, %60, %cst_94 {dimension_numbers = #tpu.dot_dimension_numbers<[1], [0], [0], [1], [0, 0, 1, 1], [], []>} : vector<2x128xbf16>, vector<128x128xbf16>, vector<2x128xf32> -> vector<2x128xf32>
    %415 = vector.broadcast %61 : vector<1x128xf32> to vector<2x128xf32>
    %416 = arith.addf %414, %415 : vector<2x128xf32>
    %c8_i32 = arith.constant 8 : i32
    %417 = vector.broadcast %c8_i32 : i32 to vector<2x1xi32>
    %418 = arith.cmpi sgt, %62, %417 : vector<2x1xi32>
    %419 = arith.extui %418 : vector<2x1xi1> to vector<2x1xi32>
    %420 = arith.sitofp %419 : vector<2x1xi32> to vector<2x1xf32>
    %421 = vector.broadcast %420 : vector<2x1xf32> to vector<2x128xf32>
    %422 = arith.mulf %416, %421 : vector<2x128xf32>
    %c16 = arith.constant 16 : index
    %c0_95 = arith.constant 0 : index
    %423 = vector.load %arg13[%c16, %c0_95] : memref<18x128xf32, #tpu.memory_space<vmem>>, vector<2x128xf32>
    tpu.vector_store %arg13[%c16, %c0_95], %422 {strides = array<i32>} : memref<18x128xf32, #tpu.memory_space<vmem>>, vector<2x128xf32>,
    return
  }
}

</mosaic_0001>

<bundles_post_ra>
// kernel: _lambda_.1
= control target key start
LH: loop header
LB: loop body
LE: loop exit
PB: predicated region body
PF: predicated region fallthrough
CT: control target
= control target key end

     0   :  { %s5276_s1 = inlined_call_operand.vmem [shape: bf16[128,128], index: 1, kind: input, shape index: {}]   ;;  %s5277_s2 = inlined_call_operand.vmem [shape: f32[1,128], index: 2, kind: input, shape index: {}]   ;;  %s5278_s0 = inlined_call_operand.vmem [shape: bf16[512,128], index: 0, kind: input, shape index: {}]   ;;  %s5279_s6 = inlined_call_operand.vmem [shape: s32[16,1], index: 6, kind: input, shape index: {}]   ;;  %s5280_s7 = inlined_call_operand.vmem [shape: s32[2,1], index: 7, kind: input, shape index: {}]   ;;  %s5281_s4 = inlined_call_operand.vmem [shape: f32[1,128], index: 4, kind: input, shape index: {}]   ;;  %s5282_s3 = inlined_call_operand.vmem [shape: bf16[128,128], index: 3, kind: input, shape index: {}]   ;;  %s5283_s5 = inlined_call_operand.vmem [shape: bf16[128,128], index: 5, kind: input, shape index: {}]   ;;  %s5284_s8 = inlined_call_operand.vmem [shape: bf16[128,512], index: 8, kind: input, shape index: {}]   ;;  %s5285_s10 = inlined_call_operand.vmem [shape: bf16[128,512], index: 10, kind: input, shape index: {}]   ;;  %s5286_s9 = inlined_call_operand.vmem [shape: f32[1,512], index: 9, kind: input, shape index: {}]   ;;  %s5287_s11 = inlined_call_operand.vmem [shape: bf16[128,128], index: 11, kind: input, shape index: {}]   ;;  %s5288_s12 = inlined_call_operand.vmem [shape: f32[1,128], index: 12, kind: input, shape index: {}]   ;;  %s5289_s13 = inlined_call_operand.vmem [shape: f32[18,128], index: 13, kind: output, shape index: {}]  }
   0x1   :  { %v3436_v0 = vld [vmem:[%s5276_s1 + $0x38] sm:$0xff]  ;;  %v3435_v1 = vld [vmem:[%s5276_s1 + $0x30] sm:$0xff]  ;;  %v3434_v2 = vld [vmem:[%s5276_s1 + $0x28] sm:$0xff] }
   0x2   :  { %369 = vmatpush.bf16.msra.mxu0 %v3436_v0  ;;  %v3433_v3 = vld [vmem:[%s5276_s1 + $0x20] sm:$0xff]  ;;  %v3432_v4 = vld [vmem:[%s5276_s1 + $0x18] sm:$0xff]  ;;  %v3431_v5 = vld [vmem:[%s5276_s1 + $0x10] sm:$0xff] }
   0x3   :  { %v3430_v6 = vld [vmem:[%s5276_s1 + $0x8] sm:$0xff]  ;;  %v3429_v7 = vld [vmem:[%s5276_s1] sm:$0xff]  ;;  %v3399_v10 = vld [vmem:[%s5278_s0 + $0x10] sm:$0xff] }
   0x4   :  { %v3397_v8 = vld [vmem:[%s5278_s0] sm:$0xff]  ;;  %v3398_v9 = vld [vmem:[%s5278_s0 + $0x8] sm:$0xff]  ;;  %v3400_v11 = vld [vmem:[%s5278_s0 + $0x18] sm:$0xff] }
   0x5   :  { %v3401_v12 = vld [vmem:[%s5278_s0 + $0x20] sm:$0xff]  ;;  %v3402_v13 = vld [vmem:[%s5278_s0 + $0x28] sm:$0xff]  ;;  %v3403_v14 = vld [vmem:[%s5278_s0 + $0x30] sm:$0xff] }
   0x6   :  { %370 = vmatpush.bf16.msra.mxu0 %v3435_v1  ;;  %v3404_v15 = vld [vmem:[%s5278_s0 + $0x38] sm:$0xff]  ;;  %v3405_v16 = vld [vmem:[%s5278_s0 + $0x40] sm:$0xff]  ;;  %v3406_v25 = vld [vmem:[%s5278_s0 + $0x48] sm:$0xff] }
   0x7   :  { %v3840_v18 = vld [vmem:[%s5277_s2] ss:$0 sm:$0xff]  ;;  %v3407_v34 = vld [vmem:[%s5278_s0 + $0x50] sm:$0xff]  ;;  %v3408_v43 = vld [vmem:[%s5278_s0 + $0x58] sm:$0xff] }
   0x8   :  { %v3409_v52 = vld [vmem:[%s5278_s0 + $0x60] sm:$0xff]  ;;  %v3410_v61 = vld [vmem:[%s5278_s0 + $0x68] sm:$0xff] }
   0xa   :  { %371 = vmatpush.bf16.msra.mxu0 %v3434_v2 }
   0xe   :  { %372 = vmatpush.bf16.msra.mxu0 %v3433_v3 }
  0x12   :  { %373 = vmatpush.bf16.msra.mxu0 %v3432_v4 }
  0x16   :  { %374 = vmatpush.bf16.msra.mxu0 %v3431_v5 }
  0x1a   :  { %375 = vmatpush.bf16.msra.mxu0 %v3430_v6  ;;  %v3411_v6 = vld [vmem:[%s5278_s0 + $0x70] sm:$0xff] }
  0x1e   :  { %376 = vmatpush.bf16.msra.mxu0 %v3429_v7 }
  0x21   :  { %377 = vmatmul.bf16.vlgmr.msra.gmra.mxu0 %v3397_v8 }
  0x31   :  { %382 = vmatmul.bf16.gmra.mxu0 %v3398_v9 }
  0x41   :  { %387 = vmatmul.bf16.gmra.mxu0 %v3399_v10 }
  0x51   :  { %392 = vmatmul.bf16.gmra.mxu0 %v3400_v11 }
  0x61   :  { %397 = vmatmul.bf16.gmra.mxu0 %v3401_v12 }
  0x71   :  { %402 = vmatmul.bf16.gmra.mxu0 %v3402_v13 }
  0x81   :  { %407 = vmatmul.bf16.gmra.mxu0 %v3403_v14 }
  0x91   :  { %412 = vmatmul.bf16.gmra.mxu0 %v3404_v15  ;;  %v3412_v15 = vld [vmem:[%s5278_s0 + $0x78] sm:$0xff] }
  0x9e   :  { %v378_v17 = vpop.f32.mrf.mxu0 }
  0x9f   :  { %v379_v19 = vadd.f32 %v3840_v18, %v378_v17 }
  0xa1   :  { %417 = vmatmul.bf16.gmra.mxu0 %v3405_v16  ;;  %v538_v22 = vmax.f32 %v379_v19, 0.0 }
  0xa6   :  { %v380_v20 = vpop.f32.mrf.mxu0 }
  0xa7   :  { %v381_v21 = vadd.f32 %v3840_v18, %v380_v20 }
  0xa9   :  { %v539_v23 = vmax.f32 %v381_v21, 0.0 }
  0xab   :  { %v604_v24 = vadd.f32 %v539_v23, %v538_v22 }
  0xae   :  { %v383_v26 = vpop.f32.mrf.mxu0 }
  0xaf   :  { %v384_v27 = vadd.f32 %v3840_v18, %v383_v26 }
  0xb1   :  { %v540_v28 = vmax.f32 %v384_v27, 0.0  ;;  %422 = vmatmul.bf16.gmra.mxu0 %v3406_v25  ;;  %v3413_v25 = vld [vmem:[%s5278_s0 + $0x80] sm:$0xff] }
  0xb3   :  { %v605_v29 = vadd.f32 %v604_v24, %v540_v28 }
  0xb6   :  { %v385_v30 = vpop.f32.mrf.mxu0 }
  0xb7   :  { %v386_v31 = vadd.f32 %v3840_v18, %v385_v30 }
  0xb9   :  { %v541_v32 = vmax.f32 %v386_v31, 0.0 }
  0xbb   :  { %v606_v33 = vadd.f32 %v605_v29, %v541_v32 }
  0xbe   :  { %v388_v35 = vpop.f32.mrf.mxu0 }
  0xbf   :  { %v389_v36 = vadd.f32 %v3840_v18, %v388_v35 }
  0xc1   :  { %v542_v37 = vmax.f32 %v389_v36, 0.0  ;;  %427 = vmatmul.bf16.gmra.mxu0 %v3407_v34  ;;  %v3414_v34 = vld [vmem:[%s5278_s0 + $0x88] sm:$0xff] }
  0xc3   :  { %v607_v38 = vadd.f32 %v606_v33, %v542_v37 }
  0xc6   :  { %v390_v39 = vpop.f32.mrf.mxu0 }
  0xc7   :  { %v391_v40 = vadd.f32 %v3840_v18, %v390_v39 }
  0xc9   :  { %v543_v41 = vmax.f32 %v391_v40, 0.0 }
  0xcb   :  { %v608_v42 = vadd.f32 %v607_v38, %v543_v41 }
  0xce   :  { %v393_v44 = vpop.f32.mrf.mxu0 }
  0xcf   :  { %v394_v45 = vadd.f32 %v3840_v18, %v393_v44 }
  0xd1   :  { %v544_v46 = vmax.f32 %v394_v45, 0.0  ;;  %432 = vmatmul.bf16.gmra.mxu0 %v3408_v43  ;;  %v3415_v43 = vld [vmem:[%s5278_s0 + $0x90] sm:$0xff] }
  0xd3   :  { %v609_v47 = vadd.f32 %v608_v42, %v544_v46 }
  0xd6   :  { %v395_v48 = vpop.f32.mrf.mxu0 }
  0xd7   :  { %v396_v49 = vadd.f32 %v3840_v18, %v395_v48 }
  0xd9   :  { %v545_v50 = vmax.f32 %v396_v49, 0.0 }
  0xdb   :  { %v610_v51 = vadd.f32 %v609_v47, %v545_v50 }
  0xde   :  { %v398_v53 = vpop.f32.mrf.mxu0 }
  0xdf   :  { %v399_v54 = vadd.f32 %v3840_v18, %v398_v53 }
  0xe1   :  { %v546_v55 = vmax.f32 %v399_v54, 0.0  ;;  %437 = vmatmul.bf16.gmra.mxu0 %v3409_v52  ;;  %v3416_v52 = vld [vmem:[%s5278_s0 + $0x98] sm:$0xff] }
  0xe3   :  { %v611_v56 = vadd.f32 %v610_v51, %v546_v55 }
  0xe6   :  { %v400_v57 = vpop.f32.mrf.mxu0 }
  0xe7   :  { %v401_v58 = vadd.f32 %v3840_v18, %v400_v57 }
  0xe9   :  { %v547_v59 = vmax.f32 %v401_v58, 0.0 }
  0xeb   :  { %v612_v60 = vadd.f32 %v611_v56, %v547_v59 }
  0xee   :  { %v403_v62 = vpop.f32.mrf.mxu0 }
  0xef   :  { %v404_v63 = vadd.f32 %v3840_v18, %v403_v62 }
  0xf1   :  { %v548_v0 = vmax.f32 %v404_v63, 0.0  ;;  %442 = vmatmul.bf16.gmra.mxu0 %v3410_v61  ;;  %v3417_v61 = vld [vmem:[%s5278_s0 + $0xa0] sm:$0xff] }
  0xf3   :  { %v613_v1 = vadd.f32 %v612_v60, %v548_v0 }
  0xf6   :  { %v405_v2 = vpop.f32.mrf.mxu0 }
  0xf7   :  { %v406_v3 = vadd.f32 %v3840_v18, %v405_v2 }
  0xf9   :  { %v549_v4 = vmax.f32 %v406_v3, 0.0 }
  0xfb   :  { %v614_v5 = vadd.f32 %v613_v1, %v549_v4 }
  0xfe   :  { %v408_v7 = vpop.f32.mrf.mxu0 }
  0xff   :  { %v409_v8 = vadd.f32 %v3840_v18, %v408_v7 }
 0x101   :  { %v550_v9 = vmax.f32 %v409_v8, 0.0  ;;  %447 = vmatmul.bf16.gmra.mxu0 %v3411_v6  ;;  %v3418_v6 = vld [vmem:[%s5278_s0 + $0xa8] sm:$0xff] }
 0x103   :  { %v615_v10 = vadd.f32 %v614_v5, %v550_v9 }
 0x106   :  { %v410_v11 = vpop.f32.mrf.mxu0 }
 0x107   :  { %v411_v12 = vadd.f32 %v3840_v18, %v410_v11 }
 0x109   :  { %v551_v13 = vmax.f32 %v411_v12, 0.0 }
 0x10b   :  { %v616_v14 = vadd.f32 %v615_v10, %v551_v13 }
 0x10e   :  { %v413_v16 = vpop.f32.mrf.mxu0 }
 0x10f   :  { %v414_v17 = vadd.f32 %v3840_v18, %v413_v16 }
 0x111   :  { %v552_v19 = vmax.f32 %v414_v17, 0.0  ;;  %452 = vmatmul.bf16.gmra.mxu0 %v3412_v15  ;;  %v3419_v15 = vld [vmem:[%s5278_s0 + $0xb0] sm:$0xff] }
 0x113   :  { %v617_v20 = vadd.f32 %v616_v14, %v552_v19 }
 0x116   :  { %v415_v21 = vpop.f32.mrf.mxu0 }
 0x117   :  { %v416_v22 = vadd.f32 %v3840_v18, %v415_v21 }
 0x119   :  { %v553_v23 = vmax.f32 %v416_v22, 0.0 }
 0x11b   :  { %v618_v24 = vadd.f32 %v617_v20, %v553_v23 }
 0x11e   :  { %v418_v26 = vpop.f32.mrf.mxu0 }
 0x11f   :  { %v419_v27 = vadd.f32 %v3840_v18, %v418_v26 }
 0x121   :  { %v554_v28 = vmax.f32 %v419_v27, 0.0  ;;  %457 = vmatmul.bf16.gmra.mxu0 %v3413_v25  ;;  %v3420_v25 = vld [vmem:[%s5278_s0 + $0xb8] sm:$0xff] }
 0x123   :  { %v619_v29 = vadd.f32 %v618_v24, %v554_v28 }
 0x126   :  { %v420_v30 = vpop.f32.mrf.mxu0 }
 0x127   :  { %v421_v31 = vadd.f32 %v3840_v18, %v420_v30 }
 0x129   :  { %v555_v32 = vmax.f32 %v421_v31, 0.0 }
 0x12b   :  { %v620_v33 = vadd.f32 %v619_v29, %v555_v32 }
 0x12e   :  { %v423_v35 = vpop.f32.mrf.mxu0 }
 0x12f   :  { %v424_v36 = vadd.f32 %v3840_v18, %v423_v35 }
 0x131   :  { %v556_v37 = vmax.f32 %v424_v36, 0.0  ;;  %462 = vmatmul.bf16.gmra.mxu0 %v3414_v34  ;;  %v3421_v34 = vld [vmem:[%s5278_s0 + $0xc0] sm:$0xff] }
 0x133   :  { %v621_v38 = vadd.f32 %v620_v33, %v556_v37 }
 0x136   :  { %v425_v39 = vpop.f32.mrf.mxu0 }
 0x137   :  { %v426_v40 = vadd.f32 %v3840_v18, %v425_v39 }
 0x139   :  { %v557_v41 = vmax.f32 %v426_v40, 0.0 }
 0x13b   :  { %v622_v42 = vadd.f32 %v621_v38, %v557_v41 }
 0x13e   :  { %v428_v44 = vpop.f32.mrf.mxu0 }
 0x13f   :  { %v429_v45 = vadd.f32 %v3840_v18, %v428_v44 }
 0x141   :  { %v558_v46 = vmax.f32 %v429_v45, 0.0  ;;  %467 = vmatmul.bf16.gmra.mxu0 %v3415_v43 }
 0x143   :  { %v623_v47 = vadd.f32 %v622_v42, %v558_v46  ;;  %v3422_v42 = vld [vmem:[%s5278_s0 + $0xc8] sm:$0xff] }
 0x146   :  { %v430_v48 = vpop.f32.mrf.mxu0 }
 0x147   :  { %v431_v49 = vadd.f32 %v3840_v18, %v430_v48 }
 0x149   :  { %v559_v50 = vmax.f32 %v431_v49, 0.0 }
 0x14b   :  { %v624_v51 = vadd.f32 %v623_v47, %v559_v50 }
 0x14e   :  { %v433_v53 = vpop.f32.mrf.mxu0 }
 0x14f   :  { %v434_v54 = vadd.f32 %v3840_v18, %v433_v53 }
 0x151   :  { %v560_v55 = vmax.f32 %v434_v54, 0.0  ;;  %472 = vmatmul.bf16.gmra.mxu0 %v3416_v52 }
 0x153   :  { %v625_v56 = vadd.f32 %v624_v51, %v560_v55  ;;  %v3423_v51 = vld [vmem:[%s5278_s0 + $0xd0] sm:$0xff] }
 0x156   :  { %v435_v57 = vpop.f32.mrf.mxu0 }
 0x157   :  { %v436_v58 = vadd.f32 %v3840_v18, %v435_v57 }
 0x159   :  { %v561_v59 = vmax.f32 %v436_v58, 0.0 }
 0x15b   :  { %v626_v60 = vadd.f32 %v625_v56, %v561_v59 }
 0x15e   :  { %v438_v62 = vpop.f32.mrf.mxu0 }
 0x15f   :  { %v439_v63 = vadd.f32 %v3840_v18, %v438_v62 }
 0x161   :  { %v562_v0 = vmax.f32 %v439_v63, 0.0  ;;  %477 = vmatmul.bf16.gmra.mxu0 %v3417_v61 }
 0x163   :  { %v627_v1 = vadd.f32 %v626_v60, %v562_v0  ;;  %v3424_v60 = vld [vmem:[%s5278_s0 + $0xd8] sm:$0xff] }
 0x166   :  { %v440_v2 = vpop.f32.mrf.mxu0 }
 0x167   :  { %v441_v3 = vadd.f32 %v3840_v18, %v440_v2 }
 0x169   :  { %v563_v4 = vmax.f32 %v441_v3, 0.0 }
 0x16b   :  { %v628_v5 = vadd.f32 %v627_v1, %v563_v4 }
 0x16e   :  { %v443_v7 = vpop.f32.mrf.mxu0 }
 0x16f   :  { %v444_v8 = vadd.f32 %v3840_v18, %v443_v7 }
 0x171   :  { %v564_v9 = vmax.f32 %v444_v8, 0.0  ;;  %482 = vmatmul.bf16.gmra.mxu0 %v3418_v6 }
 0x173   :  { %v629_v10 = vadd.f32 %v628_v5, %v564_v9  ;;  %v3425_v5 = vld [vmem:[%s5278_s0 + $0xe0] sm:$0xff] }
 0x176   :  { %v445_v11 = vpop.f32.mrf.mxu0 }
 0x177   :  { %v446_v12 = vadd.f32 %v3840_v18, %v445_v11 }
 0x179   :  { %v565_v13 = vmax.f32 %v446_v12, 0.0 }
 0x17b   :  { %v630_v14 = vadd.f32 %v629_v10, %v565_v13  ;;  %v3426_v13 = vld [vmem:[%s5278_s0 + $0xe8] sm:$0xff] }
 0x17e   :  { %v448_v16 = vpop.f32.mrf.mxu0 }
 0x17f   :  { %v449_v17 = vadd.f32 %v3840_v18, %v448_v16 }
 0x181   :  { %v566_v19 = vmax.f32 %v449_v17, 0.0  ;;  %487 = vmatmul.bf16.gmra.mxu0 %v3419_v15 }
 0x183   :  { %v631_v20 = vadd.f32 %v630_v14, %v566_v19 }
 0x186   :  { %v450_v21 = vpop.f32.mrf.mxu0 }
 0x187   :  { %v451_v22 = vadd.f32 %v3840_v18, %v450_v21 }
 0x189   :  { %v567_v23 = vmax.f32 %v451_v22, 0.0 }
 0x18b   :  { %v632_v24 = vadd.f32 %v631_v20, %v567_v23  ;;  %v3427_v23 = vld [vmem:[%s5278_s0 + $0xf0] sm:$0xff] }
 0x18e   :  { %v453_v26 = vpop.f32.mrf.mxu0 }
 0x18f   :  { %v454_v27 = vadd.f32 %v3840_v18, %v453_v26 }
 0x191   :  { %v568_v28 = vmax.f32 %v454_v27, 0.0  ;;  %492 = vmatmul.bf16.gmra.mxu0 %v3420_v25 }
 0x193   :  { %v633_v29 = vadd.f32 %v632_v24, %v568_v28 }
 0x196   :  { %v455_v30 = vpop.f32.mrf.mxu0 }
 0x197   :  { %v456_v31 = vadd.f32 %v3840_v18, %v455_v30 }
 0x199   :  { %v569_v32 = vmax.f32 %v456_v31, 0.0 }
 0x19b   :  { %v3919_v33 = vadd.f32 %v633_v29, %v569_v32 }
 0x19e   :  { %v458_v35 = vpop.f32.mrf.mxu0 }
 0x19f   :  { %v459_v36 = vadd.f32 %v3840_v18, %v458_v35 }
 0x1a1   :  { %497 = vmatmul.bf16.gmra.mxu0 %v3421_v34  ;;  %v570_v39 = vmax.f32 %v459_v36, 0.0  ;;  %v3428_v34 = vld [vmem:[%s5278_s0 + $0xf8] sm:$0xff] }
 0x1a6   :  { %v460_v37 = vpop.f32.mrf.mxu0 }
 0x1a7   :  { %v461_v38 = vadd.f32 %v3840_v18, %v460_v37 }
 0x1a9   :  { %v571_v40 = vmax.f32 %v461_v38, 0.0 }
 0x1ab   :  { %v652_v41 = vadd.f32 %v571_v40, %v570_v39  ;;  %v3712_v39 = vmov 0  }
 0x1ac   :  { %3529 = vset.pattern.permute.xlu0 %v3712_v39  ;;  %3530 = vset.pattern.permute.xlu1 %v3712_v39 }
 0x1ad   :  { %3541 = vset.pattern.permute.xlu2 %v3712_v39 }
 0x1ae   :  { %v463_v43 = vpop.f32.mrf.mxu0 }
 0x1af   :  { %v464_v44 = vadd.f32 %v3840_v18, %v463_v43 }
 0x1b1   :  { %v572_v45 = vmax.f32 %v464_v44, 0.0  ;;  %502 = vmatmul.bf16.gmra.mxu0 %v3422_v42 }
 0x1b3   :  { %v653_v46 = vadd.f32 %v652_v41, %v572_v45  ;;  %v775_v41 = vld [vmem:[%s5279_s6] sm:$0xff] }
 0x1b4   :  { %780 = vperm.xlu0 %3529, %v775_v41  }
 0x1b6   :  { %v465_v47 = vpop.f32.mrf.mxu0 }
 0x1b7   :  { %v466_v48 = vadd.f32 %v3840_v18, %v465_v47 }
 0x1b9   :  { %v573_v49 = vmax.f32 %v466_v48, 0.0 }
 0x1bb   :  { %v654_v50 = vadd.f32 %v653_v46, %v573_v49  ;;  %v776_v46 = vld [vmem:[%s5279_s6 + $0x8] sm:$0xff] }
 0x1bc   :  { %783 = vperm.xlu0 %3529, %v776_v46   ;;  %v602_v46 = vlaneseq }
 0x1be   :  { %v468_v52 = vpop.f32.mrf.mxu0 }
 0x1bf   :  { %v469_v53 = vadd.f32 %v3840_v18, %v468_v52 }
 0x1c1   :  { %v574_v54 = vmax.f32 %v469_v53, 0.0  ;;  %507 = vmatmul.bf16.gmra.mxu0 %v3423_v51 }
 0x1c3   :  { %v655_v55 = vadd.f32 %v654_v50, %v574_v54  ;;  %v1231_v54 = vld [vmem:[%s5280_s7] sm:$0x3] }
 0x1c4   :  { %vm2831_vm0 = vcmp.gt.s32.totalorder %v1231_v54, 8 }
 0x1c6   :  { %v470_v56 = vpop.f32.mrf.mxu0 }
 0x1c7   :  { %v471_v57 = vadd.f32 %v3840_v18, %v470_v56 }
 0x1c9   :  { %v575_v58 = vmax.f32 %v471_v57, 0.0 }
 0x1cb   :  { %v656_v59 = vadd.f32 %v655_v55, %v575_v58  ;;  %v5290_v55 = vmov 0.0  }
 0x1cc   :  { %v3396_v56 = vsel %vm2831_vm0, 1.0, %v5290_v55 }
 0x1cd   :  { %2836 = vperm.xlu0 %3529, %v3396_v56   ;;  %v635_v56 = vrot.slane %v3919_v33, 4 }
 0x1ce   :  { %v473_v61 = vpop.f32.mrf.mxu0 }
 0x1cf   :  { %v474_v62 = vadd.f32 %v3840_v18, %v473_v61 }
 0x1d1   :  { %v576_v63 = vmax.f32 %v474_v62, 0.0  ;;  %512 = vmatmul.bf16.gmra.mxu0 %v3424_v60 }
 0x1d3   :  { %v657_v0 = vadd.f32 %v656_v59, %v576_v63 }
 0x1d6   :  { %v475_v1 = vpop.f32.mrf.mxu0 }
 0x1d7   :  { %v476_v2 = vadd.f32 %v3840_v18, %v475_v1 }
 0x1d9   :  { %v577_v3 = vmax.f32 %v476_v2, 0.0 }
 0x1db   :  { %v658_v4 = vadd.f32 %v657_v0, %v577_v3 }
 0x1de   :  { %v478_v6 = vpop.f32.mrf.mxu0 }
 0x1df   :  { %v479_v7 = vadd.f32 %v3840_v18, %v478_v6 }
 0x1e1   :  { %v578_v8 = vmax.f32 %v479_v7, 0.0  ;;  %517 = vmatmul.bf16.gmra.mxu0 %v3425_v5 }
 0x1e3   :  { %v659_v9 = vadd.f32 %v658_v4, %v578_v8 }
 0x1e6   :  { %v480_v10 = vpop.f32.mrf.mxu0 }
 0x1e7   :  { %v481_v11 = vadd.f32 %v3840_v18, %v480_v10 }
 0x1e9   :  { %v579_v12 = vmax.f32 %v481_v11, 0.0  ;;  %v3444_v11 = vld [vmem:[%s5282_s3 + $0x38] sm:$0xff] }
 0x1ea   :  { %762 = vmatpush.bf16.msra.mxu1 %v3444_v11  ;;  %v3484_v11 = vld [vmem:[%s5284_s8 + $0xf4] sm:$0xf0] }
 0x1eb   :  { %v660_v16 = vadd.f32 %v659_v9, %v579_v12  ;;  %v3443_v12 = vld [vmem:[%s5282_s3 + $0x30] sm:$0xff] }
 0x1ee   :  { %v483_v14 = vpop.f32.mrf.mxu0  ;;  %763 = vmatpush.bf16.msra.mxu1 %v3443_v12  ;;  %v3171_v12 = vld [vmem:[%s5284_s8 + $0xc0] sm:$0xf] }
 0x1ef   :  { %v484_v15 = vadd.f32 %v3840_v18, %v483_v14 }
 0x1f1   :  { %v580_v17 = vmax.f32 %v484_v15, 0.0  ;;  %522 = vmatmul.bf16.gmra.mxu0 %v3426_v13  ;;  %v3452_v13 = vld [vmem:[%s5283_s5 + $0x38] sm:$0xff]  ;;  %v3442_v15 = vld [vmem:[%s5282_s3 + $0x28] sm:$0xff] }
 0x1f2   :  { %856 = vmatpush.bf16.msra.mxu2 %v3452_v13  ;;  %764 = vmatpush.bf16.msra.mxu1 %v3442_v15 }
 0x1f3   :  { %v661_v19 = vadd.f32 %v660_v16, %v580_v17  ;;  %v3451_v16 = vld [vmem:[%s5283_s5 + $0x30] sm:$0xff]  ;;  %v3441_v17 = vld [vmem:[%s5282_s3 + $0x20] sm:$0xff] }
 0x1f6   :  { %v485_v20 = vpop.f32.mrf.mxu0  ;;  %857 = vmatpush.bf16.msra.mxu2 %v3451_v16  ;;  %765 = vmatpush.bf16.msra.mxu1 %v3441_v17  ;;  %v3479_v16 = vld [vmem:[%s5284_s8 + $0xcc] sm:$0xf0]  ;;  %v3477_v17 = vld [vmem:[%s5284_s8 + $0xc4] sm:$0xf] }
 0x1f7   :  { %v486_v21 = vadd.f32 %v3840_v18, %v485_v20 }
 0x1f9   :  { %v581_v22 = vmax.f32 %v486_v21, 0.0 }
 0x1fb   :  { %v662_v26 = vadd.f32 %v661_v19, %v581_v22  ;;  %v3450_v19 = vld [vmem:[%s5283_s5 + $0x28] sm:$0xff]  ;;  %v3440_v22 = vld [vmem:[%s5282_s3 + $0x18] sm:$0xff] }
 0x1fc   :  { %858 = vmatpush.bf16.msra.mxu2 %v3450_v19  ;;  %766 = vmatpush.bf16.msra.mxu1 %v3440_v22  ;;  %v3715_v19 = vmov 1.0|1.0   ;;  %v3179_v22 = vld [vmem:[%s5284_s8 + $0xc8] sm:$0xf] }
 0x1fe   :  { %v488_v24 = vpop.f32.mrf.mxu0 }
 0x1ff   :  { %v489_v25 = vadd.f32 %v3840_v18, %v488_v24 }
 0x201   :  { %v582_v27 = vmax.f32 %v489_v25, 0.0  ;;  %527 = vmatmul.bf16.gmra.mxu0 %v3427_v23  ;;  %v3449_v23 = vld [vmem:[%s5283_s5 + $0x20] sm:$0xff] }
 0x202   :  { %859 = vmatpush.bf16.msra.mxu2 %v3449_v23  ;;  %v3480_v23 = vld [vmem:[%s5284_s8 + $0xd4] sm:$0xf0] }
 0x203   :  { %v663_v28 = vadd.f32 %v662_v26, %v582_v27  ;;  %v3439_v27 = vld [vmem:[%s5282_s3 + $0x10] sm:$0xff] }
 0x204   :  { %767 = vmatpush.bf16.msra.mxu1 %v3439_v27  ;;  %v3155_v27 = vld [vmem:[%s5284_s8 + $0xa0] sm:$0xf] }
 0x206   :  { %v490_v29 = vpop.f32.mrf.mxu0 }
 0x207   :  { %v491_v30 = vadd.f32 %v3840_v18, %v490_v29 }
 0x209   :  { %v583_v31 = vmax.f32 %v491_v30, 0.0 }
 0x20b   :  { %v664_v32 = vadd.f32 %v663_v28, %v583_v31  ;;  %v3448_v28 = vld [vmem:[%s5283_s5 + $0x18] sm:$0xff]  ;;  %v3438_v31 = vld [vmem:[%s5282_s3 + $0x8] sm:$0xff] }
 0x20c   :  { %860 = vmatpush.bf16.msra.mxu2 %v3448_v28  ;;  %768 = vmatpush.bf16.msra.mxu1 %v3438_v31  ;;  %v3475_v28 = vld [vmem:[%s5284_s8 + $0xac] sm:$0xf0]  ;;  %v3157_v31 = vld [vmem:[%s5284_s8 + $0xb0] sm:$0xf0] }
 0x20e   :  { %v493_v35 = vpop.f32.mrf.mxu0 }
 0x20f   :  { %v494_v36 = vadd.f32 %v3840_v18, %v493_v35 }
 0x211   :  { %v584_v37 = vmax.f32 %v494_v36, 0.0  ;;  %532 = vmatmul.bf16.gmra.mxu0 %v3428_v34 }
 0x213   :  { %v665_v38 = vadd.f32 %v664_v32, %v584_v37  ;;  %v3447_v32 = vld [vmem:[%s5283_s5 + $0x10] sm:$0xff] }
 0x214   :  { %861 = vmatpush.bf16.msra.mxu2 %v3447_v32  ;;  %v3163_v32 = vld [vmem:[%s5284_s8 + $0xa8] sm:$0xf] }
 0x216   :  { %v495_v40 = vpop.f32.mrf.mxu0 }
 0x217   :  { %v496_v42 = vadd.f32 %v3840_v18, %v495_v40 }
 0x219   :  { %v585_v43 = vmax.f32 %v496_v42, 0.0 }
 0x21b   :  { %v666_v44 = vadd.f32 %v665_v38, %v585_v43  ;;  %v3714_v38 = vmov 256.0  }
 0x21c   :  { %3555 = vrcp.f32 %v3714_v38  ;;  %v4117_v38 = vor.u32 %v3475_v28, %v3155_v27  ;;  %v3091_v27 = vld [vmem:[%s5284_s8 + $0x20] sm:$0xf]  ;;  %v3459_v28 = vld [vmem:[%s5284_s8 + $0x2c] sm:$0xf0] }
 0x21e   :  { %v498_v45 = vpop.f32.mrf.mxu0 }
 0x21f   :  { %v499_v47 = vadd.f32 %v3840_v18, %v498_v45  ;;  %v3446_v45 = vld [vmem:[%s5283_s5 + $0x8] sm:$0xff] }
 0x220   :  { %862 = vmatpush.bf16.msra.mxu2 %v3446_v45 }
 0x221   :  { %v586_v48 = vmax.f32 %v499_v47, 0.0 }
 0x223   :  { %v667_v49 = vadd.f32 %v666_v44, %v586_v48  ;;  %v3437_v44 = vld [vmem:[%s5282_s3] sm:$0xff] }
 0x224   :  { %769 = vmatpush.bf16.msra.mxu1 %v3437_v44 }
 0x226   :  { %v500_v50 = vpop.f32.mrf.mxu0  ;;  %v781_v43 = vpop.permute.xlu0 %780 }
 0x227   :  { %v501_v51 = vadd.f32 %v3840_v18, %v500_v50 }
 0x229   :  { %v587_v52 = vmax.f32 %v501_v51, 0.0  ;;  %v778_v51 = vand.u32 127, %v602_v46 }
 0x22b   :  { %v668_v53 = vadd.f32 %v667_v49, %v587_v52  ;;  %v4033_v52 = vpop.eup %3555  ;;  %vm785_vm1 = vcmp.eq.s32.totalorder %v781_v43, %v778_v51  ;;  %v3471_v43 = vld [vmem:[%s5284_s8 + $0x8c] sm:$0xf0] }
 0x22c   :  { %vm646_vm4 = vweird.f32 %v4033_v52 }
 0x22e   :  { %v503_v57 = vpop.f32.mrf.mxu0 }
 0x22f   :  { %v504_v58 = vadd.f32 %v3840_v18, %v503_v57 }
 0x231   :  { %v588_v59 = vmax.f32 %v504_v58, 0.0 }
 0x233   :  { %v669_v60 = vadd.f32 %v668_v53, %v588_v59 }
 0x236   :  { %v505_v61 = vpop.f32.mrf.mxu0 }
 0x237   :  { %v506_v62 = vadd.f32 %v3840_v18, %v505_v61 }
 0x239   :  { %v589_v63 = vmax.f32 %v506_v62, 0.0  ;;  %v3445_v62 = vld [vmem:[%s5283_s5] sm:$0xff] }
 0x23a   :  { %863 = vmatpush.bf16.msra.mxu2 %v3445_v62  ;;  %v3465_v62 = vld [vmem:[%s5284_s8 + $0x64] sm:$0xf] }
 0x23b   :  { %v670_v0 = vadd.f32 %v669_v60, %v589_v63 }
 0x23e   :  { %v508_v1 = vpop.f32.mrf.mxu0 }
 0x23f   :  { %v509_v2 = vadd.f32 %v3840_v18, %v508_v1  ;;  %v3187_v1 = vld [vmem:[%s5284_s8 + $0xe0] sm:$0xf] }
 0x241   :  { %v590_v3 = vmax.f32 %v509_v2, 0.0  ;;  %v3483_v2 = vld [vmem:[%s5284_s8 + $0xec] sm:$0xf0] }
 0x243   :  { %v671_v4 = vadd.f32 %v670_v0, %v590_v3  ;;  %v4042_v0 = vmul.f32 256.0, %v4033_v52 }
 0x246   :  { %v510_v5 = vpop.f32.mrf.mxu0 }
 0x247   :  { %v511_v21 = vadd.f32 %v3840_v18, %v510_v5  ;;  %v4050_v5 = vor.u32 %v3483_v2, %v3187_v1  ;;  %v3468_v1 = vld [vmem:[%s5284_s8 + $0x74] sm:$0xf0] }
 0x249   :  { %v591_v25 = vmax.f32 %v511_v21, 0.0  ;;  %1073 = vmatpush.bf16.msra.mxu3 %v4050_v5  ;;  %v3173_v21 = vld [vmem:[%s5284_s8 + $0xd0] sm:$0xf0] }
 0x24b   :  { %v672_v35 = vadd.f32 %v671_v4, %v591_v25  ;;  %v784_v4 = vpop.permute.xlu0 %783  ;;  %v4093_v25 = vor.u32 %v3477_v17, %v3173_v21 }
 0x24c   :  { %vm786_vm2 = vcmp.eq.s32.totalorder %v784_v4, %v778_v51 }
 0x24d   :  { %vm3071_vm3 = vmpackc.low %vm786_vm2, %vm785_vm1 }
 0x24e   :  { %v513_v6 = vpop.f32.mrf.mxu0  ;;  %3072 = vmatmul.msk.bf16.vlgmr.msra.gmra.mxu2 %vm3071_vm3, %v3715_v19 }
 0x24f   :  { %v514_v24 = vadd.f32 %v3840_v18, %v513_v6  ;;  %v3481_v6 = vld [vmem:[%s5284_s8 + $0xe4] sm:$0xf] }
 0x251   :  { %v592_v29 = vmax.f32 %v514_v24, 0.0 }
 0x253   :  { %v673_v40 = vadd.f32 %v672_v35, %v592_v29  ;;  %v3473_v29 = vld [vmem:[%s5284_s8 + $0xa4] sm:$0xf] }
 0x256   :  { %v515_v7 = vpop.f32.mrf.mxu0 }
 0x257   :  { %v516_v26 = vadd.f32 %v3840_v18, %v515_v7  ;;  %v3189_v7 = vld [vmem:[%s5284_s8 + $0xf0] sm:$0xf0] }
 0x259   :  { %v593_v36 = vmax.f32 %v516_v26, 0.0  ;;  %v4095_v26 = vor.u32 %v3480_v23, %v3179_v22  ;;  %v603_v22 = vshrl.u32 %v602_v46, 7  ;;  %v3457_v46 = vld [vmem:[%s5284_s8 + $0x24] sm:$0xf] }
 0x25b   :  { %v674_v47 = vadd.f32 %v673_v40, %v593_v36  ;;  %v643_v40 = vsub.f32 1.0, %v4042_v0  ;;  %v3131_v0 = vld [vmem:[%s5284_s8 + $0x68] sm:$0xf]  ;;  %vm649_vm5 = vcmp.eq.s32.totalorder %v603_v22, 0  ;;  %vm690_vm6 = vcmp.eq.s32.totalorder %v603_v22, 1 }
 0x25c   :  { %v3515_v22 = vld [vmem:[%s5285_s10 + $0xec] sm:$0xf0] }
 0x25e   :  { %v518_v8 = vpop.f32.mrf.mxu0 }
 0x25f   :  { %v519_v30 = vadd.f32 %v3840_v18, %v518_v8  ;;  %v636_v8 = vadd.f32 %v635_v56, %v3919_v33  ;;  %v644_v56 = vmul.f32 %v4033_v52, %v643_v40  ;;  %v3075_v40 = vld [vmem:[%s5284_s8] sm:$0xf] }
 0x261   :  { %v594_v41 = vmax.f32 %v519_v30, 0.0  ;;  %v637_v35 = vrot.slane %v636_v8, 2 }
 0x263   :  { %v675_v53 = vadd.f32 %v674_v47, %v594_v41  ;;  %v4121_v41 = vor.u32 %v3473_v29, %v3157_v31  ;;  %v3469_v47 = vld [vmem:[%s5284_s8 + $0x84] sm:$0xf]  ;;  %v638_v51 = vadd.f32 %v637_v35, %v636_v8  ;;  %v3107_v8 = vld [vmem:[%s5284_s8 + $0x40] sm:$0xf]  ;;  %v3099_v31 = vld [vmem:[%s5284_s8 + $0x28] sm:$0xf] }
 0x266   :  { %v520_v9 = vpop.f32.mrf.mxu0 }
 0x267   :  { %v521_v37 = vadd.f32 %v3840_v18, %v520_v9  ;;  %v4059_v9 = vor.u32 %v3481_v6, %v3189_v7  ;;  %v645_v6 = vadd.f32 %v4033_v52, %v644_v56 }
 0x269   :  { %v595_v48 = vmax.f32 %v521_v37, 0.0  ;;  %1086 = vmatpush.bf16.msrb.mxu1 %v4059_v9  ;;  %v647_v23 = vsel %vm646_vm4, %v4033_v52, %v645_v6  ;;  %v3093_v52 = vld [vmem:[%s5284_s8 + $0x30] sm:$0xf0]  ;;  %v3474_v6 = vld [vmem:[%s5284_s8 + $0xac] sm:$0xf] }
 0x26b   :  { %v676_v58 = vadd.f32 %v675_v53, %v595_v48  ;;  %v3141_v48 = vld [vmem:[%s5284_s8 + $0x90] sm:$0xf0] }
 0x26d   :  { %1087 = vmatpush.bf16.msrb.mxu1 %v4093_v25 }
 0x26e   :  { %v523_v10 = vpop.f32.mrf.mxu0 }
 0x26f   :  { %v524_v42 = vadd.f32 %v3840_v18, %v523_v10  ;;  %v3195_v10 = vld [vmem:[%s5284_s8 + $0xe8] sm:$0xf] }
 0x270   :  { %v4072_v33 = vor.u32 %v3484_v11, %v3195_v10  ;;  %v3463_v10 = vld [vmem:[%s5284_s8 + $0x4c] sm:$0xf0] }
 0x271   :  { %v596_v54 = vmax.f32 %v524_v42, 0.0  ;;  %v3139_v42 = vld [vmem:[%s5284_s8 + $0x80] sm:$0xf]  ;;  %1088 = vmatpush.bf16.msrb.mxu1 %v4121_v41  ;;  %v4202_v21 = vor.u32 %v3463_v10, %v3107_v8  ;;  %v3165_v8 = vld [vmem:[%s5284_s8 + $0xb8] sm:$0xf0] }
 0x272   :  { %1099 = vmatpush.bf16.msrb.mxu2 %v4072_v33  ;;  %v4286_v10 = vor.u32 %v3474_v6, %v3165_v8  ;;  %v3494_v8 = vld [vmem:[%s5285_s10 + $0x4c] sm:$0xf] }
 0x273   :  { %v677_v3 = vadd.f32 %v676_v58, %v596_v54  ;;  %v4145_v54 = vor.u32 %v3471_v43, %v3139_v42  ;;  %v3123_v58 = vld [vmem:[%s5284_s8 + $0x60] sm:$0xf]  ;;  %v3455_v42 = vld [vmem:[%s5284_s8 + $0xc] sm:$0xf0] }
 0x276   :  { %v525_v14 = vpop.f32.mrf.mxu0  ;;  %1100 = vmatpush.bf16.msrb.mxu2 %v4095_v26 }
 0x277   :  { %v526_v49 = vadd.f32 %v3840_v18, %v525_v14 }
 0x279   :  { %v597_v59 = vmax.f32 %v526_v49, 0.0  ;;  %v3147_v49 = vld [vmem:[%s5284_s8 + $0x88] sm:$0xf] }
 0x27b   :  { %v678_v13 = vadd.f32 %v677_v3, %v597_v59  ;;  %v3467_v59 = vld [vmem:[%s5284_s8 + $0x6c] sm:$0xf0]  ;;  %v639_v3 = vrot.slane %v638_v51, 1 }
 0x27c   :  { %v4173_v4 = vor.u32 %v3467_v59, %v3123_v58  ;;  %v3076_v58 = vor.u32 %v3455_v42, %v3075_v40  ;;  %v3507_v40 = vld [vmem:[%s5285_s10 + $0xac] sm:$0xf0] }
 0x27d   :  { %v640_v19 = vadd.f32 %v639_v3, %v638_v51  ;;  %v3456_v51 = vld [vmem:[%s5284_s8 + $0x14] sm:$0xf0] }
 0x27e   :  { %v528_v20 = vpop.f32.mrf.mxu0 }
 0x27f   :  { %v529_v50 = vadd.f32 %v3840_v18, %v528_v20  ;;  %v4081_v20 = vor.u32 %v3479_v16, %v3171_v12  ;;  %v4187_v12 = vor.u32 %v3468_v1, %v3131_v0  ;;  %v3464_v16 = vld [vmem:[%s5284_s8 + $0x54] sm:$0xf0]  ;;  %v3478_v0 = vld [vmem:[%s5284_s8 + $0xcc] sm:$0xf]  ;;  %v3181_v1 = vld [vmem:[%s5284_s8 + $0xd8] sm:$0xf0] }
 0x280   :  { %v4274_v3 = vor.u32 %v3478_v0, %v3181_v1  ;;  %v3498_v0 = vld [vmem:[%s5285_s10 + $0x6c] sm:$0xf]  ;;  %v3261_v1 = vld [vmem:[%s5285_s10 + $0x78] sm:$0xf0] }
 0x281   :  { %v598_v63 = vmax.f32 %v529_v50, 0.0  ;;  %1074 = vmatpush.bf16.msra.mxu3 %v4081_v20  ;;  %v3472_v50 = vld [vmem:[%s5284_s8 + $0x94] sm:$0xf0] }
 0x283   :  { %v679_v24 = vadd.f32 %v678_v13, %v598_v63  ;;  %v3125_v63 = vld [vmem:[%s5284_s8 + $0x70] sm:$0xf0]  ;;  %v3461_v13 = vld [vmem:[%s5284_s8 + $0x44] sm:$0xf] }
 0x284   :  { %v4177_v7 = vor.u32 %v3465_v62, %v3125_v63 }
 0x285   :  { %1075 = vmatpush.bf16.msra.mxu3 %v4117_v38 }
 0x286   :  { %v530_v34 = vpop.f32.mrf.mxu0 }
 0x287   :  { %v531_v60 = vadd.f32 %v3840_v18, %v530_v34  ;;  %v3476_v34 = vld [vmem:[%s5284_s8 + $0xb4] sm:$0xf0] }
 0x288   :  { %v4130_v45 = vor.u32 %v3476_v34, %v3163_v32  ;;  %v3460_v32 = vld [vmem:[%s5284_s8 + $0x34] sm:$0xf0]  ;;  %v648_v34 = vmul.f32 %v647_v23, %v640_v19 }
 0x289   :  { %v599_v14 = vmax.f32 %v531_v60, 0.0  ;;  %1076 = vmatpush.bf16.msra.mxu3 %v4145_v54 }
 0x28a   :  { %1101 = vmatpush.bf16.msrb.mxu2 %v4130_v45 }
 0x28b   :  { %v680_v36 = vadd.f32 %v679_v24, %v599_v14  ;;  %v3109_v14 = vld [vmem:[%s5284_s8 + $0x50] sm:$0xf0] }
 0x28c   :  { %v4207_v24 = vor.u32 %v3461_v13, %v3109_v14  ;;  %v3149_v13 = vld [vmem:[%s5284_s8 + $0x98] sm:$0xf0] }
 0x28d   :  { %1077 = vmatpush.bf16.msra.mxu3 %v4173_v4  ;;  %v3133_v14 = vld [vmem:[%s5284_s8 + $0x78] sm:$0xf0] }
 0x28e   :  { %v533_v57 = vpop.f32.mrf.mxu0 }
 0x28f   :  { %v534_v61 = vadd.f32 %v3840_v18, %v533_v57  ;;  %v4149_v57 = vor.u32 %v3469_v47, %v3141_v48  ;;  %v3482_v47 = vld [vmem:[%s5284_s8 + $0xec] sm:$0xf]  ;;  %v3197_v48 = vld [vmem:[%s5284_s8 + $0xf8] sm:$0xf0] }
 0x291   :  { %v600_v15 = vmax.f32 %v534_v61, 0.0  ;;  %v4158_v61 = vor.u32 %v3472_v50, %v3147_v49  ;;  %1089 = vmatpush.bf16.msrb.mxu1 %v4149_v57  ;;  %1078 = vmatpush.bf16.msra.mxu3 %v4202_v21  ;;  %v3077_v49 = vld [vmem:[%s5284_s8 + $0x10] sm:$0xf0]  ;;  %v3083_v50 = vld [vmem:[%s5284_s8 + $0x8] sm:$0xf] }
 0x292   :  { %v4265_v63 = vor.u32 %v3456_v51, %v3083_v50 }
 0x293   :  { %v681_v44 = vadd.f32 %v680_v36, %v600_v15  ;;  %1102 = vmatpush.bf16.msrb.mxu2 %v4158_v61  ;;  %v3115_v15 = vld [vmem:[%s5284_s8 + $0x48] sm:$0xf]  ;;  %v4231_v36 = vor.u32 %v3459_v28, %v3091_v27  ;;  %v3514_v28 = vld [vmem:[%s5285_s10 + $0xec] sm:$0xf] }
 0x295   :  { %1090 = vmatpush.bf16.msrb.mxu1 %v4177_v7  ;;  %1079 = vmatpush.bf16.msra.mxu3 %v4231_v36 }
 0x296   :  { %v535_v30 = vpop.f32.mrf.mxu0 }
 0x297   :  { %v536_v37 = vadd.f32 %v3840_v18, %v535_v30  ;;  %1103 = vmatpush.bf16.msrb.mxu2 %v4187_v12  ;;  %v4216_v30 = vor.u32 %v3464_v16, %v3115_v15  ;;  %v3117_v15 = vld [vmem:[%s5284_s8 + $0x58] sm:$0xf0] }
 0x299   :  { %v601_v18 = vmax.f32 %v536_v37, 0.0  ;;  %1091 = vmatpush.bf16.msrb.mxu1 %v4207_v24  ;;  %v3096_v37 = vor.u32 %v3457_v46, %v3093_v52  ;;  %1080 = vmatpush.bf16.msra.mxu3 %v3076_v58  ;;  %v3299_v46 = vld [vmem:[%s5285_s10 + $0xc0] sm:$0xf]  ;;  %v3511_v52 = vld [vmem:[%s5285_s10 + $0xcc] sm:$0xf0] }
 0x29b   :  { %v682_v53 = vadd.f32 %v681_v44, %v601_v18  ;;  %1104 = vmatpush.bf16.msrb.mxu2 %v4216_v30  ;;  %v4241_v44 = vor.u32 %v3460_v32, %v3099_v31  ;;  %v3453_v18 = vld [vmem:[%s5284_s8 + $0x4] sm:$0xf] }
 0x29c   :  { %v3080_v62 = vor.u32 %v3453_v18, %v3077_v49  ;;  %v3506_v18 = vld [vmem:[%s5285_s10 + $0xac] sm:$0xf] }
 0x29d   :  { %v683_v60 = vrot.slane %v682_v53, 4  ;;  %1092 = vmatpush.bf16.msrb.mxu1 %v3096_v37 }
 0x29f   :  { %v684_v2 = vadd.f32 %v683_v60, %v682_v53  ;;  %v650_v53 = vsel %vm649_vm5, %v648_v34, 0.0  ;;  %v4262_v60 = vor.u32 %v3482_v47, %v3197_v48  ;;  %1105 = vmatpush.bf16.msrb.mxu2 %v4241_v44  ;;  %v4373_v34 = vor.u32 %v3511_v52, %v3299_v46  ;;  %v3293_v47 = vld [vmem:[%s5285_s10 + $0xb8] sm:$0xf0]  ;;  %v3503_v48 = vld [vmem:[%s5285_s10 + $0x8c] sm:$0xf0] }
 0x2a0   :  { %v4409_v50 = vor.u32 %v3506_v18, %v3293_v47  ;;  %v3508_v46 = vld [vmem:[%s5285_s10 + $0xb4] sm:$0xf0] }
 0x2a1   :  { %v685_v11 = vrot.slane %v684_v2, 2  ;;  %1112 = vmatpush.bf16.msrb.mxu3 %v4262_v60  ;;  %1093 = vmatpush.bf16.msrb.mxu1 %v3080_v62 }
 0x2a2   :  { %5322 = vst [vmem:[#allocation4_spill] sm:$0xff] %v4409_v50 }
 0x2a3   :  { %v686_v17 = vadd.f32 %v685_v11, %v684_v2  ;;  %1106 = vmatpush.bf16.msrb.mxu2 %v4265_v63  ;;  %v3470_v11 = vld [vmem:[%s5284_s8 + $0x8c] sm:$0xf] }
 0x2a5   :  { %v687_v29 = vrot.slane %v686_v17, 1  ;;  %1113 = vmatpush.bf16.msrb.mxu3 %v4274_v3 }
 0x2a7   :  { %v688_v35 = vadd.f32 %v687_v29, %v686_v17  ;;  %1140 = vmatpush.bf16.msra.mxu2 %v4059_v9  ;;  %v3466_v9 = vld [vmem:[%s5284_s8 + $0x6c] sm:$0xf]  ;;  %v3553_v17 = vld [vmem:[%s5281_s4] ss:$0 sm:$0xff]  ;;  %v3325_v29 = vld [vmem:[%s5285_s10 + $0xf8] sm:$0xf0] }
 0x2a8   :  { %v4369_v32 = vor.u32 %v3514_v28, %v3325_v29  ;;  %v3291_v29 = vld [vmem:[%s5285_s10 + $0xa8] sm:$0xf] }
 0x2a9   :  { %v689_v43 = vmul.f32 %v688_v35, %v647_v23  ;;  %1114 = vmatpush.bf16.msrb.mxu3 %v4286_v10  ;;  %v3510_v35 = vld [vmem:[%s5285_s10 + $0xcc] sm:$0xf] }
 0x2aa   :  { %5320 = vst [vmem:[#allocation2_spill] sm:$0xff] %v4369_v32  ;;  %2558 = vmatpush.bf16.msrb.mxu0 %v4369_v32 }
 0x2ab   :  { %v691_v56 = vsel %vm690_vm6, %v689_v43, 0.0  ;;  %1141 = vmatpush.bf16.msra.mxu2 %v4093_v25  ;;  %v3462_v25 = vld [vmem:[%s5284_s8 + $0x4c] sm:$0xf] }
 0x2ac   :  { %v692_v59 = vadd.f32 %v691_v56, %v650_v53  ;;  %v3502_v53 = vld [vmem:[%s5285_s10 + $0x8c] sm:$0xf]  ;;  %v3277_v56 = vld [vmem:[%s5285_s10 + $0x98] sm:$0xf0] }
 0x2ae   :  { %v693_v2 = vpack.c.bf16 %v692_v59, %v692_v59 }
 0x2af   :  { %1142 = vmatpush.bf16.msra.mxu2 %v4121_v41  ;;  %v3458_v41 = vld [vmem:[%s5284_s8 + $0x2c] sm:$0xf] }
 0x2b0   :  { %770 = vmatmul.bf16.vlgmr.msra.gmra.mxu1 %v693_v2  ;;  %v3495_v2 = vld [vmem:[%s5285_s10 + $0x4c] sm:$0xf0] }
 0x2b1   :  { %1126 = vmatpush.bf16.msra.mxu1 %v4050_v5  ;;  %v4297_v5 = vor.u32 %v3470_v11, %v3149_v13  ;;  %v3491_v11 = vld [vmem:[%s5285_s10 + $0x2c] sm:$0xf0] }
 0x2b3   :  { %1115 = vmatpush.bf16.msrb.mxu3 %v4297_v5  ;;  %1143 = vmatpush.bf16.msra.mxu2 %v4149_v57 }
 0x2b5   :  { %1127 = vmatpush.bf16.msra.mxu1 %v4081_v20  ;;  %v4308_v20 = vor.u32 %v3466_v9, %v3133_v14  ;;  %v3490_v9 = vld [vmem:[%s5285_s10 + $0x2c] sm:$0xf]  ;;  %v3229_v14 = vld [vmem:[%s5285_s10 + $0x38] sm:$0xf0] }
 0x2b7   :  { %1116 = vmatpush.bf16.msrb.mxu3 %v4308_v20  ;;  %1144 = vmatpush.bf16.msra.mxu2 %v4177_v7  ;;  %v3085_v7 = vld [vmem:[%s5284_s8 + $0x18] sm:$0xf0] }
 0x2b9   :  { %1128 = vmatpush.bf16.msra.mxu1 %v4117_v38  ;;  %v4319_v38 = vor.u32 %v3462_v25, %v3117_v15  ;;  %v3513_v25 = vld [vmem:[%s5285_s10 + $0xe4] sm:$0xf]  ;;  %v3317_v15 = vld [vmem:[%s5285_s10 + $0xf0] sm:$0xf0] }
 0x2bb   :  { %1117 = vmatpush.bf16.msrb.mxu3 %v4319_v38  ;;  %1145 = vmatpush.bf16.msra.mxu2 %v4207_v24 }
 0x2bd   :  { %1129 = vmatpush.bf16.msra.mxu1 %v4145_v54  ;;  %v3101_v54 = vld [vmem:[%s5284_s8 + $0x38] sm:$0xf0] }
 0x2be   :  { %v4333_v57 = vor.u32 %v3458_v41, %v3101_v54  ;;  %v3516_v41 = vld [vmem:[%s5285_s10 + $0xf4] sm:$0xf0]  ;;  %v4505_v54 = vor.u32 %v3490_v9, %v3229_v14 }
 0x2bf   :  { %1146 = vmatpush.bf16.msra.mxu2 %v3096_v37 }
 0x2c0   :  { %1118 = vmatpush.bf16.msrb.mxu3 %v4333_v57  ;;  %5326 = vst [vmem:[#allocation8_spill] sm:$0xff] %v4505_v54 }
 0x2c1   :  { %1130 = vmatpush.bf16.msra.mxu1 %v4173_v4  ;;  %v3454_v4 = vld [vmem:[%s5284_s8 + $0xc] sm:$0xf] }
 0x2c2   :  { %v4342_v16 = vor.u32 %v3454_v4, %v3085_v7  ;;  %v4511_v7 = vor.u32 %v3513_v25, %v3317_v15  ;;  %v3211_v25 = vld [vmem:[%s5285_s10 + $0x8] sm:$0xf]  ;;  %v3488_v15 = vld [vmem:[%s5285_s10 + $0x14] sm:$0xf0] }
 0x2c3   :  { %1147 = vmatpush.bf16.msra.mxu2 %v3080_v62 }
 0x2c4   :  { %1119 = vmatpush.bf16.msrb.mxu3 %v4342_v16 }
 0x2c5   :  { %1131 = vmatpush.bf16.msra.mxu1 %v4202_v21  ;;  %v3315_v21 = vld [vmem:[%s5285_s10 + $0xe0] sm:$0xf] }
 0x2c6   :  { %v4354_v27 = vor.u32 %v3515_v22, %v3315_v21  ;;  %v3512_v21 = vld [vmem:[%s5285_s10 + $0xd4] sm:$0xf0]  ;;  %v3486_v22 = vld [vmem:[%s5285_s10 + $0xc] sm:$0xf] }
 0x2c9   :  { %1132 = vmatpush.bf16.msra.mxu1 %v4231_v36  ;;  %v3309_v36 = vld [vmem:[%s5285_s10 + $0xd8] sm:$0xf0] }
 0x2ca   :  { %v4389_v42 = vor.u32 %v3510_v35, %v3309_v36  ;;  %v4566_v35 = vor.u32 %v3508_v46, %v3291_v29  ;;  %v3501_v36 = vld [vmem:[%s5285_s10 + $0x84] sm:$0xf] }
 0x2cc   :  { %5321 = vst [vmem:[#allocation3_spill] sm:$0xff] %v4389_v42  ;;  %2559 = vmatpush.bf16.msrb.mxu0 %v4389_v42 }
 0x2cd   :  { %1133 = vmatpush.bf16.msra.mxu1 %v3076_v58  ;;  %v3499_v58 = vld [vmem:[%s5285_s10 + $0x6c] sm:$0xf0] }
 0x2d0   :  { %2560 = vmatpush.bf16.msrb.mxu0 %v4409_v50 }
 0x2d1   :  { %v865_v31 = vpop.f32.mrf.mxu2 }
 0x2d9   :  { %v867_v49 = vpop.f32.mrf.mxu2 }
 0x2da   :  { %v4428_v59 = vpack.c.bf16 %v867_v49, %v865_v31  ;;  %v3259_v49 = vld [vmem:[%s5285_s10 + $0x68] sm:$0xf] }
 0x32d   :  { %v771_v19 = vpop.f32.mrf.mxu1 }
 0x32e   :  { %v772_v23 = vadd.f32 %v3553_v17, %v771_v19  ;;  %v3509_v19 = vld [vmem:[%s5285_s10 + $0xc4] sm:$0xf] }
 0x330   :  { %v903_v24 = vpack.c.bf16 %v772_v23, %v772_v23  ;;  %v3213_v23 = vld [vmem:[%s5285_s10 + $0x18] sm:$0xf0] }
 0x331   :  { %v4557_v52 = vor.u32 %v3486_v22, %v3213_v23 }
 0x332   :  { %1081 = vmatmul.bf16.vlgmr.msra.gmra.mxu3 %v903_v24  ;;  %1094 = vmatmul.bf16.vlgmr.msrb.gmra.mxu1 %v903_v24 }
 0x333   :  { %1107 = vmatmul.bf16.vlgmr.msrb.gmra.mxu2 %v903_v24  ;;  %1154 = vmatpush.bf16.msra.mxu3 %v4072_v33  ;;  %v3283_v33 = vld [vmem:[%s5285_s10 + $0xa0] sm:$0xf]  ;;  %5327 = vst [vmem:[#allocation9_spill] sm:$0xff] %v4557_v52 }
 0x334   :  { %1168 = vmatpush.bf16.msrb.mxu1 %v4262_v60  ;;  %1392 = vmatpush.bf16.msrb.mxu2 %v4354_v27  ;;  %v4393_v43 = vor.u32 %v3507_v40, %v3283_v33  ;;  %v4431_v60 = vor.u32 %v3502_v53, %v3277_v56  ;;  %v3275_v33 = vld [vmem:[%s5285_s10 + $0x88] sm:$0xf]  ;;  %v3504_v40 = vld [vmem:[%s5285_s10 + $0x94] sm:$0xf0] }
 0x335   :  { %v773_v37 = vpop.f32.mrf.mxu1  ;;  %v4586_v47 = vor.u32 %v3504_v40, %v3275_v33  ;;  %v3500_v53 = vld [vmem:[%s5285_s10 + $0x74] sm:$0xf0] }
 0x336   :  { %5323 = vst [vmem:[#allocation5_spill] sm:$0xff] %v4431_v60  ;;  %2561 = vmatpush.bf16.msrb.mxu0 %v4431_v60  ;;  %v3269_v37 = vld [vmem:[%s5285_s10 + $0x90] sm:$0xf0] }
 0x337   :  { %1155 = vmatpush.bf16.msra.mxu3 %v4095_v26  ;;  %v3267_v26 = vld [vmem:[%s5285_s10 + $0x80] sm:$0xf]  ;;  %v4584_v18 = vor.u32 %v3501_v36, %v3269_v37 }
 0x338   :  { %1169 = vmatpush.bf16.msrb.mxu1 %v4274_v3  ;;  %1393 = vmatpush.bf16.msrb.mxu2 %v4373_v34  ;;  %v4413_v51 = vor.u32 %v3503_v48, %v3267_v26  ;;  %v4453_v3 = vor.u32 %v3498_v0, %v3261_v1  ;;  %v3497_v26 = vld [vmem:[%s5285_s10 + $0x64] sm:$0xf]  ;;  %v3253_v48 = vld [vmem:[%s5285_s10 + $0x70] sm:$0xf0]  ;;  %v3243_v0 = vld [vmem:[%s5285_s10 + $0x48] sm:$0xf] }
 0x339   :  { %v4604_v56 = vor.u32 %v3497_v26, %v3253_v48  ;;  %v3496_v1 = vld [vmem:[%s5285_s10 + $0x54] sm:$0xf0] }
 0x33a   :  { %5324 = vst [vmem:[#allocation6_spill] sm:$0xff] %v4453_v3  ;;  %2562 = vmatpush.bf16.msrb.mxu0 %v4453_v3 }
 0x33b   :  { %1156 = vmatpush.bf16.msra.mxu3 %v4130_v45  ;;  %v3251_v45 = vld [vmem:[%s5285_s10 + $0x60] sm:$0xf] }
 0x33c   :  { %1170 = vmatpush.bf16.msrb.mxu1 %v4286_v10  ;;  %1394 = vmatpush.bf16.msrb.mxu2 %v4393_v43  ;;  %v4435_v62 = vor.u32 %v3499_v58, %v3251_v45  ;;  %v3245_v10 = vld [vmem:[%s5285_s10 + $0x58] sm:$0xf0]  ;;  %v4606_v45 = vor.u32 %v3500_v53, %v3259_v49  ;;  %v3493_v58 = vld [vmem:[%s5285_s10 + $0x44] sm:$0xf] }
 0x33d   :  { %v4473_v13 = vor.u32 %v3494_v8, %v3245_v10  ;;  %v3489_v8 = vld [vmem:[%s5285_s10 + $0x24] sm:$0xf]  ;;  %v3221_v10 = vld [vmem:[%s5285_s10 + $0x30] sm:$0xf0] }
 0x33e   :  { %v4644_v9 = vor.u32 %v3489_v8, %v3221_v10 }
 0x33f   :  { %1157 = vmatpush.bf16.msra.mxu3 %v4158_v61  ;;  %v3235_v61 = vld [vmem:[%s5285_s10 + $0x40] sm:$0xf]  ;;  %5325 = vst [vmem:[#allocation7_spill] sm:$0xff] %v4473_v13  ;;  %2563 = vmatpush.bf16.msrb.mxu0 %v4473_v13 }
 0x340   :  { %1171 = vmatpush.bf16.msrb.mxu1 %v4297_v5  ;;  %1395 = vmatpush.bf16.msrb.mxu2 %v4413_v51  ;;  %v4457_v6 = vor.u32 %v3495_v2, %v3235_v61  ;;  %v4626_v2 = vor.u32 %v3496_v1, %v3243_v0  ;;  %v4731_v0 = vld [vmem:[%s5287_s11 + $0x38] sm:$0xff] }
 0x342   :  { %1120 = vmatmul.bf16.vlgmr.msrb.gmra.mxu3 %v903_v24  ;;  %1134 = vmatmul.bf16.vlgmr.msra.gmra.mxu1 %v4428_v59 }
 0x343   :  { %1148 = vmatmul.bf16.vlgmr.msra.gmra.mxu2 %v4428_v59  ;;  %1158 = vmatpush.bf16.msra.mxu3 %v4187_v12  ;;  %v3219_v12 = vld [vmem:[%s5285_s10 + $0x20] sm:$0xf] }
 0x344   :  { %1172 = vmatpush.bf16.msrb.mxu1 %v4308_v20  ;;  %1396 = vmatpush.bf16.msrb.mxu2 %v4435_v62  ;;  %v4477_v5 = vor.u32 %v3491_v11, %v3219_v12  ;;  %v3487_v20 = vld [vmem:[%s5285_s10 + $0xc] sm:$0xf0]  ;;  %v3227_v12 = vld [vmem:[%s5285_s10 + $0x28] sm:$0xf]  ;;  %v3492_v11 = vld [vmem:[%s5285_s10 + $0x34] sm:$0xf0] }
 0x345   :  { %2564 = vmatpush.bf16.msrb.mxu0 %v4505_v54  ;;  %v4646_v14 = vor.u32 %v3492_v11, %v3227_v12  ;;  %v4741_v12 = vld [vmem:[%s5287_s11 + $0x30] sm:$0xff] }
 0x347   :  { %1159 = vmatpush.bf16.msra.mxu3 %v4216_v30  ;;  %v3203_v30 = vld [vmem:[%s5285_s10] sm:$0xf] }
 0x348   :  { %1173 = vmatpush.bf16.msrb.mxu1 %v4319_v38  ;;  %1397 = vmatpush.bf16.msrb.mxu2 %v4457_v6  ;;  %v3323_v38 = vld [vmem:[%s5285_s10 + $0xe8] sm:$0xf]  ;;  %v4509_v4 = vor.u32 %v3487_v20, %v3203_v30  ;;  %v3485_v30 = vld [vmem:[%s5285_s10 + $0x4] sm:$0xf]  ;;  %v3205_v20 = vld [vmem:[%s5285_s10 + $0x10] sm:$0xf0] }
 0x349   :  { %v4513_v17 = vor.u32 %v3516_v41, %v3323_v38  ;;  %2565 = vmatpush.bf16.msrb.mxu0 %v4557_v52  ;;  %v4664_v38 = vor.u32 %v3485_v30, %v3205_v20  ;;  %v4666_v41 = vor.u32 %v3488_v15, %v3211_v25  ;;  %v4749_v30 = vld [vmem:[%s5287_s11 + $0x28] sm:$0xff]  ;;  %v4756_v15 = vld [vmem:[%s5287_s11 + $0x20] sm:$0xff] }
 0x34b   :  { %1160 = vmatpush.bf16.msra.mxu3 %v4241_v44  ;;  %v3301_v44 = vld [vmem:[%s5285_s10 + $0xd0] sm:$0xf0] }
 0x34c   :  { %1174 = vmatpush.bf16.msrb.mxu1 %v4333_v57  ;;  %1398 = vmatpush.bf16.msrb.mxu2 %v4477_v5  ;;  %v3307_v57 = vld [vmem:[%s5285_s10 + $0xc8] sm:$0xf]  ;;  %v4539_v24 = vor.u32 %v3509_v19, %v3301_v44 }
 0x34d   :  { %v4541_v28 = vor.u32 %v3512_v21, %v3307_v57  ;;  %2706 = vmatpush.bf16.msra.mxu0 %v4513_v17  ;;  %v902_v21 = vld [vmem:[%s5286_s9] sm:$0xf] }
 0x34e   :  { %v4707_v23 = vperm.slane %v902_v21, 0  ;;  %v4712_v46 = vperm.slane %v902_v21, 1  ;;  %v4721_v49 = vperm.slane %v902_v21, 3 }
 0x34f   :  { %1161 = vmatpush.bf16.msra.mxu3 %v4265_v63  ;;  %v3505_v63 = vld [vmem:[%s5285_s10 + $0xa4] sm:$0xf] }
 0x350   :  { %1175 = vmatpush.bf16.msrb.mxu1 %v4342_v16  ;;  %1399 = vmatpush.bf16.msrb.mxu2 %v4509_v4  ;;  %v3285_v16 = vld [vmem:[%s5285_s10 + $0xb0] sm:$0xf0]  ;;  %5328 = vst [vmem:[#allocation10_spill] sm:$0xff] %v4707_v23 }
 0x351   :  { %v4564_v31 = vor.u32 %v3505_v63, %v3285_v16  ;;  %2707 = vmatpush.bf16.msra.mxu0 %v4541_v28  ;;  %5330 = vst [vmem:[#allocation12_spill] sm:$0xff] %v4712_v46 }
 0x352   :  { %1162 = vmatmul.bf16.vlgmr.msra.gmra.mxu3 %v4428_v59  ;;  %5334 = vst [vmem:[#allocation16_spill] sm:$0xff] %v4721_v49 }
 0x353   :  { %1405 = vmatpush.bf16.msrb.mxu3 %v4511_v7  ;;  %1176 = vmatmul.bf16.vlgmr.msrb.gmra.mxu1 %v4428_v59  ;;  %v3237_v59 = vld [vmem:[%s5285_s10 + $0x50] sm:$0xf0] }
 0x354   :  { %1418 = vmatpush.bf16.msra.mxu1 %v4513_v17  ;;  %1431 = vmatpush.bf16.msra.mxu2 %v4369_v32  ;;  %v4624_v61 = vor.u32 %v3493_v58, %v3237_v59  ;;  %v4726_v59 = vperm.slane %v902_v21, 2 }
 0x355   :  { %1400 = vmatmul.bf16.vlgmr.msrb.gmra.mxu2 %v3712_v39  ;;  %2708 = vmatpush.bf16.msra.mxu0 %v4566_v35 }
 0x356   :  { %5336 = vst [vmem:[#allocation18_spill] sm:$0xff] %v4726_v59 }
 0x357   :  { %1406 = vmatpush.bf16.msrb.mxu3 %v4539_v24 }
 0x358   :  { %1419 = vmatpush.bf16.msra.mxu1 %v4541_v28  ;;  %1432 = vmatpush.bf16.msra.mxu2 %v4389_v42 }
 0x359   :  { %2709 = vmatpush.bf16.msra.mxu0 %v4586_v47 }
 0x35b   :  { %1407 = vmatpush.bf16.msrb.mxu3 %v4564_v31 }
 0x35c   :  { %1420 = vmatpush.bf16.msra.mxu1 %v4566_v35  ;;  %1433 = vmatpush.bf16.msra.mxu2 %v4409_v50 }
 0x35d   :  { %2710 = vmatpush.bf16.msra.mxu0 %v4606_v45 }
 0x35f   :  { %1408 = vmatpush.bf16.msrb.mxu3 %v4584_v18 }
 0x360   :  { %1421 = vmatpush.bf16.msra.mxu1 %v4586_v47  ;;  %1434 = vmatpush.bf16.msra.mxu2 %v4431_v60 }
 0x361   :  { %2711 = vmatpush.bf16.msra.mxu0 %v4626_v2 }
 0x363   :  { %1409 = vmatpush.bf16.msrb.mxu3 %v4604_v56 }
 0x364   :  { %1422 = vmatpush.bf16.msra.mxu1 %v4606_v45  ;;  %1435 = vmatpush.bf16.msra.mxu2 %v4453_v3 }
 0x365   :  { %2712 = vmatpush.bf16.msra.mxu0 %v4646_v14 }
 0x367   :  { %1410 = vmatpush.bf16.msrb.mxu3 %v4624_v61 }
 0x368   :  { %1423 = vmatpush.bf16.msra.mxu1 %v4626_v2  ;;  %1436 = vmatpush.bf16.msra.mxu2 %v4473_v13 }
 0x369   :  { %2713 = vmatpush.bf16.msra.mxu0 %v4666_v41 }
 0x36b   :  { %1411 = vmatpush.bf16.msrb.mxu3 %v4644_v9 }
 0x36c   :  { %1424 = vmatpush.bf16.msra.mxu1 %v4646_v14  ;;  %1437 = vmatpush.bf16.msra.mxu2 %v4505_v54 }
 0x36f   :  { %1412 = vmatpush.bf16.msrb.mxu3 %v4664_v38 }
 0x370   :  { %1425 = vmatpush.bf16.msra.mxu1 %v4666_v41  ;;  %1438 = vmatpush.bf16.msra.mxu2 %v4557_v52 }
 0x372   :  { %1413 = vmatmul.bf16.vlgmr.msrb.gmra.mxu3 %v3712_v39 }
 0x373   :  { %1426 = vmatmul.bf16.vlgmr.msra.gmra.mxu1 %v3712_v39  ;;  %1439 = vmatmul.bf16.vlgmr.msra.gmra.mxu2 %v3712_v39 }
 0x374   :  { %1586 = vmatpush.bf16.msrb.mxu1 %v4354_v27  ;;  %1599 = vmatpush.bf16.msrb.mxu2 %v4511_v7 }
 0x375   :  { %1563 = vmatpush.bf16.msra.mxu3 %v4731_v0 }
 0x378   :  { %1587 = vmatpush.bf16.msrb.mxu1 %v4373_v34  ;;  %1600 = vmatpush.bf16.msrb.mxu2 %v4539_v24 }
 0x379   :  { %1564 = vmatpush.bf16.msra.mxu3 %v4741_v12 }
 0x37c   :  { %1588 = vmatpush.bf16.msrb.mxu1 %v4393_v43  ;;  %1601 = vmatpush.bf16.msrb.mxu2 %v4564_v31 }
 0x37d   :  { %1565 = vmatpush.bf16.msra.mxu3 %v4749_v30 }
 0x380   :  { %1589 = vmatpush.bf16.msrb.mxu1 %v4413_v51  ;;  %1602 = vmatpush.bf16.msrb.mxu2 %v4584_v18 }
 0x381   :  { %1566 = vmatpush.bf16.msra.mxu3 %v4756_v15 }
 0x384   :  { %1590 = vmatpush.bf16.msrb.mxu1 %v4435_v62  ;;  %1603 = vmatpush.bf16.msrb.mxu2 %v4604_v56 }
 0x388   :  { %1591 = vmatpush.bf16.msrb.mxu1 %v4457_v6  ;;  %1604 = vmatpush.bf16.msrb.mxu2 %v4624_v61 }
 0x38c   :  { %1592 = vmatpush.bf16.msrb.mxu1 %v4477_v5  ;;  %1605 = vmatpush.bf16.msrb.mxu2 %v4644_v9 }
 0x390   :  { %1593 = vmatpush.bf16.msrb.mxu1 %v4509_v4  ;;  %1606 = vmatpush.bf16.msrb.mxu2 %v4664_v38 }
 0x394   :  { %1625 = vmatpush.bf16.msra.mxu1 %v4369_v32  ;;  %1706 = vmatpush.bf16.msra.mxu2 %v4731_v0 }
 0x398   :  { %1626 = vmatpush.bf16.msra.mxu1 %v4389_v42  ;;  %1707 = vmatpush.bf16.msra.mxu2 %v4741_v12 }
 0x39c   :  { %1627 = vmatpush.bf16.msra.mxu1 %v4409_v50  ;;  %1708 = vmatpush.bf16.msra.mxu2 %v4749_v30 }
 0x3a0   :  { %1628 = vmatpush.bf16.msra.mxu1 %v4431_v60  ;;  %1709 = vmatpush.bf16.msra.mxu2 %v4756_v15 }
 0x3a4   :  { %1629 = vmatpush.bf16.msra.mxu1 %v4453_v3 }
 0x3a8   :  { %1630 = vmatpush.bf16.msra.mxu1 %v4473_v13 }
 0x3ac   :  { %1631 = vmatpush.bf16.msra.mxu1 %v4505_v54 }
 0x3af   :  { %v1095_v39 = vpop.f32.mrf.mxu1 }
 0x3b0   :  { %1632 = vmatpush.bf16.msra.mxu1 %v4557_v52 }
 0x3b5   :  { %v1082_v19 = vpop.f32.mrf.mxu3 }
 0x3b6   :  { %v4702_v44 = vpop.f32.mrf.mxu2  ;;  %v1083_v11 = vadd.f32 %v1082_v19, %v4707_v23  ;;  %v4763_v19 = vld [vmem:[%s5287_s11 + $0x18] sm:$0xff] }
 0x3b7   :  { %v1097_v57 = vpop.f32.mrf.mxu1  ;;  %1567 = vmatpush.bf16.msra.mxu3 %v4763_v19  ;;  %1710 = vmatpush.bf16.msra.mxu2 %v4763_v19 }
 0x3bd   :  { %v1084_v22 = vpop.f32.mrf.mxu3 }
 0x3be   :  { %v1110_v63 = vpop.f32.mrf.mxu2  ;;  %v4772_v22 = vld [vmem:[%s5287_s11 + $0x10] sm:$0xff] }
 0x3bf   :  { %v1135_v16 = vpop.f32.mrf.mxu1  ;;  %1568 = vmatpush.bf16.msra.mxu3 %v4772_v22  ;;  %1711 = vmatpush.bf16.msra.mxu2 %v4772_v22 }
 0x3c0   :  { %v4710_v29 = vadd.f32 %v1135_v16, %v4707_v23 }
 0x3c2   :  { %5329 = vst [vmem:[#allocation11_spill] sm:$0xff] %v4710_v29 }
 0x3c5   :  { %v1121_v36 = vpop.f32.mrf.mxu3 }
 0x3c6   :  { %v1149_v37 = vpop.f32.mrf.mxu2 }
 0x3c7   :  { %v4715_v33 = vadd.f32 %v1149_v37, %v4712_v46  ;;  %v4717_v40 = vpop.f32.mrf.mxu1  ;;  %v4781_v37 = vld [vmem:[%s5287_s11 + $0x8] sm:$0xff] }
 0x3c8   :  { %5332 = vst [vmem:[#allocation14_spill] sm:$0xff] %v4717_v40  ;;  %1569 = vmatpush.bf16.msra.mxu3 %v4781_v37  ;;  %1712 = vmatpush.bf16.msra.mxu2 %v4781_v37 }
 0x3c9   :  { %5331 = vst [vmem:[#allocation13_spill] sm:$0xff] %v4715_v33 }
 0x3cd   :  { %v1123_v26 = vpop.f32.mrf.mxu3 }
 0x3ce   :  { %v4719_v48 = vpop.f32.mrf.mxu2 }
 0x3cf   :  { %5333 = vst [vmem:[#allocation15_spill] sm:$0xff] %v4719_v48 }
 0x3d0   :  { %v1177_v53 = vpop.f32.mrf.mxu1 }
 0x3d1   :  { %v4724_v58 = vadd.f32 %v1177_v53, %v4721_v49 }
 0x3d3   :  { %5335 = vst [vmem:[#allocation17_spill] sm:$0xff] %v4724_v58 }
 0x3d5   :  { %v1163_v1 = vpop.f32.mrf.mxu3 }
 0x3d6   :  { %v4734_v8 = vadd.f32 %v1163_v1, %v4726_v59  ;;  %v4788_v1 = vld [vmem:[%s5287_s11] sm:$0xff] }
 0x3d7   :  { %5340 = vst [vmem:[#allocation22_spill] sm:$0xff] %v4788_v1  ;;  %1570 = vmatpush.bf16.msra.mxu3 %v4788_v1  ;;  %1713 = vmatpush.bf16.msra.mxu2 %v4788_v1 }
 0x3d8   :  { %5337 = vst [vmem:[#allocation19_spill] sm:$0xff] %v4734_v8  ;;  %v1401_v10 = vpop.f32.mrf.mxu2  ;;  %v4765_v21 = vpop.f32.mrf.mxu1 }
 0x3d9   :  { %v1444_v20 = vadd.f32 %v1401_v10, %v1083_v11  ;;  %5338 = vst [vmem:[#allocation20_spill] sm:$0xff] %v4765_v21  ;;  %v1096_v10 = vadd.f32 %v1095_v39, %v4712_v46  ;;  %v1122_v11 = vadd.f32 %v1121_v36, %v4721_v49 }
 0x3db   :  { %v3329_v57 = vmul.f32 -1.442695, %v1444_v20  ;;  %1612 = vmatpush.bf16.msrb.mxu3 %v4513_v17 }
 0x3dd   :  { %3557 = vpow2.f32 %v3329_v57  ;;  %v4776_v63 = vpop.f32.mrf.mxu3 }
 0x3de   :  { %5339 = vst [vmem:[#allocation21_spill] sm:$0xff] %v4776_v63 }
 0x3df   :  { %1613 = vmatpush.bf16.msrb.mxu3 %v4541_v28 }
 0x3e0   :  { %v1403_v25 = vpop.f32.mrf.mxu2 }
 0x3e3   :  { %v3558_v16 = vpop.eup %3557  ;;  %1614 = vmatpush.bf16.msrb.mxu3 %v4566_v35 }
 0x3e4   :  { %v1451_v53 = vadd.f32 1.0, %v3558_v16 }
 0x3e6   :  { %3559 = vrcp.f32 %v1451_v53  ;;  %vm1457_vm8 = vweird.f32 %v1451_v53 }
 0x3e7   :  { %1615 = vmatpush.bf16.msrb.mxu3 %v4586_v47 }
 0x3eb   :  { %1616 = vmatpush.bf16.msrb.mxu3 %v4606_v45 }
 0x3ec   :  { %v3560_v39 = vpop.eup %3559 }
 0x3ed   :  { %v1453_v23 = vmul.f32 %v3560_v39, %v1451_v53  ;;  %vm1458_vm7 = vweird.f32 %v3560_v39 }
 0x3ee   :  { %vm1459_vm9 = vmor %vm1457_vm8, %vm1458_vm7 }
 0x3ef   :  { %1617 = vmatpush.bf16.msrb.mxu3 %v4626_v2 }
 0x3f0   :  { %v1427_v26 = vpop.f32.mrf.mxu1 }
 0x3f3   :  { %1618 = vmatpush.bf16.msrb.mxu3 %v4646_v14 }
 0x3f5   :  { %v1414_v20 = vpop.f32.mrf.mxu3 }
 0x3f6   :  { %v1445_v25 = vadd.f32 %v1414_v20, %v1096_v10  ;;  %v1440_v57 = vpop.f32.mrf.mxu2  ;;  %v1454_v10 = vsub.f32 1.0, %v1453_v23 }
 0x3f7   :  { %v1447_v16 = vadd.f32 %v1440_v57, %v1122_v11  ;;  %v1463_v57 = vand.u32 2147483648, %v1451_v53  ;;  %1619 = vmatpush.bf16.msrb.mxu3 %v4666_v41 }
 0x3f8   :  { %v1429_v55 = vpop.f32.mrf.mxu1  ;;  %v3330_v63 = vmul.f32 -1.442695, %v1445_v25 }
 0x3f9   :  { %v3331_v21 = vmul.f32 -1.442695, %v1447_v16  ;;  %v1109_v55 = vadd.f32 %v4702_v44, %v4726_v59 }
 0x3fa   :  { %3561 = vpow2.f32 %v3330_v63 }
 0x3fb   :  { %3563 = vpow2.f32 %v3331_v21  ;;  %v1455_v21 = vmul.f32 %v3560_v39, %v1454_v10 }
 0x3fd   :  { %v1416_v40 = vpop.f32.mrf.mxu3  ;;  %v1456_v25 = vadd.f32 %v3560_v39, %v1455_v21 }
 0x3fe   :  { %v1442_v36 = vpop.f32.mrf.mxu2  ;;  %v1446_v40 = vadd.f32 %v1427_v26, %v1109_v55  ;;  %v1464_v55 = vor.u32 1.1754944e-38, %v1463_v57 }
 0x3ff   :  { %v1460_v44 = vsel %vm1459_vm9, %v3560_v39, %v1456_v25  ;;  %v5342_v25 = vmov 0.0  }
 0x400   :  { %v3562_v49 = vpop.eup %3561 }
 0x401   :  { %v3564_v48 = vpop.eup %3563  ;;  %v1470_v46 = vadd.f32 1.0, %v3562_v49 }
 0x402   :  { %v1490_v11 = vadd.f32 1.0, %v3564_v48  ;;  %v1461_v48 = vand.u32 2147483647, %v1451_v53  ;;  %v4807_v53 = vld [vmem:[%s5280_s7] sm:$0x3] }
 0x403   :  { %3565 = vrcp.f32 %v1470_v46  ;;  %v1482_v36 = vand.u32 2147483648, %v1470_v46  ;;  %v1480_v26 = vand.u32 2147483647, %v1470_v46  ;;  %vm1476_vm12 = vweird.f32 %v1470_v46  ;;  %5341 = vst [vmem:[#allocation23_spill] sm:$0xff] %v4807_v53 }
 0x404   :  { %3567 = vrcp.f32 %v1490_v11  ;;  %vm1462_vm11 = vcmp.eq.f32.partialorder %v1461_v48, 8.507059e+37  ;;  %vm1576_vm14 = vcmp.gt.s32.totalorder %v4807_v53, 0  ;;  %vm1719_vm15 = vcmp.gt.s32.totalorder %v4807_v53, 1 }
 0x405   :  { %3569 = vtanh.f32 %v1446_v40  ;;  %v1465_v58 = vsel %vm1462_vm11, %v1464_v55, %v1460_v44  ;;  %v1483_v40 = vor.u32 1.1754944e-38, %v1482_v36  ;;  %vm1481_vm0 = vcmp.eq.f32.partialorder %v1480_v26, 8.507059e+37 }
 0x406   :  { %v1502_v55 = vand.u32 2147483648, %v1490_v11  ;;  %vm1496_vm2 = vweird.f32 %v1490_v11 }
 0x409   :  { %v3566_v63 = vpop.eup %3565 }
 0x40a   :  { %v3568_v20 = vpop.eup %3567  ;;  %v1472_v49 = vmul.f32 %v3566_v63, %v1470_v46  ;;  %vm1477_vm10 = vweird.f32 %v3566_v63  ;;  %v3368_v46 = vsel %vm1719_vm15, 1.0, %v5342_v25 }
 0x40b   :  { %v1492_v23 = vmul.f32 %v3568_v20, %v1490_v11  ;;  %v3570_v8 = vpop.eup %3569  ;;  %vm1478_vm13 = vmor %vm1476_vm12, %vm1477_vm10  ;;  %vm1497_vm1 = vweird.f32 %v3568_v20 }
 0x40c   :  { %v1473_v16 = vsub.f32 1.0, %v1472_v49  ;;  %v3364_v49 = vsel %vm1576_vm14, 1.0, %v5342_v25  ;;  %vm1498_vm3 = vmor %vm1496_vm2, %vm1497_vm1 }
 0x40d   :  { %v1493_v59 = vsub.f32 1.0, %v1492_v23  ;;  %v3531_v48 = vpack.i.bf16 %v3368_v46, %v3364_v49 }
 0x40e   :  { %v1474_v10 = vmul.f32 %v3566_v63, %v1473_v16  ;;  %v1507_v16 = vmul.f32 %v3570_v8, %v1465_v58 }
 0x40f   :  { %v1494_v23 = vmul.f32 %v3568_v20, %v1493_v59  ;;  %3532 = vperm.xlu1 %3530, %v3531_v48  }
 0x410   :  { %v1475_v21 = vadd.f32 %v3566_v63, %v1474_v10 }
 0x411   :  { %v1495_v10 = vadd.f32 %v3568_v20, %v1494_v23 }
 0x412   :  { %v1479_v39 = vsel %vm1478_vm13, %v3566_v63, %v1475_v21  ;;  %v1500_v63 = vand.u32 2147483647, %v1490_v11  ;;  %v1503_v21 = vor.u32 1.1754944e-38, %v1502_v55 }
 0x413   :  { %v1484_v57 = vsel %vm1481_vm0, %v1483_v40, %v1479_v39  ;;  %v1499_v26 = vsel %vm1498_vm3, %v3568_v20, %v1495_v10 }
 0x414   :  { %v1506_v36 = vmul.f32 0.0, %v1484_v57  ;;  %vm1501_vm4 = vcmp.eq.f32.partialorder %v1500_v63, 8.507059e+37 }
 0x415   :  { %v1504_v40 = vsel %vm1501_vm4, %v1503_v21, %v1499_v26 }
 0x416   :  { %v4813_v44 = vadd.f32 %v1507_v16, %v1506_v36 }
 0x418   :  { %3571 = vtanh.f32 %v4813_v44 }
 0x41e   :  { %v3572_v25 = vpop.eup %3571 }
 0x41f   :  { %v1510_v59 = vmul.f32 %v3572_v25, %v1504_v40  ;;  %v4862_v25 = vld [vmem:[%s5288_s12] ss:$0 sm:$0xff] }
 0x420   :  { %5344 = vst [vmem:[#allocation25_spill] sm:$0xff] %v4862_v25 }
 0x421   :  { %v1511_v39 = vpack.c.bf16 %v1510_v59, %v1510_v59  ;;  %v5345_v59 = vld [vmem:[#allocation17_spill] sm:$0xff] }
 0x423   :  { %1571 = vmatmul.bf16.vlgmr.msra.gmra.mxu3 %v1511_v39  ;;  %1594 = vmatmul.bf16.vlgmr.msrb.gmra.mxu1 %v1511_v39 }
 0x424   :  { %1607 = vmatmul.bf16.vlgmr.msrb.gmra.mxu2 %v1511_v39  ;;  %1729 = vmatpush.bf16.msra.mxu3 %v4354_v27 }
 0x425   :  { %1742 = vmatpush.bf16.msrb.mxu1 %v4511_v7  ;;  %1755 = vmatpush.bf16.msrb.mxu2 %v4513_v17 }
 0x428   :  { %1730 = vmatpush.bf16.msra.mxu3 %v4373_v34 }
 0x429   :  { %1743 = vmatpush.bf16.msrb.mxu1 %v4539_v24  ;;  %1756 = vmatpush.bf16.msrb.mxu2 %v4541_v28 }
 0x42c   :  { %1731 = vmatpush.bf16.msra.mxu3 %v4393_v43 }
 0x42d   :  { %1744 = vmatpush.bf16.msrb.mxu1 %v4564_v31  ;;  %1757 = vmatpush.bf16.msrb.mxu2 %v4566_v35 }
 0x430   :  { %1732 = vmatpush.bf16.msra.mxu3 %v4413_v51 }
 0x431   :  { %1745 = vmatpush.bf16.msrb.mxu1 %v4584_v18  ;;  %1758 = vmatpush.bf16.msrb.mxu2 %v4586_v47 }
 0x433   :  { %1620 = vmatmul.bf16.vlgmr.msrb.gmra.mxu3 %v1511_v39  ;;  %1633 = vmatmul.bf16.vlgmr.msra.gmra.mxu1 %v1511_v39 }
 0x434   :  { %1733 = vmatpush.bf16.msra.mxu3 %v4435_v62 }
 0x435   :  { %1746 = vmatpush.bf16.msrb.mxu1 %v4604_v56  ;;  %1759 = vmatpush.bf16.msrb.mxu2 %v4606_v45 }
 0x438   :  { %1734 = vmatpush.bf16.msra.mxu3 %v4457_v6 }
 0x439   :  { %1747 = vmatpush.bf16.msrb.mxu1 %v4624_v61  ;;  %1760 = vmatpush.bf16.msrb.mxu2 %v4626_v2 }
 0x43c   :  { %1735 = vmatpush.bf16.msra.mxu3 %v4477_v5 }
 0x43d   :  { %1748 = vmatpush.bf16.msrb.mxu1 %v4644_v9  ;;  %1761 = vmatpush.bf16.msrb.mxu2 %v4646_v14 }
 0x440   :  { %1736 = vmatpush.bf16.msra.mxu3 %v4509_v4 }
 0x441   :  { %1749 = vmatpush.bf16.msrb.mxu1 %v4664_v38  ;;  %1762 = vmatpush.bf16.msrb.mxu2 %v4666_v41 }
 0x444   :  { %1768 = vmatpush.bf16.msrb.mxu3 %v4369_v32 }
 0x445   :  { %1867 = vmatpush.bf16.msra.mxu1 %v4731_v0 }
 0x448   :  { %1769 = vmatpush.bf16.msrb.mxu3 %v4389_v42 }
 0x449   :  { %1868 = vmatpush.bf16.msra.mxu1 %v4741_v12 }
 0x44c   :  { %1770 = vmatpush.bf16.msrb.mxu3 %v4409_v50 }
 0x44d   :  { %1869 = vmatpush.bf16.msra.mxu1 %v4749_v30 }
 0x450   :  { %1771 = vmatpush.bf16.msrb.mxu3 %v4431_v60 }
 0x451   :  { %1870 = vmatpush.bf16.msra.mxu1 %v4756_v15 }
 0x454   :  { %1772 = vmatpush.bf16.msrb.mxu3 %v4453_v3 }
 0x455   :  { %1871 = vmatpush.bf16.msra.mxu1 %v4763_v19 }
 0x458   :  { %1773 = vmatpush.bf16.msrb.mxu3 %v4473_v13 }
 0x459   :  { %1872 = vmatpush.bf16.msra.mxu1 %v4772_v22 }
 0x45c   :  { %1774 = vmatpush.bf16.msrb.mxu3 %v4505_v54 }
 0x45d   :  { %1873 = vmatpush.bf16.msra.mxu1 %v4781_v37 }
 0x460   :  { %1775 = vmatpush.bf16.msrb.mxu3 %v4557_v52 }
 0x461   :  { %1874 = vmatpush.bf16.msra.mxu1 %v4788_v1 }
 0x481   :  { %v4857_v11 = vpop.permute.xlu1 %3532 }
 0x482   :  { %5343 = vst [vmem:[#allocation24_spill] sm:$0xff] %v4857_v11  ;;  %v3534_v49 = vunpack.i.l.bf16 %v4857_v11 }
 0x4a0   :  { %v1595_v58 = vpop.f32.mrf.mxu1 }
 0x4a1   :  { %v1638_v8 = vadd.f32 %v1595_v58, %v4710_v29 }
 0x4a3   :  { %v3365_v20 = vmul.f32 -1.442695, %v1638_v8 }
 0x4a5   :  { %3573 = vpow2.f32 %v3365_v20 }
 0x4a6   :  { %v1572_v46 = vpop.f32.mrf.mxu3 }
 0x4a7   :  { %v1573_v57 = vadd.f32 %v4862_v25, %v1572_v46  ;;  %v1608_v23 = vpop.f32.mrf.mxu2 }
 0x4a8   :  { %v1639_v48 = vadd.f32 %v1608_v23, %v4715_v33  ;;  %v1597_v16 = vpop.f32.mrf.mxu1 }
 0x4a9   :  { %v1584_v36 = vmul.f32 %v3534_v49, %v1573_v57  ;;  %v5346_v16 = vld [vmem:[#allocation19_spill] sm:$0xff] }
 0x4aa   :  { %v3366_v10 = vmul.f32 -1.442695, %v1639_v48 }
 0x4ab   :  { %v3574_v55 = vpop.eup %3573  ;;  %1585 = vst [vmem:[%s5289_s13] sm:$0x3] %v1584_v36 }
 0x4ac   :  { %v1645_v63 = vadd.f32 1.0, %v3574_v55  ;;  %3575 = vpow2.f32 %v3366_v10 }
 0x4ae   :  { %3577 = vrcp.f32 %v1645_v63  ;;  %v1574_v26 = vpop.f32.mrf.mxu3  ;;  %vm1651_vm6 = vweird.f32 %v1645_v63 }
 0x4af   :  { %v1610_v21 = vpop.f32.mrf.mxu2 }
 0x4b0   :  { %v1634_v40 = vpop.f32.mrf.mxu1 }
 0x4b1   :  { %v1641_v39 = vadd.f32 %v1634_v40, %v5345_v59  ;;  %v1657_v40 = vand.u32 2147483648, %v1645_v63 }
 0x4b2   :  { %v3576_v58 = vpop.eup %3575 }
 0x4b3   :  { %v1664_v8 = vadd.f32 1.0, %v3576_v58  ;;  %v3367_v20 = vmul.f32 -1.442695, %v1641_v39  ;;  %v1655_v39 = vand.u32 2147483647, %v1645_v63 }
 0x4b4   :  { %v3578_v46 = vpop.eup %3577 }
 0x4b5   :  { %v1647_v23 = vmul.f32 %v3578_v46, %v1645_v63  ;;  %3579 = vrcp.f32 %v1664_v8  ;;  %vm1652_vm5 = vweird.f32 %v3578_v46  ;;  %v1676_v25 = vand.u32 2147483648, %v1664_v8 }
 0x4b6   :  { %3581 = vpow2.f32 %v3367_v20  ;;  %v1621_v49 = vpop.f32.mrf.mxu3  ;;  %vm1653_vm7 = vmor %vm1651_vm6, %vm1652_vm5  ;;  %vm1670_vm9 = vweird.f32 %v1664_v8  ;;  %vm1656_vm10 = vcmp.eq.f32.partialorder %v1655_v39, 8.507059e+37 }
 0x4b7   :  { %v1648_v57 = vsub.f32 1.0, %v1647_v23  ;;  %v1640_v36 = vadd.f32 %v1621_v49, %v5346_v16  ;;  %v1674_v49 = vand.u32 2147483647, %v1664_v8 }
 0x4b8   :  { %v1636_v48 = vpop.f32.mrf.mxu1 }
 0x4b9   :  { %v1649_v55 = vmul.f32 %v3578_v46, %v1648_v57  ;;  %3583 = vtanh.f32 %v1640_v36  ;;  %v1658_v57 = vor.u32 1.1754944e-38, %v1657_v40  ;;  %vm1675_vm12 = vcmp.eq.f32.partialorder %v1674_v49, 8.507059e+37 }
 0x4bb   :  { %v3580_v10 = vpop.eup %3579  ;;  %v1650_v21 = vadd.f32 %v3578_v46, %v1649_v55 }
 0x4bc   :  { %v3582_v53 = vpop.eup %3581  ;;  %v1666_v26 = vmul.f32 %v3580_v10, %v1664_v8  ;;  %vm1671_vm8 = vweird.f32 %v3580_v10 }
 0x4bd   :  { %v1684_v29 = vadd.f32 1.0, %v3582_v53  ;;  %v1654_v23 = vsel %vm1653_vm7, %v3578_v46, %v1650_v21  ;;  %vm1672_vm11 = vmor %vm1670_vm9, %vm1671_vm8  ;;  %v1677_v53 = vor.u32 1.1754944e-38, %v1676_v25 }
 0x4be   :  { %v1667_v58 = vsub.f32 1.0, %v1666_v26  ;;  %v1623_v59 = vpop.f32.mrf.mxu3  ;;  %v1659_v16 = vsel %vm1656_vm10, %v1658_v57, %v1654_v23  ;;  %v5349_v57 = vld [vmem:[#allocation24_spill] sm:$0xff] }
 0x4bf   :  { %3585 = vrcp.f32 %v1684_v29  ;;  %v3584_v55 = vpop.eup %3583  ;;  %v1696_v46 = vand.u32 2147483648, %v1684_v29  ;;  %v1694_v8 = vand.u32 2147483647, %v1684_v29  ;;  %vm1690_vm14 = vweird.f32 %v1684_v29 }
 0x4c0   :  { %v1668_v20 = vmul.f32 %v3580_v10, %v1667_v58  ;;  %v1701_v33 = vmul.f32 %v3584_v55, %v1659_v16  ;;  %v5348_v16 = vld [vmem:[#allocation13_spill] sm:$0xff] }
 0x4c1   :  { %vm1695_vm0 = vcmp.eq.f32.partialorder %v1694_v8, 8.507059e+37 }
 0x4c2   :  { %v1669_v48 = vadd.f32 %v3580_v10, %v1668_v20 }
 0x4c4   :  { %v1673_v36 = vsel %vm1672_vm11, %v3580_v10, %v1669_v48  ;;  %v1697_v10 = vor.u32 1.1754944e-38, %v1696_v46  ;;  %v3535_v48 = vunpack.i.h.bf16 %v5349_v57  ;;  %v5351_v46 = vld [vmem:[#allocation11_spill] sm:$0xff] }
 0x4c5   :  { %v3586_v26 = vpop.eup %3585  ;;  %v1678_v63 = vsel %vm1675_vm12, %v1677_v53, %v1673_v36 }
 0x4c6   :  { %v1686_v59 = vmul.f32 %v3586_v26, %v1684_v29  ;;  %v1700_v11 = vmul.f32 %v1678_v63, %v4813_v44  ;;  %vm1691_vm13 = vweird.f32 %v3586_v26  ;;  %v5347_v29 = vld [vmem:[#allocation22_spill] sm:$0xff] }
 0x4c7   :  { %vm1692_vm15 = vmor %vm1690_vm14, %vm1691_vm13 }
 0x4c8   :  { %v1687_v58 = vsub.f32 1.0, %v1686_v59  ;;  %v4873_v1 = vadd.f32 %v1701_v33, %v1700_v11 }
 0x4ca   :  { %v1688_v21 = vmul.f32 %v3586_v26, %v1687_v58  ;;  %3587 = vtanh.f32 %v4873_v1 }
 0x4cc   :  { %v1689_v25 = vadd.f32 %v3586_v26, %v1688_v21 }
 0x4ce   :  { %v1693_v40 = vsel %vm1692_vm15, %v3586_v26, %v1689_v25  ;;  %v5350_v26 = vld [vmem:[#allocation25_spill] sm:$0xff] }
 0x4cf   :  { %v1698_v39 = vsel %vm1695_vm0, %v1697_v10, %v1693_v40 }
 0x4d0   :  { %v3588_v20 = vpop.eup %3587 }
 0x4d1   :  { %v1704_v23 = vmul.f32 %v3588_v20, %v1698_v39 }
 0x4d3   :  { %v1705_v44 = vpack.c.bf16 %v1704_v23, %v1704_v23 }
 0x4d5   :  { %1714 = vmatmul.bf16.vlgmr.msra.gmra.mxu2 %v1705_v44  ;;  %1737 = vmatmul.bf16.vlgmr.msra.gmra.mxu3 %v1705_v44 }
 0x4d6   :  { %1750 = vmatmul.bf16.vlgmr.msrb.gmra.mxu1 %v1705_v44  ;;  %1890 = vmatpush.bf16.msra.mxu2 %v4354_v27 }
 0x4d7   :  { %1903 = vmatpush.bf16.msra.mxu3 %v4511_v7  ;;  %1916 = vmatpush.bf16.msrb.mxu1 %v4513_v17 }
 0x4da   :  { %1891 = vmatpush.bf16.msra.mxu2 %v4373_v34 }
 0x4db   :  { %1904 = vmatpush.bf16.msra.mxu3 %v4539_v24  ;;  %1917 = vmatpush.bf16.msrb.mxu1 %v4541_v28 }
 0x4de   :  { %1892 = vmatpush.bf16.msra.mxu2 %v4393_v43 }
 0x4df   :  { %1905 = vmatpush.bf16.msra.mxu3 %v4564_v31  ;;  %1918 = vmatpush.bf16.msrb.mxu1 %v4566_v35 }
 0x4e2   :  { %1893 = vmatpush.bf16.msra.mxu2 %v4413_v51 }
 0x4e3   :  { %1906 = vmatpush.bf16.msra.mxu3 %v4584_v18  ;;  %1919 = vmatpush.bf16.msrb.mxu1 %v4586_v47 }
 0x4e5   :  { %1763 = vmatmul.bf16.vlgmr.msrb.gmra.mxu2 %v1705_v44  ;;  %1776 = vmatmul.bf16.vlgmr.msrb.gmra.mxu3 %v1705_v44 }
 0x4e6   :  { %1894 = vmatpush.bf16.msra.mxu2 %v4435_v62 }
 0x4e7   :  { %1907 = vmatpush.bf16.msra.mxu3 %v4604_v56  ;;  %1920 = vmatpush.bf16.msrb.mxu1 %v4606_v45 }
 0x4ea   :  { %1895 = vmatpush.bf16.msra.mxu2 %v4457_v6 }
 0x4eb   :  { %1908 = vmatpush.bf16.msra.mxu3 %v4624_v61  ;;  %1921 = vmatpush.bf16.msrb.mxu1 %v4626_v2 }
 0x4ee   :  { %1896 = vmatpush.bf16.msra.mxu2 %v4477_v5 }
 0x4ef   :  { %1909 = vmatpush.bf16.msra.mxu3 %v4644_v9  ;;  %1922 = vmatpush.bf16.msrb.mxu1 %v4646_v14 }
 0x4f2   :  { %1897 = vmatpush.bf16.msra.mxu2 %v4509_v4 }
 0x4f3   :  { %1910 = vmatpush.bf16.msra.mxu3 %v4664_v38  ;;  %1923 = vmatpush.bf16.msrb.mxu1 %v4666_v41 }
 0x4f6   :  { %1929 = vmatpush.bf16.msrb.mxu2 %v4369_v32 }
 0x4f7   :  { %2028 = vmatpush.bf16.msrb.mxu3 %v4731_v0 }
 0x4fa   :  { %1930 = vmatpush.bf16.msrb.mxu2 %v4389_v42 }
 0x4fb   :  { %2029 = vmatpush.bf16.msrb.mxu3 %v4741_v12 }
 0x4fe   :  { %1931 = vmatpush.bf16.msrb.mxu2 %v4409_v50 }
 0x4ff   :  { %2030 = vmatpush.bf16.msrb.mxu3 %v4749_v30 }
 0x502   :  { %1932 = vmatpush.bf16.msrb.mxu2 %v4431_v60 }
 0x503   :  { %2031 = vmatpush.bf16.msrb.mxu3 %v4756_v15 }
 0x506   :  { %1933 = vmatpush.bf16.msrb.mxu2 %v4453_v3 }
 0x507   :  { %2032 = vmatpush.bf16.msrb.mxu3 %v4763_v19 }
 0x50a   :  { %1934 = vmatpush.bf16.msrb.mxu2 %v4473_v13 }
 0x50b   :  { %2033 = vmatpush.bf16.msrb.mxu3 %v4772_v22 }
 0x50e   :  { %1935 = vmatpush.bf16.msrb.mxu2 %v4505_v54 }
 0x50f   :  { %2034 = vmatpush.bf16.msrb.mxu3 %v4781_v37 }
 0x512   :  { %1936 = vmatpush.bf16.msrb.mxu2 %v4557_v52 }
 0x513   :  { %2035 = vmatpush.bf16.msrb.mxu3 %v5347_v29 }
 0x553   :  { %v1751_v33 = vpop.f32.mrf.mxu1 }
 0x554   :  { %v1786_v11 = vrot.slane %v1751_v33, 6 }
 0x556   :  { %v1794_v49 = vadd.f32 %v1786_v11, %v5348_v16 }
 0x558   :  { %v3370_v55 = vmul.f32 -1.442695, %v1794_v49  ;;  %v1715_v53 = vpop.f32.mrf.mxu2  ;;  %v1738_v36 = vpop.f32.mrf.mxu3 }
 0x559   :  { %v1716_v63 = vadd.f32 %v5350_v26, %v1715_v53  ;;  %v1785_v59 = vrot.slane %v1738_v36, 6  ;;  %v5352_v53 = vld [vmem:[#allocation17_spill] sm:$0xff] }
 0x55a   :  { %3589 = vpow2.f32 %v3370_v55 }
 0x55b   :  { %v1727_v58 = vmul.f32 %v3535_v48, %v1716_v63  ;;  %v1793_v21 = vadd.f32 %v1785_v59, %v5351_v46  ;;  %v1753_v8 = vpop.f32.mrf.mxu1  ;;  %v5355_v46 = vmov 0.0  }
 0x55d   :  { %1728 = vst [vmem:[%s5289_s13 + $0x2] sm:$0x3] %v1727_v58  ;;  %v3369_v25 = vmul.f32 -1.442695, %v1793_v21 }
 0x55f   :  { %3591 = vpow2.f32 %v3369_v25  ;;  %v5353_v25 = vld [vmem:[#allocation19_spill] sm:$0xff] }
 0x560   :  { %v3590_v10 = vpop.eup %3589  ;;  %v1717_v40 = vpop.f32.mrf.mxu2 }
 0x561   :  { %v1740_v39 = vpop.f32.mrf.mxu3  ;;  %v1819_v20 = vadd.f32 1.0, %v3590_v10 }
 0x563   :  { %3593 = vrcp.f32 %v1819_v20  ;;  %v1831_v16 = vand.u32 2147483648, %v1819_v20  ;;  %vm1825_vm5 = vweird.f32 %v1819_v20 }
 0x565   :  { %v3592_v23 = vpop.eup %3591 }
 0x566   :  { %v1800_v44 = vadd.f32 1.0, %v3592_v23  ;;  %v5354_v23 = vld [vmem:[#allocation23_spill] sm:$0xff] }
 0x567   :  { %vm1880_vm1 = vcmp.gt.s32.totalorder %v5354_v23, 2  ;;  %vm2041_vm2 = vcmp.gt.s32.totalorder %v5354_v23, 3 }
 0x568   :  { %3595 = vrcp.f32 %v1800_v44  ;;  %v1764_v33 = vpop.f32.mrf.mxu2  ;;  %vm1806_vm7 = vweird.f32 %v1800_v44 }
 0x569   :  { %v1777_v11 = vpop.f32.mrf.mxu3  ;;  %v3594_v49 = vpop.eup %3593  ;;  %v1787_v55 = vrot.slane %v1764_v33, 6  ;;  %v3372_v33 = vsel %vm1880_vm1, 1.0, %v5355_v46 }
 0x56a   :  { %v1788_v57 = vrot.slane %v1777_v11, 6  ;;  %v1821_v48 = vmul.f32 %v3594_v49, %v1819_v20  ;;  %vm1826_vm3 = vweird.f32 %v3594_v49 }
 0x56b   :  { %v1795_v40 = vadd.f32 %v1787_v55, %v5353_v25  ;;  %v1810_v55 = vand.u32 2147483647, %v1800_v44  ;;  %vm1827_vm6 = vmor %vm1825_vm5, %vm1826_vm3 }
 0x56c   :  { %v1796_v36 = vadd.f32 %v1788_v57, %v5352_v53  ;;  %v1822_v63 = vsub.f32 1.0, %v1821_v48  ;;  %v3376_v57 = vsel %vm2041_vm2, 1.0, %v5355_v46  ;;  %v1812_v48 = vand.u32 2147483648, %v1800_v44 }
 0x56d   :  { %v1832_v46 = vor.u32 1.1754944e-38, %v1831_v16  ;;  %vm1811_vm9 = vcmp.eq.f32.partialorder %v1810_v55, 8.507059e+37 }
 0x56e   :  { %v3371_v59 = vmul.f32 -1.442695, %v1796_v36  ;;  %v3596_v58 = vpop.eup %3595  ;;  %v1823_v21 = vmul.f32 %v3594_v49, %v1822_v63  ;;  %v3536_v63 = vpack.i.bf16 %v3376_v57, %v3372_v33 }
 0x56f   :  { %v1802_v8 = vmul.f32 %v3596_v58, %v1800_v44  ;;  %vm1807_vm4 = vweird.f32 %v3596_v58 }
 0x570   :  { %3597 = vpow2.f32 %v3371_v59  ;;  %v1766_v10 = vpop.f32.mrf.mxu2  ;;  %v1824_v36 = vadd.f32 %v3594_v49, %v1823_v21  ;;  %v1829_v59 = vand.u32 2147483647, %v1819_v20  ;;  %3537 = vperm.xlu1 %3530, %v3536_v63   ;;  %vm1808_vm8 = vmor %vm1806_vm7, %vm1807_vm4 }
 0x571   :  { %v1779_v39 = vpop.f32.mrf.mxu3  ;;  %v1803_v11 = vsub.f32 1.0, %v1802_v8  ;;  %3599 = vtanh.f32 %v1795_v40  ;;  %v1813_v8 = vor.u32 1.1754944e-38, %v1812_v48  ;;  %v1856_v40 = vrot.slane %v4873_v1, 6 }
 0x572   :  { %v1828_v23 = vsel %vm1827_vm6, %v3594_v49, %v1824_v36  ;;  %vm1830_vm10 = vcmp.eq.f32.partialorder %v1829_v59, 8.507059e+37 }
 0x573   :  { %v1804_v53 = vmul.f32 %v3596_v58, %v1803_v11  ;;  %v1833_v33 = vsel %vm1830_vm10, %v1832_v46, %v1828_v23 }
 0x574   :  { %v1858_v57 = vmul.f32 %v1856_v40, %v1833_v33  ;;  %v5359_v40 = vld [vmem:[#allocation13_spill] sm:$0xff] }
 0x575   :  { %v1805_v39 = vadd.f32 %v3596_v58, %v1804_v53 }
 0x576   :  { %v3598_v10 = vpop.eup %3597 }
 0x577   :  { %v1839_v25 = vadd.f32 1.0, %v3598_v10  ;;  %v1809_v26 = vsel %vm1808_vm8, %v3596_v58, %v1805_v39  ;;  %v3600_v11 = vpop.eup %3599 }
 0x578   :  { %v1814_v21 = vsel %vm1811_vm9, %v1813_v8, %v1809_v26 }
 0x579   :  { %3601 = vrcp.f32 %v1839_v25  ;;  %v1859_v20 = vmul.f32 %v3600_v11, %v1814_v21  ;;  %v1851_v49 = vand.u32 2147483648, %v1839_v25  ;;  %v1849_v58 = vand.u32 2147483647, %v1839_v25  ;;  %v5358_v11 = vld [vmem:[#allocation11_spill] sm:$0xff] }
 0x57a   :  { %vm1845_vm12 = vweird.f32 %v1839_v25 }
 0x57b   :  { %v4930_v29 = vadd.f32 %v1859_v20, %v1858_v57  ;;  %v1852_v48 = vor.u32 1.1754944e-38, %v1851_v49  ;;  %vm1850_vm14 = vcmp.eq.f32.partialorder %v1849_v58, 8.507059e+37 }
 0x57d   :  { %3603 = vtanh.f32 %v4930_v29 }
 0x57f   :  { %v3602_v63 = vpop.eup %3601 }
 0x580   :  { %v1841_v44 = vmul.f32 %v3602_v63, %v1839_v25  ;;  %vm1846_vm11 = vweird.f32 %v3602_v63  ;;  %v5357_v25 = vld [vmem:[#allocation25_spill] sm:$0xff] }
 0x581   :  { %vm1847_vm13 = vmor %vm1845_vm12, %vm1846_vm11 }
 0x582   :  { %v1842_v53 = vsub.f32 1.0, %v1841_v44 }
 0x583   :  { %v3604_v1 = vpop.eup %3603 }
 0x584   :  { %v1843_v16 = vmul.f32 %v3602_v63, %v1842_v53 }
 0x586   :  { %v1844_v26 = vadd.f32 %v3602_v63, %v1843_v16 }
 0x588   :  { %v1848_v46 = vsel %vm1847_vm13, %v3602_v63, %v1844_v26 }
 0x589   :  { %v1853_v36 = vsel %vm1850_vm14, %v1852_v48, %v1848_v46 }
 0x58a   :  { %v1862_v55 = vmul.f32 %v3604_v1, %v1853_v36 }
 0x58c   :  { %v1863_v59 = vpack.c.bf16 %v1862_v55, %v1862_v55 }
 0x58e   :  { %v1865_v10 = vrot.slane %v1863_v59, 1  ;;  %v5360_v59 = vld [vmem:[#allocation17_spill] sm:$0xff] }
 0x590   :  { %1875 = vmatmul.bf16.vlgmr.msra.gmra.mxu1 %v1865_v10  ;;  %1898 = vmatmul.bf16.vlgmr.msra.gmra.mxu2 %v1865_v10 }
 0x591   :  { %1911 = vmatmul.bf16.vlgmr.msra.gmra.mxu3 %v1865_v10  ;;  %2051 = vmatpush.bf16.msra.mxu1 %v4354_v27 }
 0x592   :  { %2064 = vmatpush.bf16.msra.mxu2 %v4511_v7  ;;  %2077 = vmatpush.bf16.msra.mxu3 %v4513_v17 }
 0x595   :  { %2052 = vmatpush.bf16.msra.mxu1 %v4373_v34 }
 0x596   :  { %2065 = vmatpush.bf16.msra.mxu2 %v4539_v24  ;;  %2078 = vmatpush.bf16.msra.mxu3 %v4541_v28 }
 0x599   :  { %2053 = vmatpush.bf16.msra.mxu1 %v4393_v43 }
 0x59a   :  { %2066 = vmatpush.bf16.msra.mxu2 %v4564_v31  ;;  %2079 = vmatpush.bf16.msra.mxu3 %v4566_v35 }
 0x59d   :  { %2054 = vmatpush.bf16.msra.mxu1 %v4413_v51 }
 0x59e   :  { %2067 = vmatpush.bf16.msra.mxu2 %v4584_v18  ;;  %2080 = vmatpush.bf16.msra.mxu3 %v4586_v47 }
 0x5a0   :  { %1924 = vmatmul.bf16.vlgmr.msrb.gmra.mxu1 %v1865_v10  ;;  %1937 = vmatmul.bf16.vlgmr.msrb.gmra.mxu2 %v1865_v10 }
 0x5a1   :  { %2055 = vmatpush.bf16.msra.mxu1 %v4435_v62 }
 0x5a2   :  { %2068 = vmatpush.bf16.msra.mxu2 %v4604_v56  ;;  %2081 = vmatpush.bf16.msra.mxu3 %v4606_v45 }
 0x5a5   :  { %2056 = vmatpush.bf16.msra.mxu1 %v4457_v6 }
 0x5a6   :  { %2069 = vmatpush.bf16.msra.mxu2 %v4624_v61  ;;  %2082 = vmatpush.bf16.msra.mxu3 %v4626_v2 }
 0x5a9   :  { %2057 = vmatpush.bf16.msra.mxu1 %v4477_v5 }
 0x5aa   :  { %2070 = vmatpush.bf16.msra.mxu2 %v4644_v9  ;;  %2083 = vmatpush.bf16.msra.mxu3 %v4646_v14 }
 0x5ad   :  { %2058 = vmatpush.bf16.msra.mxu1 %v4509_v4 }
 0x5ae   :  { %2071 = vmatpush.bf16.msra.mxu2 %v4664_v38  ;;  %2084 = vmatpush.bf16.msra.mxu3 %v4666_v41 }
 0x5b1   :  { %2090 = vmatpush.bf16.msrb.mxu1 %v4369_v32 }
 0x5b2   :  { %2189 = vmatpush.bf16.msrb.mxu2 %v4731_v0  ;;  %v5356_v0 = vld [vmem:[#allocation22_spill] sm:$0xff] }
 0x5b5   :  { %2091 = vmatpush.bf16.msrb.mxu1 %v4389_v42 }
 0x5b6   :  { %2190 = vmatpush.bf16.msrb.mxu2 %v4741_v12 }
 0x5b9   :  { %2092 = vmatpush.bf16.msrb.mxu1 %v4409_v50 }
 0x5ba   :  { %2191 = vmatpush.bf16.msrb.mxu2 %v4749_v30 }
 0x5bd   :  { %2093 = vmatpush.bf16.msrb.mxu1 %v4431_v60 }
 0x5be   :  { %2192 = vmatpush.bf16.msrb.mxu2 %v4756_v15 }
 0x5c1   :  { %2094 = vmatpush.bf16.msrb.mxu1 %v4453_v3 }
 0x5c2   :  { %2193 = vmatpush.bf16.msrb.mxu2 %v4763_v19 }
 0x5c5   :  { %2095 = vmatpush.bf16.msrb.mxu1 %v4473_v13 }
 0x5c6   :  { %2194 = vmatpush.bf16.msrb.mxu2 %v4772_v22 }
 0x5c9   :  { %2096 = vmatpush.bf16.msrb.mxu1 %v4505_v54 }
 0x5ca   :  { %2195 = vmatpush.bf16.msrb.mxu2 %v4781_v37 }
 0x5cd   :  { %2097 = vmatpush.bf16.msrb.mxu1 %v4557_v52 }
 0x5ce   :  { %2196 = vmatpush.bf16.msrb.mxu2 %v5356_v0 }
 0x5e2   :  { %v4973_v12 = vpop.permute.xlu1 %3537 }
 0x5e3   :  { %v3539_v30 = vunpack.i.l.bf16 %v4973_v12 }
 0x60d   :  { %v1876_v15 = vpop.f32.mrf.mxu1 }
 0x60e   :  { %v1877_v39 = vadd.f32 %v5357_v25, %v1876_v15 }
 0x610   :  { %v1888_v19 = vmul.f32 %v3539_v30, %v1877_v39 }
 0x612   :  { %1889 = vst [vmem:[%s5289_s13 + $0x4] sm:$0x3] %v1888_v19 }
 0x613   :  { %v1899_v22 = vpop.f32.mrf.mxu2 }
 0x614   :  { %v1946_v8 = vrot.slane %v1899_v22, 4  ;;  %v1912_v23 = vpop.f32.mrf.mxu3  ;;  %v5361_v22 = vld [vmem:[#allocation19_spill] sm:$0xff] }
 0x615   :  { %v1947_v37 = vrot.slane %v1912_v23, 4  ;;  %v1878_v21 = vpop.f32.mrf.mxu1 }
 0x616   :  { %v1954_v33 = vadd.f32 %v1946_v8, %v5358_v11 }
 0x617   :  { %v1955_v20 = vadd.f32 %v1947_v37, %v5359_v40 }
 0x618   :  { %v3373_v57 = vmul.f32 -1.442695, %v1954_v33 }
 0x619   :  { %v3374_v63 = vmul.f32 -1.442695, %v1955_v20 }
 0x61a   :  { %3605 = vpow2.f32 %v3373_v57 }
 0x61b   :  { %3607 = vpow2.f32 %v3374_v63  ;;  %v1901_v44 = vpop.f32.mrf.mxu2 }
 0x61c   :  { %v1914_v53 = vpop.f32.mrf.mxu3 }
 0x61d   :  { %v1925_v49 = vpop.f32.mrf.mxu1 }
 0x61e   :  { %v1948_v55 = vrot.slane %v1925_v49, 4 }
 0x620   :  { %v3606_v16 = vpop.eup %3605  ;;  %v1956_v8 = vadd.f32 %v1948_v55, %v5361_v22 }
 0x621   :  { %v3608_v58 = vpop.eup %3607  ;;  %v1961_v26 = vadd.f32 1.0, %v3606_v16 }
 0x622   :  { %v1980_v48 = vadd.f32 1.0, %v3608_v58 }
 0x623   :  { %3609 = vrcp.f32 %v1961_v26  ;;  %v1938_v46 = vpop.f32.mrf.mxu2  ;;  %v1973_v33 = vand.u32 2147483648, %v1961_v26  ;;  %v1971_v63 = vand.u32 2147483647, %v1961_v26  ;;  %vm1967_vm1 = vweird.f32 %v1961_v26 }
 0x624   :  { %3611 = vrcp.f32 %v1980_v48  ;;  %v1949_v1 = vrot.slane %v1938_v46, 4  ;;  %v1992_v20 = vand.u32 2147483648, %v1980_v48  ;;  %v1990_v53 = vand.u32 2147483647, %v1980_v48 }
 0x625   :  { %v1927_v36 = vpop.f32.mrf.mxu1  ;;  %vm1986_vm2 = vweird.f32 %v1980_v48  ;;  %v1974_v58 = vor.u32 1.1754944e-38, %v1973_v33  ;;  %vm1972_vm5 = vcmp.eq.f32.partialorder %v1971_v63, 8.507059e+37 }
 0x626   :  { %v1957_v10 = vadd.f32 %v1949_v1, %v5360_v59  ;;  %v1993_v1 = vor.u32 1.1754944e-38, %v1992_v20  ;;  %vm1991_vm6 = vcmp.eq.f32.partialorder %v1990_v53, 8.507059e+37 }
 0x628   :  { %v3375_v30 = vmul.f32 -1.442695, %v1957_v10 }
 0x629   :  { %v3610_v0 = vpop.eup %3609 }
 0x62a   :  { %v3612_v15 = vpop.eup %3611  ;;  %v1963_v39 = vmul.f32 %v3610_v0, %v1961_v26  ;;  %3613 = vpow2.f32 %v3375_v30  ;;  %vm1968_vm15 = vweird.f32 %v3610_v0 }
 0x62b   :  { %v1982_v19 = vmul.f32 %v3612_v15, %v1980_v48  ;;  %v1940_v23 = vpop.f32.mrf.mxu2  ;;  %vm1987_vm0 = vweird.f32 %v3612_v15  ;;  %3615 = vtanh.f32 %v1956_v8  ;;  %vm1969_vm3 = vmor %vm1967_vm1, %vm1968_vm15 }
 0x62c   :  { %v1964_v37 = vsub.f32 1.0, %v1963_v39  ;;  %vm1988_vm4 = vmor %vm1986_vm2, %vm1987_vm0  ;;  %v2017_v39 = vrot.slane %v4930_v29, 6 }
 0x62d   :  { %v1983_v21 = vsub.f32 1.0, %v1982_v19 }
 0x62e   :  { %v1965_v57 = vmul.f32 %v3610_v0, %v1964_v37 }
 0x62f   :  { %v1984_v44 = vmul.f32 %v3612_v15, %v1983_v21 }
 0x630   :  { %v1966_v49 = vadd.f32 %v3610_v0, %v1965_v57  ;;  %v3614_v16 = vpop.eup %3613 }
 0x631   :  { %v1985_v46 = vadd.f32 %v3612_v15, %v1984_v44  ;;  %v2000_v55 = vadd.f32 1.0, %v3614_v16  ;;  %v3616_v8 = vpop.eup %3615 }
 0x632   :  { %v1970_v36 = vsel %vm1969_vm3, %v3610_v0, %v1966_v49 }
 0x633   :  { %v1975_v10 = vsel %vm1972_vm5, %v1974_v58, %v1970_v36  ;;  %v1989_v30 = vsel %vm1988_vm4, %v3612_v15, %v1985_v46  ;;  %3617 = vrcp.f32 %v2000_v55  ;;  %v2012_v0 = vand.u32 2147483648, %v2000_v55  ;;  %v5016_v46 = vld [vmem:[%s5287_s11 + $0x38] sm:$0xff]  ;;  %v5030_v36 = vld [vmem:[%s5287_s11 + $0x28] sm:$0xff] }
 0x634   :  { %v1994_v19 = vsel %vm1991_vm6, %v1993_v1, %v1989_v30  ;;  %v2020_v26 = vmul.f32 %v3616_v8, %v1975_v10  ;;  %v2010_v57 = vand.u32 2147483647, %v2000_v55  ;;  %vm2006_vm8 = vweird.f32 %v2000_v55  ;;  %v5023_v1 = vld [vmem:[%s5287_s11 + $0x30] sm:$0xff]  ;;  %v5044_v10 = vld [vmem:[%s5287_s11 + $0x18] sm:$0xff] }
 0x635   :  { %v2019_v23 = vmul.f32 %v2017_v39, %v1994_v19  ;;  %v2013_v63 = vor.u32 1.1754944e-38, %v2012_v0  ;;  %v5051_v30 = vld [vmem:[%s5287_s11 + $0x10] sm:$0xff]  ;;  %v5058_v39 = vld [vmem:[%s5287_s11 + $0x8] sm:$0xff]  ;;  %v5065_v19 = vld [vmem:[%s5287_s11] sm:$0xff] }
 0x636   :  { %vm2011_vm10 = vcmp.eq.f32.partialorder %v2010_v57, 8.507059e+37 }
 0x637   :  { %v4985_v48 = vadd.f32 %v2020_v26, %v2019_v23 }
 0x639   :  { %v3618_v37 = vpop.eup %3617  ;;  %3619 = vtanh.f32 %v4985_v48 }
 0x63a   :  { %v2002_v21 = vmul.f32 %v3618_v37, %v2000_v55  ;;  %vm2007_vm7 = vweird.f32 %v3618_v37  ;;  %v5037_v55 = vld [vmem:[%s5287_s11 + $0x20] sm:$0xff] }
 0x63b   :  { %vm2008_vm9 = vmor %vm2006_vm8, %vm2007_vm7 }
 0x63c   :  { %v2003_v33 = vsub.f32 1.0, %v2002_v21 }
 0x63e   :  { %v2004_v20 = vmul.f32 %v3618_v37, %v2003_v33 }
 0x63f   :  { %v3620_v44 = vpop.eup %3619 }
 0x640   :  { %v2005_v15 = vadd.f32 %v3618_v37, %v2004_v20 }
 0x642   :  { %v2009_v29 = vsel %vm2008_vm9, %v3618_v37, %v2005_v15  ;;  %v3540_v37 = vunpack.i.h.bf16 %v4973_v12 }
 0x643   :  { %v2014_v53 = vsel %vm2011_vm10, %v2013_v63, %v2009_v29 }
 0x644   :  { %v2023_v49 = vmul.f32 %v3620_v44, %v2014_v53 }
 0x646   :  { %v2024_v16 = vpack.c.bf16 %v2023_v49, %v2023_v49 }
 0x648   :  { %v2026_v58 = vrot.slane %v2024_v16, 2 }
 0x64a   :  { %2036 = vmatmul.bf16.vlgmr.msrb.gmra.mxu3 %v2026_v58  ;;  %2059 = vmatmul.bf16.vlgmr.msra.gmra.mxu1 %v2026_v58 }
 0x64b   :  { %2072 = vmatmul.bf16.vlgmr.msra.gmra.mxu2 %v2026_v58  ;;  %2212 = vmatpush.bf16.msrb.mxu3 %v4354_v27 }
 0x64c   :  { %2225 = vmatpush.bf16.msra.mxu1 %v4511_v7  ;;  %2238 = vmatpush.bf16.msra.mxu2 %v4513_v17 }
 0x64f   :  { %2213 = vmatpush.bf16.msrb.mxu3 %v4373_v34 }
 0x650   :  { %2226 = vmatpush.bf16.msra.mxu1 %v4539_v24  ;;  %2239 = vmatpush.bf16.msra.mxu2 %v4541_v28 }
 0x653   :  { %2214 = vmatpush.bf16.msrb.mxu3 %v4393_v43 }
 0x654   :  { %2227 = vmatpush.bf16.msra.mxu1 %v4564_v31  ;;  %2240 = vmatpush.bf16.msra.mxu2 %v4566_v35 }
 0x657   :  { %2215 = vmatpush.bf16.msrb.mxu3 %v4413_v51 }
 0x658   :  { %2228 = vmatpush.bf16.msra.mxu1 %v4584_v18  ;;  %2241 = vmatpush.bf16.msra.mxu2 %v4586_v47 }
 0x65a   :  { %2085 = vmatmul.bf16.vlgmr.msra.gmra.mxu3 %v2026_v58  ;;  %2098 = vmatmul.bf16.vlgmr.msrb.gmra.mxu1 %v2026_v58 }
 0x65b   :  { %2216 = vmatpush.bf16.msrb.mxu3 %v4435_v62 }
 0x65c   :  { %2229 = vmatpush.bf16.msra.mxu1 %v4604_v56  ;;  %2242 = vmatpush.bf16.msra.mxu2 %v4606_v45 }
 0x65f   :  { %2217 = vmatpush.bf16.msrb.mxu3 %v4457_v6 }
 0x660   :  { %2230 = vmatpush.bf16.msra.mxu1 %v4624_v61  ;;  %2243 = vmatpush.bf16.msra.mxu2 %v4626_v2 }
 0x663   :  { %2218 = vmatpush.bf16.msrb.mxu3 %v4477_v5 }
 0x664   :  { %2231 = vmatpush.bf16.msra.mxu1 %v4644_v9  ;;  %2244 = vmatpush.bf16.msra.mxu2 %v4646_v14 }
 0x667   :  { %2219 = vmatpush.bf16.msrb.mxu3 %v4509_v4 }
 0x668   :  { %2232 = vmatpush.bf16.msra.mxu1 %v4664_v38  ;;  %2245 = vmatpush.bf16.msra.mxu2 %v4666_v41 }
 0x66b   :  { %2251 = vmatpush.bf16.msra.mxu3 %v4369_v32 }
 0x66c   :  { %2335 = vmatpush.bf16.msrb.mxu1 %v5016_v46 }
 0x66f   :  { %2252 = vmatpush.bf16.msra.mxu3 %v4389_v42 }
 0x670   :  { %2336 = vmatpush.bf16.msrb.mxu1 %v5023_v1 }
 0x673   :  { %2253 = vmatpush.bf16.msra.mxu3 %v4409_v50 }
 0x674   :  { %2337 = vmatpush.bf16.msrb.mxu1 %v5030_v36 }
 0x677   :  { %2254 = vmatpush.bf16.msra.mxu3 %v4431_v60 }
 0x678   :  { %2338 = vmatpush.bf16.msrb.mxu1 %v5037_v55 }
 0x67b   :  { %2255 = vmatpush.bf16.msra.mxu3 %v4453_v3 }
 0x67c   :  { %2339 = vmatpush.bf16.msrb.mxu1 %v5044_v10 }
 0x67f   :  { %2256 = vmatpush.bf16.msra.mxu3 %v4473_v13 }
 0x680   :  { %2340 = vmatpush.bf16.msrb.mxu1 %v5051_v30 }
 0x683   :  { %2257 = vmatpush.bf16.msra.mxu3 %v4505_v54 }
 0x684   :  { %2341 = vmatpush.bf16.msrb.mxu1 %v5058_v39 }
 0x687   :  { %2258 = vmatpush.bf16.msra.mxu3 %v4557_v52 }
 0x688   :  { %2342 = vmatpush.bf16.msrb.mxu1 %v5065_v19 }
 0x6c7   :  { %v2060_v8 = vpop.f32.mrf.mxu1 }
 0x6c8   :  { %v2107_v23 = vrot.slane %v2060_v8, 2 }
 0x6ca   :  { %v2115_v26 = vadd.f32 %v2107_v23, %v5358_v11 }
 0x6cc   :  { %v3377_v21 = vmul.f32 -1.442695, %v2115_v26 }
 0x6cd   :  { %v2037_v33 = vpop.f32.mrf.mxu3 }
 0x6ce   :  { %3621 = vpow2.f32 %v3377_v21  ;;  %v2038_v0 = vadd.f32 %v5357_v25, %v2037_v33  ;;  %v2073_v20 = vpop.f32.mrf.mxu2 }
 0x6cf   :  { %v2108_v57 = vrot.slane %v2073_v20, 2  ;;  %v2062_v15 = vpop.f32.mrf.mxu1 }
 0x6d0   :  { %v2049_v63 = vmul.f32 %v3540_v37, %v2038_v0 }
 0x6d1   :  { %v2116_v29 = vadd.f32 %v2108_v57, %v5359_v40 }
 0x6d2   :  { %2050 = vst [vmem:[%s5289_s13 + $0x6] sm:$0x3] %v2049_v63 }
 0x6d3   :  { %v3378_v44 = vmul.f32 -1.442695, %v2116_v29 }
 0x6d4   :  { %v3622_v53 = vpop.eup %3621 }
 0x6d5   :  { %v2122_v11 = vadd.f32 1.0, %v3622_v53  ;;  %3623 = vpow2.f32 %v3378_v44  ;;  %v2039_v12 = vpop.f32.mrf.mxu3 }
 0x6d6   :  { %v2075_v49 = vpop.f32.mrf.mxu2 }
 0x6d7   :  { %3625 = vrcp.f32 %v2122_v11  ;;  %v2099_v16 = vpop.f32.mrf.mxu1  ;;  %v2134_v49 = vand.u32 2147483648, %v2122_v11  ;;  %vm2128_vm12 = vweird.f32 %v2122_v11 }
 0x6d8   :  { %v2110_v58 = vrot.slane %v2099_v16, 2 }
 0x6da   :  { %v2118_v25 = vadd.f32 %v2110_v58, %v5360_v59  ;;  %v2132_v58 = vand.u32 2147483647, %v2122_v11 }
 0x6db   :  { %v3624_v8 = vpop.eup %3623 }
 0x6dc   :  { %v2141_v23 = vadd.f32 1.0, %v3624_v8  ;;  %v3379_v26 = vmul.f32 -1.442695, %v2118_v25  ;;  %vm2133_vm0 = vcmp.eq.f32.partialorder %v2132_v58, 8.507059e+37 }
 0x6dd   :  { %v3626_v37 = vpop.eup %3625  ;;  %v2086_v40 = vpop.f32.mrf.mxu3 }
 0x6de   :  { %v2124_v21 = vmul.f32 %v3626_v37, %v2122_v11  ;;  %3627 = vrcp.f32 %v2141_v23  ;;  %v2109_v33 = vrot.slane %v2086_v40, 2  ;;  %vm2129_vm11 = vweird.f32 %v3626_v37 }
 0x6df   :  { %3629 = vpow2.f32 %v3379_v26  ;;  %v2101_v0 = vpop.f32.mrf.mxu1  ;;  %v2153_v25 = vand.u32 2147483648, %v2141_v23  ;;  %vm2130_vm13 = vmor %vm2128_vm12, %vm2129_vm11  ;;  %v2135_v40 = vor.u32 1.1754944e-38, %v2134_v49  ;;  %vm2147_vm15 = vweird.f32 %v2141_v23 }
 0x6e0   :  { %v2125_v20 = vsub.f32 1.0, %v2124_v21  ;;  %v2117_v57 = vadd.f32 %v2109_v33, %v5361_v22  ;;  %v2151_v22 = vand.u32 2147483647, %v2141_v23 }
 0x6e1   :  { %v2154_v0 = vor.u32 1.1754944e-38, %v2153_v25 }
 0x6e2   :  { %v2126_v15 = vmul.f32 %v3626_v37, %v2125_v20  ;;  %3631 = vtanh.f32 %v2117_v57  ;;  %v2178_v57 = vrot.slane %v4985_v48, 6  ;;  %vm2152_vm2 = vcmp.eq.f32.partialorder %v2151_v22, 8.507059e+37 }
 0x6e3   :  { %v5362_v48 = vmov 0.0  }
 0x6e4   :  { %v3628_v63 = vpop.eup %3627  ;;  %v2127_v53 = vadd.f32 %v3626_v37, %v2126_v15 }
 0x6e5   :  { %v3630_v29 = vpop.eup %3629  ;;  %v2143_v44 = vmul.f32 %v3628_v63, %v2141_v23  ;;  %v2088_v59 = vpop.f32.mrf.mxu3  ;;  %vm2148_vm14 = vweird.f32 %v3628_v63 }
 0x6e6   :  { %v2161_v12 = vadd.f32 1.0, %v3630_v29  ;;  %v2131_v26 = vsel %vm2130_vm13, %v3626_v37, %v2127_v53  ;;  %vm2149_vm1 = vmor %vm2147_vm15, %vm2148_vm14  ;;  %v5081_v37 = vld [vmem:[%s5280_s7] sm:$0x3] }
 0x6e7   :  { %v2144_v16 = vsub.f32 1.0, %v2143_v44  ;;  %v2136_v20 = vsel %vm2133_vm0, %v2135_v40, %v2131_v26  ;;  %vm2202_vm3 = vcmp.gt.s32.totalorder %v5081_v37, 4  ;;  %vm2348_vm4 = vcmp.gt.s32.totalorder %v5081_v37, 5 }
 0x6e8   :  { %3633 = vrcp.f32 %v2161_v12  ;;  %v3632_v33 = vpop.eup %3631  ;;  %v3384_v49 = vsel %vm2348_vm4, 1.0, %v5362_v48  ;;  %v2173_v58 = vand.u32 2147483648, %v2161_v12  ;;  %v2171_v26 = vand.u32 2147483647, %v2161_v12 }
 0x6e9   :  { %v2145_v8 = vmul.f32 %v3628_v63, %v2144_v16  ;;  %v2181_v16 = vmul.f32 %v3632_v33, %v2136_v20  ;;  %vm2167_vm6 = vweird.f32 %v2161_v12 }
 0x6ea   :  { %v2174_v40 = vor.u32 1.1754944e-38, %v2173_v58  ;;  %vm2172_vm8 = vcmp.eq.f32.partialorder %v2171_v26, 8.507059e+37 }
 0x6eb   :  { %v2146_v21 = vadd.f32 %v3628_v63, %v2145_v8 }
 0x6ed   :  { %v2150_v15 = vsel %vm2149_vm1, %v3628_v63, %v2146_v21  ;;  %v3380_v63 = vsel %vm2202_vm3, 1.0, %v5362_v48 }
 0x6ee   :  { %v3634_v11 = vpop.eup %3633  ;;  %v2155_v29 = vsel %vm2152_vm2, %v2154_v0, %v2150_v15  ;;  %v3542_v25 = vpack.i.bf16 %v3384_v49, %v3380_v63  ;;  %v5365_v63 = vld [vmem:[#allocation10_spill] sm:$0xff] }
 0x6ef   :  { %v2163_v44 = vmul.f32 %v3634_v11, %v2161_v12  ;;  %v2180_v59 = vmul.f32 %v2178_v57, %v2155_v29  ;;  %vm2168_vm5 = vweird.f32 %v3634_v11  ;;  %v5363_v12 = vld [vmem:[#allocation12_spill] sm:$0xff]  ;;  %v5366_v49 = vld [vmem:[#allocation14_spill] sm:$0xff] }
 0x6f0   :  { %3543 = vperm.xlu2 %3541, %v3542_v25   ;;  %vm2169_vm7 = vmor %vm2167_vm6, %vm2168_vm5  ;;  %v5139_v58 = vadd.f32 %v5366_v49, %v5365_v63  ;;  %v5367_v63 = vld [vmem:[#allocation16_spill] sm:$0xff] }
 0x6f1   :  { %v2164_v23 = vsub.f32 1.0, %v2163_v44  ;;  %v5085_v53 = vadd.f32 %v2181_v16, %v2180_v59  ;;  %v5368_v49 = vld [vmem:[#allocation20_spill] sm:$0xff] }
 0x6f3   :  { %v2165_v8 = vmul.f32 %v3634_v11, %v2164_v23  ;;  %3635 = vtanh.f32 %v5085_v53 }
 0x6f5   :  { %v2166_v22 = vadd.f32 %v3634_v11, %v2165_v8 }
 0x6f7   :  { %v2170_v21 = vsel %vm2169_vm7, %v3634_v11, %v2166_v22  ;;  %v5364_v11 = vld [vmem:[#allocation15_spill] sm:$0xff]  ;;  %v5145_v22 = vld [vmem:[%s5288_s12] ss:$0 sm:$0xff] }
 0x6f8   :  { %v2175_v33 = vsel %vm2172_vm8, %v2174_v40, %v2170_v21  ;;  %v5132_v29 = vadd.f32 %v5364_v11, %v5363_v12 }
 0x6f9   :  { %v3636_v0 = vpop.eup %3635 }
 0x6fa   :  { %v2184_v20 = vmul.f32 %v3636_v0, %v2175_v33 }
 0x6fc   :  { %v2185_v57 = vpack.c.bf16 %v2184_v20, %v2184_v20 }
 0x6fe   :  { %v2187_v15 = vrot.slane %v2185_v57, 3 }
 0x700   :  { %2197 = vmatmul.bf16.vlgmr.msrb.gmra.mxu2 %v2187_v15  ;;  %2220 = vmatmul.bf16.vlgmr.msrb.gmra.mxu3 %v2187_v15 }
 0x701   :  { %2233 = vmatmul.bf16.vlgmr.msra.gmra.mxu1 %v2187_v15  ;;  %2358 = vmatpush.bf16.msrb.mxu2 %v4354_v27 }
 0x702   :  { %2371 = vmatpush.bf16.msrb.mxu3 %v4511_v7  ;;  %2384 = vmatpush.bf16.msra.mxu1 %v4513_v17 }
 0x705   :  { %2359 = vmatpush.bf16.msrb.mxu2 %v4373_v34 }
 0x706   :  { %2372 = vmatpush.bf16.msrb.mxu3 %v4539_v24  ;;  %2385 = vmatpush.bf16.msra.mxu1 %v4541_v28 }
 0x709   :  { %2360 = vmatpush.bf16.msrb.mxu2 %v4393_v43 }
 0x70a   :  { %2373 = vmatpush.bf16.msrb.mxu3 %v4564_v31  ;;  %2386 = vmatpush.bf16.msra.mxu1 %v4566_v35 }
 0x70d   :  { %2361 = vmatpush.bf16.msrb.mxu2 %v4413_v51 }
 0x70e   :  { %2374 = vmatpush.bf16.msrb.mxu3 %v4584_v18  ;;  %2387 = vmatpush.bf16.msra.mxu1 %v4586_v47 }
 0x710   :  { %2246 = vmatmul.bf16.vlgmr.msra.gmra.mxu2 %v2187_v15  ;;  %2259 = vmatmul.bf16.vlgmr.msra.gmra.mxu3 %v2187_v15 }
 0x711   :  { %2362 = vmatpush.bf16.msrb.mxu2 %v4435_v62 }
 0x712   :  { %2375 = vmatpush.bf16.msrb.mxu3 %v4604_v56  ;;  %2388 = vmatpush.bf16.msra.mxu1 %v4606_v45 }
 0x715   :  { %2363 = vmatpush.bf16.msrb.mxu2 %v4457_v6 }
 0x716   :  { %2376 = vmatpush.bf16.msrb.mxu3 %v4624_v61  ;;  %2389 = vmatpush.bf16.msra.mxu1 %v4626_v2 }
 0x719   :  { %2364 = vmatpush.bf16.msrb.mxu2 %v4477_v5 }
 0x71a   :  { %2377 = vmatpush.bf16.msrb.mxu3 %v4644_v9  ;;  %2390 = vmatpush.bf16.msra.mxu1 %v4646_v14 }
 0x71d   :  { %2365 = vmatpush.bf16.msrb.mxu2 %v4509_v4 }
 0x71e   :  { %2378 = vmatpush.bf16.msrb.mxu3 %v4664_v38  ;;  %2391 = vmatpush.bf16.msra.mxu1 %v4666_v41 }
 0x721   :  { %2397 = vmatpush.bf16.msra.mxu2 %v4369_v32 }
 0x722   :  { %2496 = vmatpush.bf16.msra.mxu3 %v5016_v46 }
 0x725   :  { %2398 = vmatpush.bf16.msra.mxu2 %v4389_v42 }
 0x726   :  { %2497 = vmatpush.bf16.msra.mxu3 %v5023_v1 }
 0x729   :  { %2399 = vmatpush.bf16.msra.mxu2 %v4409_v50 }
 0x72a   :  { %2498 = vmatpush.bf16.msra.mxu3 %v5030_v36 }
 0x72d   :  { %2400 = vmatpush.bf16.msra.mxu2 %v4431_v60 }
 0x72e   :  { %2499 = vmatpush.bf16.msra.mxu3 %v5037_v55 }
 0x731   :  { %2401 = vmatpush.bf16.msra.mxu2 %v4453_v3 }
 0x732   :  { %2500 = vmatpush.bf16.msra.mxu3 %v5044_v10 }
 0x735   :  { %2402 = vmatpush.bf16.msra.mxu2 %v4473_v13 }
 0x736   :  { %2501 = vmatpush.bf16.msra.mxu3 %v5051_v30 }
 0x739   :  { %2403 = vmatpush.bf16.msra.mxu2 %v4505_v54 }
 0x73a   :  { %2502 = vmatpush.bf16.msra.mxu3 %v5058_v39 }
 0x73d   :  { %2404 = vmatpush.bf16.msra.mxu2 %v4557_v52 }
 0x73e   :  { %2503 = vmatpush.bf16.msra.mxu3 %v5065_v19 }
 0x74a   :  { %v5135_v16 = vpop.permute.xlu2 %3543 }
 0x74b   :  { %v3545_v25 = vunpack.i.l.bf16 %v5135_v16 }
 0x77e   :  { %v2234_v44 = vpop.f32.mrf.mxu1 }
 0x77f   :  { %v2265_v59 = vadd.f32 %v2234_v44, %v5132_v29 }
 0x781   :  { %v3382_v23 = vmul.f32 -1.442695, %v2265_v59 }
 0x783   :  { %3637 = vpow2.f32 %v3382_v23  ;;  %v2198_v8 = vpop.f32.mrf.mxu2  ;;  %v2221_v26 = vpop.f32.mrf.mxu3 }
 0x784   :  { %v2199_v40 = vadd.f32 %v5145_v22, %v2198_v8  ;;  %v2264_v21 = vadd.f32 %v2221_v26, %v5139_v58  ;;  %v5154_v8 = vadd.f32 %v5368_v49, %v5367_v63 }
 0x786   :  { %v2210_v33 = vmul.f32 %v3545_v25, %v2199_v40  ;;  %v3381_v0 = vmul.f32 -1.442695, %v2264_v21  ;;  %v2236_v20 = vpop.f32.mrf.mxu1 }
 0x787   :  { %v5370_v20 = vld [vmem:[#allocation21_spill] sm:$0xff] }
 0x788   :  { %2211 = vst [vmem:[%s5289_s13 + $0x8] sm:$0x3] %v2210_v33  ;;  %3639 = vpow2.f32 %v3381_v0  ;;  %v5369_v0 = vld [vmem:[#allocation18_spill] sm:$0xff] }
 0x789   :  { %v3638_v57 = vpop.eup %3637 }
 0x78a   :  { %v2290_v15 = vadd.f32 1.0, %v3638_v57  ;;  %v5159_v57 = vadd.f32 %v5370_v20, %v5369_v0 }
 0x78b   :  { %v2200_v12 = vpop.f32.mrf.mxu2  ;;  %v2223_v11 = vpop.f32.mrf.mxu3 }
 0x78c   :  { %3641 = vrcp.f32 %v2290_v15  ;;  %v2302_v63 = vand.u32 2147483648, %v2290_v15  ;;  %vm2296_vm11 = vweird.f32 %v2290_v15  ;;  %v2300_v0 = vand.u32 2147483647, %v2290_v15 }
 0x78e   :  { %v3640_v44 = vpop.eup %3639  ;;  %vm2301_vm0 = vcmp.eq.f32.partialorder %v2300_v0, 8.507059e+37 }
 0x78f   :  { %v2271_v59 = vadd.f32 1.0, %v3640_v44 }
 0x791   :  { %3643 = vrcp.f32 %v2271_v59  ;;  %v2283_v49 = vand.u32 2147483648, %v2271_v59  ;;  %vm2277_vm13 = vweird.f32 %v2271_v59 }
 0x792   :  { %v3642_v23 = vpop.eup %3641 }
 0x793   :  { %v2292_v25 = vmul.f32 %v3642_v23, %v2290_v15  ;;  %v2247_v26 = vpop.f32.mrf.mxu2  ;;  %v2260_v40 = vpop.f32.mrf.mxu3  ;;  %vm2297_vm9 = vweird.f32 %v3642_v23 }
 0x794   :  { %v2267_v21 = vadd.f32 %v2260_v40, %v5154_v8  ;;  %v2266_v54 = vadd.f32 %v2247_v26, %v5159_v57  ;;  %vm2298_vm12 = vmor %vm2296_vm11, %vm2297_vm9  ;;  %v2284_v26 = vor.u32 1.1754944e-38, %v2283_v49 }
 0x795   :  { %v2293_v33 = vsub.f32 1.0, %v2292_v25  ;;  %v2281_v25 = vand.u32 2147483647, %v2271_v59 }
 0x796   :  { %v3383_v12 = vmul.f32 -1.442695, %v2267_v21 }
 0x797   :  { %v3644_v11 = vpop.eup %3643  ;;  %v2294_v52 = vmul.f32 %v3642_v23, %v2293_v33  ;;  %vm2282_vm15 = vcmp.eq.f32.partialorder %v2281_v25, 8.507059e+37 }
 0x798   :  { %v2273_v44 = vmul.f32 %v3644_v11, %v2271_v59  ;;  %3645 = vpow2.f32 %v3383_v12  ;;  %vm2278_vm10 = vweird.f32 %v3644_v11 }
 0x799   :  { %v2295_v3 = vadd.f32 %v3642_v23, %v2294_v52  ;;  %3647 = vtanh.f32 %v2266_v54  ;;  %vm2279_vm14 = vmor %vm2277_vm13, %vm2278_vm10  ;;  %vm2509_vm13 = vcmp.gt.s32.totalorder %v5081_v37, 6 }
 0x79a   :  { %v2274_v13 = vsub.f32 1.0, %v2273_v44  ;;  %v2303_v44 = vor.u32 1.1754944e-38, %v2302_v63 }
 0x79b   :  { %v2249_v60 = vpop.f32.mrf.mxu2  ;;  %v2262_v50 = vpop.f32.mrf.mxu3  ;;  %v2299_v20 = vsel %vm2298_vm12, %v3642_v23, %v2295_v3 }
 0x79c   :  { %v2275_v40 = vmul.f32 %v3644_v11, %v2274_v13  ;;  %v2304_v60 = vsel %vm2301_vm0, %v2303_v44, %v2299_v20  ;;  %v2327_v13 = vrot.slane %v5085_v53, 6 }
 0x79e   :  { %v3646_v21 = vpop.eup %3645  ;;  %v2276_v33 = vadd.f32 %v3644_v11, %v2275_v40  ;;  %v2329_v15 = vmul.f32 %v2327_v13, %v2304_v60 }
 0x79f   :  { %v2310_v12 = vadd.f32 1.0, %v3646_v21  ;;  %v3648_v50 = vpop.eup %3647 }
 0x7a0   :  { %v2280_v42 = vsel %vm2279_vm14, %v3644_v11, %v2276_v33  ;;  %vm2670_vm14 = vcmp.gt.s32.totalorder %v5081_v37, 7 }
 0x7a1   :  { %v2285_v52 = vsel %vm2282_vm15, %v2284_v26, %v2280_v42  ;;  %3649 = vrcp.f32 %v2310_v12  ;;  %v2322_v3 = vand.u32 2147483648, %v2310_v12  ;;  %v2320_v11 = vand.u32 2147483647, %v2310_v12 }
 0x7a2   :  { %v2330_v54 = vmul.f32 %v3648_v50, %v2285_v52  ;;  %vm2316_vm2 = vweird.f32 %v2310_v12 }
 0x7a3   :  { %v2323_v63 = vor.u32 1.1754944e-38, %v2322_v3  ;;  %vm2321_vm4 = vcmp.eq.f32.partialorder %v2320_v11, 8.507059e+37 }
 0x7a4   :  { %v5163_v48 = vadd.f32 %v2330_v54, %v2329_v15 }
 0x7a6   :  { %3651 = vtanh.f32 %v5163_v48 }
 0x7a7   :  { %v3650_v32 = vpop.eup %3649 }
 0x7a8   :  { %v2312_v59 = vmul.f32 %v3650_v32, %v2310_v12  ;;  %vm2317_vm1 = vweird.f32 %v3650_v32 }
 0x7a9   :  { %vm2318_vm3 = vmor %vm2316_vm2, %vm2317_vm1 }
 0x7aa   :  { %v2313_v40 = vsub.f32 1.0, %v2312_v59 }
 0x7ac   :  { %v2314_v23 = vmul.f32 %v3650_v32, %v2313_v40  ;;  %v3652_v53 = vpop.eup %3651 }
 0x7ae   :  { %v2315_v42 = vadd.f32 %v3650_v32, %v2314_v23 }
 0x7b0   :  { %v2319_v49 = vsel %vm2318_vm3, %v3650_v32, %v2315_v42 }
 0x7b1   :  { %v2324_v25 = vsel %vm2321_vm4, %v2323_v63, %v2319_v49 }
 0x7b2   :  { %v2333_v0 = vmul.f32 %v3652_v53, %v2324_v25 }
 0x7b4   :  { %v2334_v21 = vpack.c.bf16 %v2333_v0, %v2333_v0 }
 0x7b6   :  { %2343 = vmatmul.bf16.vlgmr.msrb.gmra.mxu1 %v2334_v21  ;;  %2366 = vmatmul.bf16.vlgmr.msrb.gmra.mxu2 %v2334_v21 }
 0x7b7   :  { %2379 = vmatmul.bf16.vlgmr.msrb.gmra.mxu3 %v2334_v21  ;;  %2519 = vmatpush.bf16.msrb.mxu1 %v4354_v27 }
 0x7b8   :  { %2532 = vmatpush.bf16.msrb.mxu2 %v4511_v7  ;;  %2545 = vmatpush.bf16.msrb.mxu3 %v4513_v17 }
 0x7bb   :  { %2520 = vmatpush.bf16.msrb.mxu1 %v4373_v34 }
 0x7bc   :  { %2533 = vmatpush.bf16.msrb.mxu2 %v4539_v24  ;;  %2546 = vmatpush.bf16.msrb.mxu3 %v4541_v28 }
 0x7bf   :  { %2521 = vmatpush.bf16.msrb.mxu1 %v4393_v43 }
 0x7c0   :  { %2534 = vmatpush.bf16.msrb.mxu2 %v4564_v31  ;;  %2547 = vmatpush.bf16.msrb.mxu3 %v4566_v35 }
 0x7c3   :  { %2522 = vmatpush.bf16.msrb.mxu1 %v4413_v51 }
 0x7c4   :  { %2535 = vmatpush.bf16.msrb.mxu2 %v4584_v18  ;;  %2548 = vmatpush.bf16.msrb.mxu3 %v4586_v47 }
 0x7c6   :  { %2392 = vmatmul.bf16.vlgmr.msra.gmra.mxu1 %v2334_v21  ;;  %2405 = vmatmul.bf16.vlgmr.msra.gmra.mxu2 %v2334_v21 }
 0x7c7   :  { %2523 = vmatpush.bf16.msrb.mxu1 %v4435_v62 }
 0x7c8   :  { %2536 = vmatpush.bf16.msrb.mxu2 %v4604_v56  ;;  %2549 = vmatpush.bf16.msrb.mxu3 %v4606_v45 }
 0x7cb   :  { %2524 = vmatpush.bf16.msrb.mxu1 %v4457_v6 }
 0x7cc   :  { %2537 = vmatpush.bf16.msrb.mxu2 %v4624_v61  ;;  %2550 = vmatpush.bf16.msrb.mxu3 %v4626_v2 }
 0x7cf   :  { %2525 = vmatpush.bf16.msrb.mxu1 %v4477_v5 }
 0x7d0   :  { %2538 = vmatpush.bf16.msrb.mxu2 %v4644_v9  ;;  %2551 = vmatpush.bf16.msrb.mxu3 %v4646_v14 }
 0x7d3   :  { %2526 = vmatpush.bf16.msrb.mxu1 %v4509_v4 }
 0x7d4   :  { %2539 = vmatpush.bf16.msrb.mxu2 %v4664_v38  ;;  %2552 = vmatpush.bf16.msrb.mxu3 %v4666_v41 }
 0x7d7   :  { %2657 = vmatpush.bf16.msra.mxu1 %v5016_v46 }
 0x7d8   :  { %2680 = vmatpush.bf16.msra.mxu2 %v4354_v27  ;;  %v3546_v27 = vunpack.i.h.bf16 %v5135_v16 }
 0x7db   :  { %2658 = vmatpush.bf16.msra.mxu1 %v5023_v1 }
 0x7dc   :  { %2681 = vmatpush.bf16.msra.mxu2 %v4373_v34 }
 0x7df   :  { %2659 = vmatpush.bf16.msra.mxu1 %v5030_v36 }
 0x7e0   :  { %2682 = vmatpush.bf16.msra.mxu2 %v4393_v43 }
 0x7e3   :  { %2660 = vmatpush.bf16.msra.mxu1 %v5037_v55 }
 0x7e4   :  { %2683 = vmatpush.bf16.msra.mxu2 %v4413_v51 }
 0x7e7   :  { %2661 = vmatpush.bf16.msra.mxu1 %v5044_v10 }
 0x7e8   :  { %2684 = vmatpush.bf16.msra.mxu2 %v4435_v62 }
 0x7eb   :  { %2662 = vmatpush.bf16.msra.mxu1 %v5051_v30 }
 0x7ec   :  { %2685 = vmatpush.bf16.msra.mxu2 %v4457_v6 }
 0x7ef   :  { %2663 = vmatpush.bf16.msra.mxu1 %v5058_v39 }
 0x7f0   :  { %2686 = vmatpush.bf16.msra.mxu2 %v4477_v5 }
 0x7f3   :  { %2664 = vmatpush.bf16.msra.mxu1 %v5065_v19 }
 0x7f4   :  { %2687 = vmatpush.bf16.msra.mxu2 %v4509_v4 }
 0x833   :  { %v2344_v32 = vpop.f32.mrf.mxu1 }
 0x834   :  { %v2345_v34 = vadd.f32 %v5145_v22, %v2344_v32 }
 0x836   :  { %v2356_v43 = vmul.f32 %v3546_v27, %v2345_v34 }
 0x838   :  { %2357 = vst [vmem:[%s5289_s13 + $0xa] sm:$0x3] %v2356_v43 }
 0x839   :  { %v2367_v51 = vpop.f32.mrf.mxu2 }
 0x83a   :  { %v2414_v62 = vrot.slane %v2367_v51, 6  ;;  %v2380_v6 = vpop.f32.mrf.mxu3 }
 0x83b   :  { %v2415_v17 = vrot.slane %v2380_v6, 6  ;;  %v2346_v28 = vpop.f32.mrf.mxu1 }
 0x83c   :  { %v2422_v5 = vadd.f32 %v2414_v62, %v5139_v58  ;;  %v2485_v28 = vrot.slane %v5163_v48, 6 }
 0x83d   :  { %v2423_v35 = vadd.f32 %v2415_v17, %v5132_v29 }
 0x83e   :  { %v3385_v4 = vmul.f32 -1.442695, %v2422_v5 }
 0x83f   :  { %v3386_v47 = vmul.f32 -1.442695, %v2423_v35 }
 0x840   :  { %3653 = vpow2.f32 %v3385_v4 }
 0x841   :  { %3655 = vpow2.f32 %v3386_v47  ;;  %v2369_v45 = vpop.f32.mrf.mxu2 }
 0x842   :  { %v2382_v2 = vpop.f32.mrf.mxu3 }
 0x843   :  { %v2393_v14 = vpop.f32.mrf.mxu1 }
 0x844   :  { %v2416_v52 = vrot.slane %v2393_v14, 6 }
 0x846   :  { %v3654_v41 = vpop.eup %3653  ;;  %v2424_v40 = vadd.f32 %v2416_v52, %v5159_v57 }
 0x847   :  { %v3656_v16 = vpop.eup %3655  ;;  %v2429_v33 = vadd.f32 1.0, %v3654_v41  ;;  %v5371_v41 = vmov 0.0  }
 0x848   :  { %v2448_v26 = vadd.f32 1.0, %v3656_v16  ;;  %v3388_v16 = vsel %vm2509_vm13, 1.0, %v5371_v41 }
 0x849   :  { %3657 = vrcp.f32 %v2429_v33  ;;  %v2406_v20 = vpop.f32.mrf.mxu2  ;;  %v2441_v42 = vand.u32 2147483648, %v2429_v33  ;;  %v2439_v53 = vand.u32 2147483647, %v2429_v33  ;;  %vm2435_vm7 = vweird.f32 %v2429_v33 }
 0x84a   :  { %3659 = vrcp.f32 %v2448_v26  ;;  %v2417_v12 = vrot.slane %v2406_v20, 6  ;;  %v2460_v63 = vand.u32 2147483648, %v2448_v26  ;;  %v2458_v0 = vand.u32 2147483647, %v2448_v26 }
 0x84b   :  { %v2395_v44 = vpop.f32.mrf.mxu1  ;;  %vm2454_vm8 = vweird.f32 %v2448_v26  ;;  %v2442_v32 = vor.u32 1.1754944e-38, %v2441_v42  ;;  %vm2440_vm11 = vcmp.eq.f32.partialorder %v2439_v53, 8.507059e+37 }
 0x84c   :  { %v2425_v50 = vadd.f32 %v2417_v12, %v5154_v8  ;;  %v2461_v43 = vor.u32 1.1754944e-38, %v2460_v63  ;;  %vm2459_vm12 = vcmp.eq.f32.partialorder %v2458_v0, 8.507059e+37 }
 0x84e   :  { %v3387_v13 = vmul.f32 -1.442695, %v2425_v50 }
 0x84f   :  { %v3658_v60 = vpop.eup %3657 }
 0x850   :  { %v3660_v54 = vpop.eup %3659  ;;  %v2431_v15 = vmul.f32 %v3658_v60, %v2429_v33  ;;  %3661 = vpow2.f32 %v3387_v13  ;;  %vm2436_vm5 = vweird.f32 %v3658_v60  ;;  %v3392_v33 = vsel %vm2670_vm14, 1.0, %v5371_v41 }
 0x851   :  { %v2450_v59 = vmul.f32 %v3660_v54, %v2448_v26  ;;  %v2408_v3 = vpop.f32.mrf.mxu2  ;;  %vm2455_vm6 = vweird.f32 %v3660_v54  ;;  %3663 = vtanh.f32 %v2424_v40  ;;  %vm2437_vm9 = vmor %vm2435_vm7, %vm2436_vm5  ;;  %v3547_v20 = vpack.i.bf16 %v3392_v33, %v3388_v16  ;;  %v5372_v40 = vld [vmem:[#allocation2_spill] sm:$0xff] }
 0x852   :  { %v2432_v23 = vsub.f32 1.0, %v2431_v15  ;;  %vm2456_vm10 = vmor %vm2454_vm8, %vm2455_vm6  ;;  %v5373_v3 = vld [vmem:[#allocation3_spill] sm:$0xff] }
 0x853   :  { %v2451_v11 = vsub.f32 1.0, %v2450_v59  ;;  %3548 = vperm.xlu2 %3541, %v3547_v20  }
 0x854   :  { %v2433_v49 = vmul.f32 %v3658_v60, %v2432_v23  ;;  %v5374_v23 = vld [vmem:[#allocation4_spill] sm:$0xff] }
 0x855   :  { %v2452_v25 = vmul.f32 %v3660_v54, %v2451_v11  ;;  %v5375_v11 = vld [vmem:[#allocation5_spill] sm:$0xff] }
 0x856   :  { %v2434_v21 = vadd.f32 %v3658_v60, %v2433_v49  ;;  %v3662_v27 = vpop.eup %3661 }
 0x857   :  { %v2453_v34 = vadd.f32 %v3660_v54, %v2452_v25  ;;  %v2468_v62 = vadd.f32 1.0, %v3662_v27  ;;  %v3664_v35 = vpop.eup %3663 }
 0x858   :  { %v2438_v51 = vsel %vm2437_vm9, %v3658_v60, %v2434_v21 }
 0x859   :  { %v2443_v6 = vsel %vm2440_vm11, %v2442_v32, %v2438_v51  ;;  %v2457_v17 = vsel %vm2456_vm10, %v3660_v54, %v2453_v34  ;;  %3665 = vrcp.f32 %v2468_v62  ;;  %v2480_v48 = vand.u32 2147483648, %v2468_v62 }
 0x85a   :  { %v2462_v5 = vsel %vm2459_vm12, %v2461_v43, %v2457_v17  ;;  %v2488_v47 = vmul.f32 %v3664_v35, %v2443_v6  ;;  %v2478_v44 = vand.u32 2147483647, %v2468_v62  ;;  %vm2474_vm0 = vweird.f32 %v2468_v62 }
 0x85b   :  { %v2487_v4 = vmul.f32 %v2485_v28, %v2462_v5  ;;  %v2481_v50 = vor.u32 1.1754944e-38, %v2480_v48 }
 0x85c   :  { %vm2479_vm2 = vcmp.eq.f32.partialorder %v2478_v44, 8.507059e+37 }
 0x85d   :  { %v5216_v2 = vadd.f32 %v2488_v47, %v2487_v4 }
 0x85f   :  { %v3666_v45 = vpop.eup %3665  ;;  %3667 = vtanh.f32 %v5216_v2 }
 0x860   :  { %v2470_v14 = vmul.f32 %v3666_v45, %v2468_v62  ;;  %vm2475_vm15 = vweird.f32 %v3666_v45 }
 0x861   :  { %vm2476_vm1 = vmor %vm2474_vm0, %vm2475_vm15 }
 0x862   :  { %v2471_v26 = vsub.f32 1.0, %v2470_v14 }
 0x864   :  { %v2472_v12 = vmul.f32 %v3666_v45, %v2471_v26 }
 0x865   :  { %v3668_v37 = vpop.eup %3667 }
 0x866   :  { %v2473_v52 = vadd.f32 %v3666_v45, %v2472_v12 }
 0x868   :  { %v2477_v60 = vsel %vm2476_vm1, %v3666_v45, %v2473_v52 }
 0x869   :  { %v2482_v13 = vsel %vm2479_vm2, %v2481_v50, %v2477_v60 }
 0x86a   :  { %v2491_v54 = vmul.f32 %v3668_v37, %v2482_v13 }
 0x86c   :  { %v2492_v15 = vpack.c.bf16 %v2491_v54, %v2491_v54 }
 0x86e   :  { %v2494_v59 = vrot.slane %v2492_v15, 1 }
 0x870   :  { %2504 = vmatmul.bf16.vlgmr.msra.gmra.mxu3 %v2494_v59  ;;  %2527 = vmatmul.bf16.vlgmr.msrb.gmra.mxu1 %v2494_v59 }
 0x871   :  { %2540 = vmatmul.bf16.vlgmr.msrb.gmra.mxu2 %v2494_v59  ;;  %2566 = vmatmul.bf16.vlgmr.msrb.gmra.mxu0 %v2494_v59 }
 0x872   :  { %2693 = vmatpush.bf16.msra.mxu3 %v4511_v7  ;;  %2719 = vmatpush.bf16.msrb.mxu1 %v5372_v40  ;;  %v5376_v7 = vld [vmem:[#allocation6_spill] sm:$0xff] }
 0x873   :  { %2818 = vmatpush.bf16.msrb.mxu2 %v5016_v46 }
 0x876   :  { %2694 = vmatpush.bf16.msra.mxu3 %v4539_v24  ;;  %2720 = vmatpush.bf16.msrb.mxu1 %v5373_v3  ;;  %v5377_v24 = vld [vmem:[#allocation7_spill] sm:$0xff] }
 0x877   :  { %2819 = vmatpush.bf16.msrb.mxu2 %v5023_v1 }
 0x87a   :  { %2695 = vmatpush.bf16.msra.mxu3 %v4564_v31  ;;  %2721 = vmatpush.bf16.msrb.mxu1 %v5374_v23  ;;  %v5378_v31 = vld [vmem:[#allocation8_spill] sm:$0xff] }
 0x87b   :  { %2820 = vmatpush.bf16.msrb.mxu2 %v5030_v36 }
 0x87e   :  { %2696 = vmatpush.bf16.msra.mxu3 %v4584_v18  ;;  %2722 = vmatpush.bf16.msrb.mxu1 %v5375_v11  ;;  %v5379_v18 = vld [vmem:[#allocation9_spill] sm:$0xff]  ;;  %v2646_v11 = vrot.slane %v5216_v2, 6 }
 0x87f   :  { %2821 = vmatpush.bf16.msrb.mxu2 %v5037_v55 }
 0x880   :  { %2553 = vmatmul.bf16.vlgmr.msrb.gmra.mxu3 %v2494_v59 }
 0x882   :  { %2697 = vmatpush.bf16.msra.mxu3 %v4604_v56  ;;  %2723 = vmatpush.bf16.msrb.mxu1 %v5376_v7 }
 0x883   :  { %2822 = vmatpush.bf16.msrb.mxu2 %v5044_v10 }
 0x886   :  { %2698 = vmatpush.bf16.msra.mxu3 %v4624_v61  ;;  %2724 = vmatpush.bf16.msrb.mxu1 %v5377_v24 }
 0x887   :  { %2823 = vmatpush.bf16.msrb.mxu2 %v5051_v30 }
 0x88a   :  { %2699 = vmatpush.bf16.msra.mxu3 %v4644_v9  ;;  %2725 = vmatpush.bf16.msrb.mxu1 %v5378_v31 }
 0x88b   :  { %2824 = vmatpush.bf16.msrb.mxu2 %v5058_v39 }
 0x88e   :  { %2700 = vmatpush.bf16.msra.mxu3 %v4664_v38  ;;  %2726 = vmatpush.bf16.msrb.mxu1 %v5379_v18 }
 0x88f   :  { %2825 = vmatpush.bf16.msrb.mxu2 %v5065_v19 }
 0x8ad   :  { %v5247_v36 = vpop.permute.xlu2 %3548 }
 0x8ae   :  { %v3550_v30 = vunpack.i.l.bf16 %v5247_v36 }
 0x8ed   :  { %v2528_v56 = vpop.f32.mrf.mxu1 }
 0x8ee   :  { %v2575_v46 = vrot.slane %v2528_v56, 4  ;;  %v2567_v1 = vpop.f32.mrf.mxu0 }
 0x8ef   :  { %v2578_v61 = vrot.slane %v2567_v1, 4 }
 0x8f0   :  { %v2583_v55 = vadd.f32 %v2575_v46, %v5139_v58 }
 0x8f1   :  { %v2586_v9 = vadd.f32 %v2578_v61, %v5154_v8 }
 0x8f2   :  { %v3389_v10 = vmul.f32 -1.442695, %v2583_v55 }
 0x8f3   :  { %v3391_v39 = vmul.f32 -1.442695, %v2586_v9  ;;  %v2505_v42 = vpop.f32.mrf.mxu3 }
 0x8f4   :  { %3669 = vpow2.f32 %v3389_v10  ;;  %v2506_v38 = vadd.f32 %v5145_v22, %v2505_v42  ;;  %v2541_v63 = vpop.f32.mrf.mxu2 }
 0x8f5   :  { %v2576_v19 = vrot.slane %v2541_v63, 4  ;;  %v2530_v49 = vpop.f32.mrf.mxu1  ;;  %3671 = vpow2.f32 %v3391_v39  ;;  %v3551_v63 = vunpack.i.h.bf16 %v5247_v36 }
 0x8f6   :  { %v2517_v53 = vmul.f32 %v3550_v30, %v2506_v38  ;;  %v2569_v25 = vpop.f32.mrf.mxu0 }
 0x8f7   :  { %v2584_v0 = vadd.f32 %v2576_v19, %v5132_v29 }
 0x8f8   :  { %2518 = vst [vmem:[%s5289_s13 + $0xc] sm:$0x3] %v2517_v53 }
 0x8f9   :  { %v3390_v21 = vmul.f32 -1.442695, %v2584_v0 }
 0x8fa   :  { %v3670_v27 = vpop.eup %3669 }
 0x8fb   :  { %v2590_v32 = vadd.f32 1.0, %v3670_v27  ;;  %3673 = vpow2.f32 %v3390_v21  ;;  %v2507_v34 = vpop.f32.mrf.mxu3  ;;  %v3672_v43 = vpop.eup %3671 }
 0x8fc   :  { %v2543_v51 = vpop.f32.mrf.mxu2  ;;  %v2629_v62 = vadd.f32 1.0, %v3672_v43 }
 0x8fd   :  { %3675 = vrcp.f32 %v2590_v32  ;;  %v2602_v12 = vand.u32 2147483648, %v2590_v32  ;;  %vm2596_vm4 = vweird.f32 %v2590_v32  ;;  %v2600_v52 = vand.u32 2147483647, %v2590_v32 }
 0x8fe   :  { %3677 = vrcp.f32 %v2629_v62  ;;  %v2641_v61 = vand.u32 2147483648, %v2629_v62  ;;  %vm2635_vm12 = vweird.f32 %v2629_v62  ;;  %v2639_v55 = vand.u32 2147483647, %v2629_v62 }
 0x8ff   :  { %v2603_v15 = vor.u32 1.1754944e-38, %v2602_v12  ;;  %vm2601_vm8 = vcmp.eq.f32.partialorder %v2600_v52, 8.507059e+37 }
 0x900   :  { %v2642_v10 = vor.u32 1.1754944e-38, %v2641_v61  ;;  %vm2640_vm14 = vcmp.eq.f32.partialorder %v2639_v55, 8.507059e+37 }
 0x901   :  { %v3674_v6 = vpop.eup %3673 }
 0x902   :  { %v2609_v17 = vadd.f32 1.0, %v3674_v6 }
 0x903   :  { %v3676_v28 = vpop.eup %3675  ;;  %v2554_v5 = vpop.f32.mrf.mxu3 }
 0x904   :  { %v2592_v35 = vmul.f32 %v3676_v28, %v2590_v32  ;;  %3679 = vrcp.f32 %v2609_v17  ;;  %v2577_v4 = vrot.slane %v2554_v5, 4  ;;  %v3678_v41 = vpop.eup %3677  ;;  %vm2597_vm3 = vweird.f32 %v3676_v28 }
 0x905   :  { %v2631_v48 = vmul.f32 %v3678_v41, %v2629_v62  ;;  %v2621_v50 = vand.u32 2147483648, %v2609_v17  ;;  %vm2598_vm5 = vmor %vm2596_vm4, %vm2597_vm3  ;;  %v2619_v13 = vand.u32 2147483647, %v2609_v17  ;;  %vm2615_vm7 = vweird.f32 %v2609_v17 }
 0x906   :  { %v2593_v47 = vsub.f32 1.0, %v2592_v35  ;;  %v2585_v45 = vadd.f32 %v2577_v4, %v5159_v57  ;;  %vm2636_vm11 = vweird.f32 %v3678_v41 }
 0x907   :  { %v2632_v54 = vsub.f32 1.0, %v2631_v48  ;;  %v2622_v3 = vor.u32 1.1754944e-38, %v2621_v50  ;;  %vm2620_vm10 = vcmp.eq.f32.partialorder %v2619_v13, 8.507059e+37  ;;  %vm2637_vm13 = vmor %vm2635_vm12, %vm2636_vm11 }
 0x908   :  { %v2594_v14 = vmul.f32 %v3676_v28, %v2593_v47  ;;  %3681 = vtanh.f32 %v2585_v45 }
 0x909   :  { %v2633_v24 = vmul.f32 %v3678_v41, %v2632_v54 }
 0x90a   :  { %v3680_v16 = vpop.eup %3679  ;;  %v2595_v26 = vadd.f32 %v3676_v28, %v2594_v14 }
 0x90b   :  { %v2611_v33 = vmul.f32 %v3680_v16, %v2609_v17  ;;  %v2556_v20 = vpop.f32.mrf.mxu3  ;;  %vm2616_vm6 = vweird.f32 %v3680_v16  ;;  %v2634_v1 = vadd.f32 %v3678_v41, %v2633_v24 }
 0x90c   :  { %v2599_v37 = vsel %vm2598_vm5, %v3676_v28, %v2595_v26  ;;  %vm2617_vm9 = vmor %vm2615_vm7, %vm2616_vm6 }
 0x90d   :  { %v2612_v44 = vsub.f32 1.0, %v2611_v33  ;;  %v2604_v23 = vsel %vm2601_vm8, %v2603_v15, %v2599_v37  ;;  %v2638_v9 = vsel %vm2637_vm13, %v3678_v41, %v2634_v1 }
 0x90e   :  { %v3682_v40 = vpop.eup %3681  ;;  %v2643_v30 = vsel %vm2640_vm14, %v2642_v10, %v2638_v9 }
 0x90f   :  { %v2613_v60 = vmul.f32 %v3680_v16, %v2612_v44  ;;  %v2649_v56 = vmul.f32 %v3682_v40, %v2604_v23 }
 0x911   :  { %v2614_v59 = vadd.f32 %v3680_v16, %v2613_v60 }
 0x913   :  { %v2618_v7 = vsel %vm2617_vm9, %v3680_v16, %v2614_v59 }
 0x914   :  { %v2623_v31 = vsel %vm2620_vm10, %v2622_v3, %v2618_v7 }
 0x915   :  { %v2648_v18 = vmul.f32 %v2646_v11, %v2623_v31 }
 0x917   :  { %v5259_v46 = vadd.f32 %v2649_v56, %v2648_v18 }
 0x919   :  { %3683 = vtanh.f32 %v5259_v46  ;;  %v2807_v24 = vrot.slane %v5259_v46, 6 }
 0x91f   :  { %v3684_v2 = vpop.eup %3683 }
 0x920   :  { %v2652_v39 = vmul.f32 %v3684_v2, %v2643_v30 }
 0x922   :  { %v2653_v42 = vpack.c.bf16 %v2652_v39, %v2652_v39 }
 0x924   :  { %v2655_v38 = vrot.slane %v2653_v42, 2 }
 0x926   :  { %2665 = vmatmul.bf16.vlgmr.msra.gmra.mxu1 %v2655_v38  ;;  %2688 = vmatmul.bf16.vlgmr.msra.gmra.mxu2 %v2655_v38 }
 0x927   :  { %2701 = vmatmul.bf16.vlgmr.msra.gmra.mxu3 %v2655_v38  ;;  %2714 = vmatmul.bf16.vlgmr.msra.gmra.mxu0 %v2655_v38 }
 0x936   :  { %2727 = vmatmul.bf16.vlgmr.msrb.gmra.mxu1 %v2655_v38 }
 0x9a3   :  { %v2666_v19 = vpop.f32.mrf.mxu1 }
 0x9a4   :  { %v2667_v49 = vadd.f32 %v5145_v22, %v2666_v19  ;;  %v2715_v53 = vpop.f32.mrf.mxu0 }
 0x9a6   :  { %v2678_v25 = vmul.f32 %v3551_v63, %v2667_v49 }
 0x9a8   :  { %2679 = vst [vmem:[%s5289_s13 + $0xe] sm:$0x3] %v2678_v25 }
 0x9a9   :  { %v2689_v0 = vpop.f32.mrf.mxu2 }
 0x9aa   :  { %v2736_v21 = vrot.slane %v2689_v0, 2  ;;  %v2702_v27 = vpop.f32.mrf.mxu3 }
 0x9ab   :  { %v2737_v32 = vrot.slane %v2702_v27, 2  ;;  %v2668_v34 = vpop.f32.mrf.mxu1 }
 0x9ac   :  { %v2744_v43 = vadd.f32 %v2736_v21, %v5139_v58  ;;  %v2717_v51 = vpop.f32.mrf.mxu0  ;;  %v2738_v58 = vrot.slane %v2715_v53, 2 }
 0x9ad   :  { %v2745_v62 = vadd.f32 %v2737_v32, %v5132_v29  ;;  %v2837_v32 = vpop.permute.xlu0 %2836 }
 0x9ae   :  { %v3393_v36 = vmul.f32 -1.442695, %v2744_v43  ;;  %v2746_v26 = vadd.f32 %v2738_v58, %v5159_v57 }
 0x9af   :  { %v3394_v6 = vmul.f32 -1.442695, %v2745_v62 }
 0x9b0   :  { %3685 = vpow2.f32 %v3393_v36 }
 0x9b1   :  { %3687 = vpow2.f32 %v3394_v6  ;;  %v2691_v17 = vpop.f32.mrf.mxu2 }
 0x9b2   :  { %v2704_v28 = vpop.f32.mrf.mxu3 }
 0x9b3   :  { %v2728_v5 = vpop.f32.mrf.mxu1 }
 0x9b4   :  { %v2739_v35 = vrot.slane %v2728_v5, 2 }
 0x9b6   :  { %v3686_v4 = vpop.eup %3685  ;;  %v2747_v47 = vadd.f32 %v2739_v35, %v5154_v8 }
 0x9b7   :  { %v3688_v45 = vpop.eup %3687  ;;  %v2751_v14 = vadd.f32 1.0, %v3686_v4 }
 0x9b8   :  { %v2770_v41 = vadd.f32 1.0, %v3688_v45  ;;  %v3395_v16 = vmul.f32 -1.442695, %v2747_v47 }
 0x9b9   :  { %3689 = vrcp.f32 %v2751_v14  ;;  %v2761_v8 = vand.u32 2147483647, %v2751_v14  ;;  %v2763_v60 = vand.u32 2147483648, %v2751_v14  ;;  %vm2757_vm1 = vweird.f32 %v2751_v14 }
 0x9ba   :  { %3691 = vrcp.f32 %v2770_v41  ;;  %v2782_v54 = vand.u32 2147483648, %v2770_v41  ;;  %v2780_v59 = vand.u32 2147483647, %v2770_v41  ;;  %vm2776_vm3 = vweird.f32 %v2770_v41 }
 0x9bb   :  { %3693 = vpow2.f32 %v3395_v16  ;;  %v2730_v29 = vpop.f32.mrf.mxu1  ;;  %v2764_v57 = vor.u32 1.1754944e-38, %v2763_v60  ;;  %vm2762_vm4 = vcmp.eq.f32.partialorder %v2761_v8, 8.507059e+37 }
 0x9bc   :  { %3695 = vtanh.f32 %v2746_v26  ;;  %v2783_v11 = vor.u32 1.1754944e-38, %v2782_v54  ;;  %vm2781_vm6 = vcmp.eq.f32.partialorder %v2780_v59, 8.507059e+37 }
 0x9bf   :  { %v3690_v33 = vpop.eup %3689 }
 0x9c0   :  { %v3692_v20 = vpop.eup %3691  ;;  %v2753_v48 = vmul.f32 %v3690_v33, %v2751_v14  ;;  %vm2758_vm15 = vweird.f32 %v3690_v33 }
 0x9c1   :  { %v3694_v12 = vpop.eup %3693  ;;  %v2772_v44 = vmul.f32 %v3692_v20, %v2770_v41  ;;  %vm2777_vm0 = vweird.f32 %v3692_v20  ;;  %vm2759_vm2 = vmor %vm2757_vm1, %vm2758_vm15 }
 0x9c2   :  { %v2754_v52 = vsub.f32 1.0, %v2753_v48  ;;  %v2790_v50 = vadd.f32 1.0, %v3694_v12  ;;  %vm2778_vm5 = vmor %vm2776_vm3, %vm2777_vm0  ;;  %v3696_v7 = vpop.eup %3695 }
 0x9c3   :  { %v2773_v37 = vsub.f32 1.0, %v2772_v44 }
 0x9c4   :  { %v2755_v13 = vmul.f32 %v3690_v33, %v2754_v52  ;;  %3697 = vrcp.f32 %v2790_v50  ;;  %v2802_v30 = vand.u32 2147483648, %v2790_v50  ;;  %v2800_v42 = vand.u32 2147483647, %v2790_v50 }
 0x9c5   :  { %v2774_v15 = vmul.f32 %v3692_v20, %v2773_v37  ;;  %vm2796_vm8 = vweird.f32 %v2790_v50 }
 0x9c6   :  { %v2756_v40 = vadd.f32 %v3690_v33, %v2755_v13  ;;  %v2803_v63 = vor.u32 1.1754944e-38, %v2802_v30  ;;  %vm2801_vm10 = vcmp.eq.f32.partialorder %v2800_v42, 8.507059e+37 }
 0x9c7   :  { %v2775_v3 = vadd.f32 %v3692_v20, %v2774_v15 }
 0x9c8   :  { %v2760_v23 = vsel %vm2759_vm2, %v3690_v33, %v2756_v40 }
 0x9c9   :  { %v2765_v31 = vsel %vm2762_vm4, %v2764_v57, %v2760_v23  ;;  %v2779_v18 = vsel %vm2778_vm5, %v3692_v20, %v2775_v3 }
 0x9ca   :  { %v3698_v56 = vpop.eup %3697  ;;  %v2810_v1 = vmul.f32 %v3696_v7, %v2765_v31  ;;  %v2784_v61 = vsel %vm2781_vm6, %v2783_v11, %v2779_v18 }
 0x9cb   :  { %v2809_v55 = vmul.f32 %v2807_v24, %v2784_v61  ;;  %v2792_v9 = vmul.f32 %v3698_v56, %v2790_v50  ;;  %vm2797_vm7 = vweird.f32 %v3698_v56 }
 0x9cc   :  { %vm2798_vm9 = vmor %vm2796_vm8, %vm2797_vm7 }
 0x9cd   :  { %v2793_v10 = vsub.f32 1.0, %v2792_v9  ;;  %v2811_v2 = vadd.f32 %v2810_v1, %v2809_v55 }
 0x9cf   :  { %v2794_v39 = vmul.f32 %v3698_v56, %v2793_v10  ;;  %3699 = vtanh.f32 %v2811_v2 }
 0x9d1   :  { %v2795_v38 = vadd.f32 %v3698_v56, %v2794_v39 }
 0x9d3   :  { %v2799_v46 = vsel %vm2798_vm9, %v3698_v56, %v2795_v38 }
 0x9d4   :  { %v2804_v19 = vsel %vm2801_vm10, %v2803_v63, %v2799_v46 }
 0x9d5   :  { %v3700_v49 = vpop.eup %3699 }
 0x9d6   :  { %v2813_v53 = vmul.f32 %v3700_v49, %v2804_v19 }
 0x9d8   :  { %v2814_v25 = vpack.c.bf16 %v2813_v53, %v2813_v53 }
 0x9da   :  { %v2816_v0 = vrot.slane %v2814_v25, 3 }
 0x9dc   :  { %2826 = vmatmul.bf16.vlgmr.msrb.gmra.mxu2 %v2816_v0 }
 0xa5f   :  { %v2827_v21 = vpop.f32.mrf.mxu2 }
 0xa60   :  { %v2828_v27 = vadd.f32 %v5145_v22, %v2827_v21 }
 0xa62   :  { %v2839_v34 = vmul.f32 %v2837_v32, %v2828_v27 }
 0xa64   :  { %2840 = vst [vmem:[%s5289_s13 + $0x10] sm:$0x3] %v2839_v34 }
 0xa67   :  { %v2829_v43 = vpop.f32.mrf.mxu2 }

</bundles_post_ra>
